<compile_context>
chip_gen: v7x
topology: tpu7x:2x2x1
jax: 0.10.0
libtpu: 0.0.40
codegen_flags: <defaults>
</compile_context>

<pallas_src>
import functools

import jax
import jax.numpy as jnp
import numpy as np
from jax import lax
from jax.experimental import pallas as pl
from jax.experimental.pallas import tpu as pltpu

jax.config.update("jax_default_matmul_precision", "highest")


# ----------------------------- Pallas kernel --------------------------------
def _actor_lstm_kernel(
    # inputs (all 2-D, time-major rows for the sequence tensors)
    x_ref,                      # (T*B, F)     LayerNorm input, row = t*B + b
    h0_ref, c0_ref,             # (L*B, H)     initial hidden/cell, rows [0:B]=layer0
    lnf_ref,                    # (2, F)       row0 = weight, row1 = bias
    w_lstm_ref,                 # (F+3H, 4H)   [wih0; whh0; wih1; whh1], cols [i,f,o,g]
    b_lstm_ref,                 # (2, 4H)      row0 = layer0 bias, row1 = layer1 bias
    lnl_ref,                    # (2, H)
    fc1_w_ref, fc1_b_ref,       # (H, H), (1, H)
    fc2_w_ref, fc2_b_ref,       # (H, O), (1, O)
    # outputs
    y_ref,                      # (T*B, O)     row = t*B + b
    hN_ref, cN_ref,             # (L*B, H)
    # scratch
    seq_ref,                    # (T*B, H)     layer-1 outputs, time-major
    *, B, T, F, H,
):
    eps = 1e-5
    f32 = jnp.float32

    def layernorm(x, w, b):
        mu = jnp.mean(x, axis=-1, keepdims=True)
        var = jnp.mean((x - mu) ** 2, axis=-1, keepdims=True)
        return (x - mu) * lax.rsqrt(var + eps) * w + b

    # Unpack the packed LSTM parameter slabs (static, sublane-aligned slices).
    wih0 = w_lstm_ref[0:F, :]
    whh0 = w_lstm_ref[F:F + H, :]
    wih1 = w_lstm_ref[F + H:F + 2 * H, :]
    whh1 = w_lstm_ref[F + 2 * H:F + 3 * H, :]
    b0 = b_lstm_ref[0:1, :]
    b1 = b_lstm_ref[1:2, :]

    # 1) LayerNorm over features + batched layer-0 input projection
    #    (hoisted out of the recurrence: one big MXU matmul, bias pre-summed).
    xn = layernorm(x_ref[...], lnf_ref[0:1, :], lnf_ref[1:2, :])          # (T*B, F)
    gx0 = jnp.dot(xn, wih0, preferred_element_type=f32) + b0              # (T*B, 4H)

    # Gate columns are pre-permuted to [i, f, o, g]:
    #   one sigmoid over the first 3H lanes + one tanh over the last H lanes.
    def cell(gates, c):
        s = jax.nn.sigmoid(gates[:, : 3 * H])
        i = s[:, :H]
        f = s[:, H:2 * H]
        o = s[:, 2 * H:3 * H]
        g = jnp.tanh(gates[:, 3 * H:])
        c_new = f * c + i * g
        h_new = o * jnp.tanh(c_new)
        return h_new, c_new

    # 2) Two stacked LSTM layers fused into a single, fully-unrolled time loop
    #    (T is small and static). Only h @ w_hh remains on the serial chain of
    #    layer 0; layer 1's input projection depends on h_a of the same step
    #    and overlaps with layer 0's next step.
    h_a, c_a = h0_ref[0:B, :], c0_ref[0:B, :]          # layer-0 carry (B, H)
    h_b, c_b = h0_ref[B:2 * B, :], c0_ref[B:2 * B, :]  # layer-1 carry (B, H)

    for t in range(T):
        g0 = gx0[t * B:(t + 1) * B, :] + jnp.dot(h_a, whh0, preferred_element_type=f32)
        h_a, c_a = cell(g0, c_a)

        g1 = (jnp.dot(h_a, wih1, preferred_element_type=f32)
              + jnp.dot(h_b, whh1, preferred_element_type=f32) + b1)
        h_b, c_b = cell(g1, c_b)

        seq_ref[t * B:(t + 1) * B, :] = h_b            # static-index store

    hN_ref[0:B, :] = h_a
    hN_ref[B:2 * B, :] = h_b
    cN_ref[0:B, :] = c_a
    cN_ref[B:2 * B, :] = c_b

    # 3) LayerNorm -> FC1 + ReLU -> FC2 + Tanh on the whole (T*B, H) slab.
    #    (dropout p=0 => identity)
    o = layernorm(seq_ref[...], lnl_ref[0:1, :], lnl_ref[1:2, :])
    x1 = jnp.maximum(
        jnp.dot(o, fc1_w_ref[...], preferred_element_type=f32) + fc1_b_ref[...], 0.0)
    y_ref[...] = jnp.tanh(
        jnp.dot(x1, fc2_w_ref[...], preferred_element_type=f32) + fc2_b_ref[...])


# ------------------------------ wrapper --------------------------------------
def prepare_kernel_params(params):
    """One-time host-side prep: permute gate columns [i,f,g,o]->[i,f,o,g],
    pre-sum input/hidden biases, and pack small parameter tensors into a few
    slabs to minimize per-call DMA count."""
    H = params["whh0"].shape[0]

    def perm(w):
        return jnp.concatenate(
            [w[:, 0:H], w[:, H:2 * H], w[:, 3 * H:4 * H], w[:, 2 * H:3 * H]], axis=1)

    w_lstm = jnp.concatenate(
        [perm(params["wih0"]), perm(params["whh0"]),
         perm(params["wih1"]), perm(params["whh1"])], axis=0)              # (F+3H, 4H)
    b_lstm = jnp.concatenate(
        [perm(params["bih0"] + params["bhh0"]),
         perm(params["bih1"] + params["bhh1"])], axis=0)                   # (2, 4H)
    lnf = jnp.concatenate([params["lnf_w"], params["lnf_b"]], axis=0)      # (2, F)
    lnl = jnp.concatenate([params["lnl_w"], params["lnl_b"]], axis=0)      # (2, H)

    return {
        "lnf": lnf, "w_lstm": w_lstm, "b_lstm": b_lstm, "lnl": lnl,
        "fc1_w": params["fc1_w"], "fc1_b": params["fc1_b"],
        "fc2_w": params["fc2_w"], "fc2_b": params["fc2_b"],
    }


@jax.jit
def actor_lstm_forward(kparams, state, hidden):
    """state: (B, T, F) batch-first; hidden: (h0, c0) each (L=2, B, H)."""
    B, T, F = state.shape
    h0, c0 = hidden
    L, _, H = h0.shape
    assert L == 2, "kernel is specialized to num_layers_lstm=2 (the default)"
    O = kparams["fc2_w"].shape[1]

    # Flat, lane-dense 2-D layouts for the kernel (time-major rows).
    x_tm = jnp.transpose(state.astype(jnp.float32), (1, 0, 2)).reshape(T * B, F)
    h0_2d = h0.astype(jnp.float32).reshape(L * B, H)
    c0_2d = c0.astype(jnp.float32).reshape(L * B, H)

    kernel = functools.partial(_actor_lstm_kernel, B=B, T=T, F=F, H=H)
    n_in = 11
    vmem_spec = pl.BlockSpec(memory_space=pltpu.MemorySpace.VMEM)

    y_tm, hN, cN = pl.pallas_call(
        kernel,
        out_shape=(
            jax.ShapeDtypeStruct((T * B, O), jnp.float32),
            jax.ShapeDtypeStruct((L * B, H), jnp.float32),
            jax.ShapeDtypeStruct((L * B, H), jnp.float32),
        ),
        in_specs=[vmem_spec] * n_in,
        out_specs=(vmem_spec, vmem_spec, vmem_spec),
        scratch_shapes=[pltpu.VMEM((T * B, H), jnp.float32)],
    )(
        x_tm, h0_2d, c0_2d,
        kparams["lnf"], kparams["w_lstm"], kparams["b_lstm"], kparams["lnl"],
        kparams["fc1_w"], kparams["fc1_b"],
        kparams["fc2_w"], kparams["fc2_b"],
    )

    y = jnp.transpose(y_tm.reshape(T, B, O), (1, 0, 2))       # back to (B, T, O)
    return y, (hN.reshape(L, B, H), cN.reshape(L, B, H))


# -------------------------- pure-JAX reference --------------------------------
def _ref_forward(params, state, hidden):
    eps = 1e-5

    def ln(x, w, b):
        mu = jnp.mean(x, axis=-1, keepdims=True)
        var = jnp.mean((x - mu) ** 2, axis=-1, keepdims=True)
        return (x - mu) / jnp.sqrt(var + eps) * w + b

    H = params["whh0"].shape[0]
    x = ln(state, params["lnf_w"], params["lnf_b"])              # (B, T, F)
    h0, c0 = hidden

    def run_layer(x_seq, w_ih, w_hh, b, h, c):
        outs = []
        for t in range(x_seq.shape[1]):
            g = x_seq[:, t] @ w_ih + h @ w_hh + b
            i = jax.nn.sigmoid(g[:, :H])
            f = jax.nn.sigmoid(g[:, H:2 * H])
            gg = jnp.tanh(g[:, 2 * H:3 * H])
            o = jax.nn.sigmoid(g[:, 3 * H:])
            c = f * c + i * gg
            h = o * jnp.tanh(c)
            outs.append(h)
        return jnp.stack(outs, axis=1), h, c

    s0, h_f0, c_f0 = run_layer(x, params["wih0"], params["whh0"],
                               params["bih0"] + params["bhh0"], h0[0], c0[0])
    s1, h_f1, c_f1 = run_layer(s0, params["wih1"], params["whh1"],
                               params["bih1"] + params["bhh1"], h0[1], c0[1])
    out = ln(s1, params["lnl_w"], params["lnl_b"])
    x1 = jnp.maximum(out @ params["fc1_w"] + params["fc1_b"], 0.0)
    y = jnp.tanh(x1 @ params["fc2_w"] + params["fc2_b"])
    hN = jnp.stack([h_f0, h_f1], 0)
    cN = jnp.stack([c_f0, c_f1], 0)
    return y, (hN, cN)


# ------------------------------- params ---------------------------------------
def make_params(key, F, H, O):
    ks = jax.random.split(key, 12)
    u = lambda k, shape, fan: jax.random.uniform(
        k, shape, jnp.float32, -1.0 / jnp.sqrt(fan), 1.0 / jnp.sqrt(fan))
    return {
        "lnf_w": jnp.ones((1, F), jnp.float32),
        "lnf_b": jnp.zeros((1, F), jnp.float32),
        # LSTM weights pre-transposed to (in_dim, 4H), PyTorch gate order i,f,g,o.
        "wih0": u(ks[0], (F, 4 * H), H), "whh0": u(ks[1], (H, 4 * H), H),
        "bih0": u(ks[2], (1, 4 * H), H), "bhh0": u(ks[3], (1, 4 * H), H),
        "wih1": u(ks[4], (H, 4 * H), H), "whh1": u(ks[5], (H, 4 * H), H),
        "bih1": u(ks[6], (1, 4 * H), H), "bhh1": u(ks[7], (1, 4 * H), H),
        "lnl_w": jnp.ones((1, H), jnp.float32),
        "lnl_b": jnp.zeros((1, H), jnp.float32),
        # Linear weights pre-transposed to (in, out).
        "fc1_w": u(ks[8], (H, H), H), "fc1_b": u(ks[9], (1, H), H),
        "fc2_w": u(ks[10], (H, O), H), "fc2_b": u(ks[11], (1, O), H),
    }


if __name__ == "__main__":
    B, T = 2, 8                # batch, past_obs (sequence length)
    F = 16                     # state_shape
    H = 32                     # hidden_size
    O = 8                      # output_size
    L = 2                      # num_layers_lstm

    key = jax.random.PRNGKey(0)
    kp, kx = jax.random.split(key)
    params = make_params(kp, F, H, O)
    kparams = prepare_kernel_params(params)   # one-time gate permutation + packing

    state = jax.random.normal(kx, (B, T, F), jnp.float32)
    # initHidden(batch_size=B)
    h0 = jnp.zeros((L, B, H), jnp.float32)
    c0 = jnp.zeros((L, B, H), jnp.float32)

    y, (hN, cN) = actor_lstm_forward(kparams, state, (h0, c0))
    jax.block_until_ready((y, hN, cN))

    # sanity check against a pure-JAX reference (original PyTorch gate order)
    y_ref, (hN_ref, cN_ref) = _ref_forward(params, state, (h0, c0))
    np.testing.assert_allclose(np.asarray(y), np.asarray(y_ref), atol=2e-3, rtol=2e-3)
    np.testing.assert_allclose(np.asarray(hN), np.asarray(hN_ref), atol=2e-3, rtol=2e-3)
    np.testing.assert_allclose(np.asarray(cN), np.asarray(cN_ref), atol=2e-3, rtol=2e-3)

    assert y.shape == (B, T, O) and hN.shape == (L, B, H) and cN.shape == (L, B, H)
    print("KERNEL_OK")
</pallas_src>

<mosaic_0001>
module attributes {stable_mosaic.version = 11 : i64} {
  func.func @_actor_lstm_kernel(%arg0: memref<16x16xf32, #tpu.memory_space<vmem>>, %arg1: memref<4x32xf32, #tpu.memory_space<vmem>>, %arg2: memref<4x32xf32, #tpu.memory_space<vmem>>, %arg3: memref<2x16xf32, #tpu.memory_space<vmem>>, %arg4: memref<112x128xf32, #tpu.memory_space<vmem>>, %arg5: memref<2x128xf32, #tpu.memory_space<vmem>>, %arg6: memref<2x32xf32, #tpu.memory_space<vmem>>, %arg7: memref<32x32xf32, #tpu.memory_space<vmem>>, %arg8: memref<1x32xf32, #tpu.memory_space<vmem>>, %arg9: memref<32x8xf32, #tpu.memory_space<vmem>>, %arg10: memref<1x8xf32, #tpu.memory_space<vmem>>, %arg11: memref<16x8xf32, #tpu.memory_space<vmem>>, %arg12: memref<4x32xf32, #tpu.memory_space<vmem>>, %arg13: memref<4x32xf32, #tpu.memory_space<vmem>>, %arg14: memref<16x32xf32, #tpu.memory_space<vmem>>) attributes {dimension_semantics = [], scalar_prefetch = 0 : i64, scratch_operands = 1 : i64, tpu.core_type = #tpu.core_type<tc>} {
    %c0 = arith.constant 0 : index
    %c0_0 = arith.constant 0 : index
    %0 = vector.load %arg4[%c0, %c0_0] : memref<112x128xf32, #tpu.memory_space<vmem>>, vector<16x128xf32>
    %c16 = arith.constant 16 : index
    %c0_1 = arith.constant 0 : index
    %1 = vector.load %arg4[%c16, %c0_1] : memref<112x128xf32, #tpu.memory_space<vmem>>, vector<32x128xf32>
    %c48 = arith.constant 48 : index
    %c0_2 = arith.constant 0 : index
    %2 = vector.load %arg4[%c48, %c0_2] : memref<112x128xf32, #tpu.memory_space<vmem>>, vector<32x128xf32>
    %c80 = arith.constant 80 : index
    %c0_3 = arith.constant 0 : index
    %3 = vector.load %arg4[%c80, %c0_3] : memref<112x128xf32, #tpu.memory_space<vmem>>, vector<32x128xf32>
    %c0_4 = arith.constant 0 : index
    %c0_5 = arith.constant 0 : index
    %4 = vector.load %arg5[%c0_4, %c0_5] : memref<2x128xf32, #tpu.memory_space<vmem>>, vector<1x128xf32>
    %c1 = arith.constant 1 : index
    %c0_6 = arith.constant 0 : index
    %5 = vector.load %arg5[%c1, %c0_6] : memref<2x128xf32, #tpu.memory_space<vmem>>, vector<1x128xf32>
    %c0_7 = arith.constant 0 : index
    %c0_8 = arith.constant 0 : index
    %6 = vector.load %arg0[%c0_7, %c0_8] : memref<16x16xf32, #tpu.memory_space<vmem>>, vector<16x16xf32>
    %c0_9 = arith.constant 0 : index
    %c0_10 = arith.constant 0 : index
    %7 = vector.load %arg3[%c0_9, %c0_10] : memref<2x16xf32, #tpu.memory_space<vmem>>, vector<1x16xf32>
    %c1_11 = arith.constant 1 : index
    %c0_12 = arith.constant 0 : index
    %8 = vector.load %arg3[%c1_11, %c0_12] : memref<2x16xf32, #tpu.memory_space<vmem>>, vector<1x16xf32>
    %cst = arith.constant dense<0.000000e+00> : vector<16xf32>
    %9 = vector.multi_reduction <add>, %6, %cst [1] : vector<16x16xf32> to vector<16xf32>
    %10 = vector.shape_cast %9 : vector<16xf32> to vector<16x1xf32>
    %cst_13 = arith.constant 1.600000e+01 : f32
    %11 = vector.broadcast %cst_13 : f32 to vector<16x1xf32>
    %12 = arith.divf %10, %11 : vector<16x1xf32>
    %13 = vector.broadcast %12 : vector<16x1xf32> to vector<16x16xf32>
    %14 = arith.subf %6, %13 : vector<16x16xf32>
    %15 = arith.mulf %14, %14 : vector<16x16xf32>
    %cst_14 = arith.constant dense<0.000000e+00> : vector<16xf32>
    %16 = vector.multi_reduction <add>, %15, %cst_14 [1] : vector<16x16xf32> to vector<16xf32>
    %17 = vector.shape_cast %16 : vector<16xf32> to vector<16x1xf32>
    %cst_15 = arith.constant 1.600000e+01 : f32
    %18 = vector.broadcast %cst_15 : f32 to vector<16x1xf32>
    %19 = arith.divf %17, %18 : vector<16x1xf32>
    %20 = vector.broadcast %12 : vector<16x1xf32> to vector<16x16xf32>
    %21 = arith.subf %6, %20 : vector<16x16xf32>
    %cst_16 = arith.constant 9.99999974E-6 : f32
    %22 = vector.broadcast %cst_16 : f32 to vector<16x1xf32>
    %23 = arith.addf %19, %22 : vector<16x1xf32>
    %24 = math.rsqrt %23 : vector<16x1xf32>
    %25 = vector.broadcast %24 : vector<16x1xf32> to vector<16x16xf32>
    %26 = arith.mulf %21, %25 : vector<16x16xf32>
    %27 = vector.broadcast %7 : vector<1x16xf32> to vector<16x16xf32>
    %28 = arith.mulf %26, %27 : vector<16x16xf32>
    %29 = vector.broadcast %8 : vector<1x16xf32> to vector<16x16xf32>
    %30 = arith.addf %28, %29 : vector<16x16xf32>
    %cst_17 = arith.constant dense<0.000000e+00> : vector<16x128xf32>
    %31 = tpu.matmul %30, %0, %cst_17 {dimension_numbers = #tpu.dot_dimension_numbers<[1], [0], [0], [1], [0, 0, 1, 1], [], []>, precision = #tpu.contract_precision<fp32>} : vector<16x16xf32>, vector<16x128xf32>, vector<16x128xf32> -> vector<16x128xf32>
    %32 = vector.broadcast %4 : vector<1x128xf32> to vector<16x128xf32>
    %33 = arith.addf %31, %32 : vector<16x128xf32>
    %c0_18 = arith.constant 0 : index
    %c0_19 = arith.constant 0 : index
    %34 = vector.load %arg1[%c0_18, %c0_19] : memref<4x32xf32, #tpu.memory_space<vmem>>, vector<2x32xf32>
    %c0_20 = arith.constant 0 : index
    %c0_21 = arith.constant 0 : index
    %35 = vector.load %arg2[%c0_20, %c0_21] : memref<4x32xf32, #tpu.memory_space<vmem>>, vector<2x32xf32>
    %c2 = arith.constant 2 : index
    %c0_22 = arith.constant 0 : index
    %36 = vector.load %arg1[%c2, %c0_22] : memref<4x32xf32, #tpu.memory_space<vmem>>, vector<2x32xf32>
    %c2_23 = arith.constant 2 : index
    %c0_24 = arith.constant 0 : index
    %37 = vector.load %arg2[%c2_23, %c0_24] : memref<4x32xf32, #tpu.memory_space<vmem>>, vector<2x32xf32>
    %38 = vector.extract_strided_slice %33 {offsets = [0, 0], sizes = [2, 128], strides = [1, 1]} : vector<16x128xf32> to vector<2x128xf32>
    %cst_25 = arith.constant dense<0.000000e+00> : vector<2x128xf32>
    %39 = tpu.matmul %34, %1, %cst_25 {dimension_numbers = #tpu.dot_dimension_numbers<[1], [0], [0], [1], [0, 0, 1, 1], [], []>, precision = #tpu.contract_precision<fp32>} : vector<2x32xf32>, vector<32x128xf32>, vector<2x128xf32> -> vector<2x128xf32>
    %40 = arith.addf %38, %39 : vector<2x128xf32>
    %41 = vector.extract_strided_slice %40 {offsets = [0, 0], sizes = [2, 96], strides = [1, 1]} : vector<2x128xf32> to vector<2x96xf32>
    %42 = arith.negf %41 : vector<2x96xf32>
    %43 = math.exp %42 : vector<2x96xf32>
    %cst_26 = arith.constant 1.000000e+00 : f32
    %44 = vector.broadcast %cst_26 : f32 to vector<2x96xf32>
    %45 = arith.addf %44, %43 : vector<2x96xf32>
    %46 = arith.divf %44, %45 : vector<2x96xf32>
    %47 = vector.extract_strided_slice %46 {offsets = [0, 0], sizes = [2, 32], strides = [1, 1]} : vector<2x96xf32> to vector<2x32xf32>
    %48 = vector.extract_strided_slice %46 {offsets = [0, 32], sizes = [2, 32], strides = [1, 1]} : vector<2x96xf32> to vector<2x32xf32>
    %49 = vector.extract_strided_slice %46 {offsets = [0, 64], sizes = [2, 32], strides = [1, 1]} : vector<2x96xf32> to vector<2x32xf32>
    %50 = vector.extract_strided_slice %40 {offsets = [0, 96], sizes = [2, 32], strides = [1, 1]} : vector<2x128xf32> to vector<2x32xf32>
    %51 = math.tanh %50 : vector<2x32xf32>
    %52 = arith.mulf %48, %35 : vector<2x32xf32>
    %53 = arith.mulf %47, %51 : vector<2x32xf32>
    %54 = arith.addf %52, %53 : vector<2x32xf32>
    %55 = math.tanh %54 : vector<2x32xf32>
    %56 = arith.mulf %49, %55 : vector<2x32xf32>
    %cst_27 = arith.constant dense<0.000000e+00> : vector<2x128xf32>
    %57 = tpu.matmul %56, %2, %cst_27 {dimension_numbers = #tpu.dot_dimension_numbers<[1], [0], [0], [1], [0, 0, 1, 1], [], []>, precision = #tpu.contract_precision<fp32>} : vector<2x32xf32>, vector<32x128xf32>, vector<2x128xf32> -> vector<2x128xf32>
    %cst_28 = arith.constant dense<0.000000e+00> : vector<2x128xf32>
    %58 = tpu.matmul %36, %3, %cst_28 {dimension_numbers = #tpu.dot_dimension_numbers<[1], [0], [0], [1], [0, 0, 1, 1], [], []>, precision = #tpu.contract_precision<fp32>} : vector<2x32xf32>, vector<32x128xf32>, vector<2x128xf32> -> vector<2x128xf32>
    %59 = arith.addf %57, %58 : vector<2x128xf32>
    %60 = vector.broadcast %5 : vector<1x128xf32> to vector<2x128xf32>
    %61 = arith.addf %59, %60 : vector<2x128xf32>
    %62 = vector.extract_strided_slice %61 {offsets = [0, 0], sizes = [2, 96], strides = [1, 1]} : vector<2x128xf32> to vector<2x96xf32>
    %63 = arith.negf %62 : vector<2x96xf32>
    %64 = math.exp %63 : vector<2x96xf32>
    %cst_29 = arith.constant 1.000000e+00 : f32
    %65 = vector.broadcast %cst_29 : f32 to vector<2x96xf32>
    %66 = arith.addf %65, %64 : vector<2x96xf32>
    %67 = arith.divf %65, %66 : vector<2x96xf32>
    %68 = vector.extract_strided_slice %67 {offsets = [0, 0], sizes = [2, 32], strides = [1, 1]} : vector<2x96xf32> to vector<2x32xf32>
    %69 = vector.extract_strided_slice %67 {offsets = [0, 32], sizes = [2, 32], strides = [1, 1]} : vector<2x96xf32> to vector<2x32xf32>
    %70 = vector.extract_strided_slice %67 {offsets = [0, 64], sizes = [2, 32], strides = [1, 1]} : vector<2x96xf32> to vector<2x32xf32>
    %71 = vector.extract_strided_slice %61 {offsets = [0, 96], sizes = [2, 32], strides = [1, 1]} : vector<2x128xf32> to vector<2x32xf32>
    %72 = math.tanh %71 : vector<2x32xf32>
    %73 = arith.mulf %69, %37 : vector<2x32xf32>
    %74 = arith.mulf %68, %72 : vector<2x32xf32>
    %75 = arith.addf %73, %74 : vector<2x32xf32>
    %76 = math.tanh %75 : vector<2x32xf32>
    %77 = arith.mulf %70, %76 : vector<2x32xf32>
    %c0_30 = arith.constant 0 : index
    %c0_31 = arith.constant 0 : index
    %78 = vector.load %arg14[%c0_30, %c0_31] : memref<16x32xf32, #tpu.memory_space<vmem>>, vector<2x32xf32>
    tpu.vector_store %arg14[%c0_30, %c0_31], %77 {strides = array<i32>} : memref<16x32xf32, #tpu.memory_space<vmem>>, vector<2x32xf32>,
    %79 = vector.extract_strided_slice %33 {offsets = [2, 0], sizes = [2, 128], strides = [1, 1]} : vector<16x128xf32> to vector<2x128xf32>
    %cst_32 = arith.constant dense<0.000000e+00> : vector<2x128xf32>
    %80 = tpu.matmul %56, %1, %cst_32 {dimension_numbers = #tpu.dot_dimension_numbers<[1], [0], [0], [1], [0, 0, 1, 1], [], []>, precision = #tpu.contract_precision<fp32>} : vector<2x32xf32>, vector<32x128xf32>, vector<2x128xf32> -> vector<2x128xf32>
    %81 = arith.addf %79, %80 : vector<2x128xf32>
    %82 = vector.extract_strided_slice %81 {offsets = [0, 0], sizes = [2, 96], strides = [1, 1]} : vector<2x128xf32> to vector<2x96xf32>
    %83 = arith.negf %82 : vector<2x96xf32>
    %84 = math.exp %83 : vector<2x96xf32>
    %cst_33 = arith.constant 1.000000e+00 : f32
    %85 = vector.broadcast %cst_33 : f32 to vector<2x96xf32>
    %86 = arith.addf %85, %84 : vector<2x96xf32>
    %87 = arith.divf %85, %86 : vector<2x96xf32>
    %88 = vector.extract_strided_slice %87 {offsets = [0, 0], sizes = [2, 32], strides = [1, 1]} : vector<2x96xf32> to vector<2x32xf32>
    %89 = vector.extract_strided_slice %87 {offsets = [0, 32], sizes = [2, 32], strides = [1, 1]} : vector<2x96xf32> to vector<2x32xf32>
    %90 = vector.extract_strided_slice %87 {offsets = [0, 64], sizes = [2, 32], strides = [1, 1]} : vector<2x96xf32> to vector<2x32xf32>
    %91 = vector.extract_strided_slice %81 {offsets = [0, 96], sizes = [2, 32], strides = [1, 1]} : vector<2x128xf32> to vector<2x32xf32>
    %92 = math.tanh %91 : vector<2x32xf32>
    %93 = arith.mulf %89, %54 : vector<2x32xf32>
    %94 = arith.mulf %88, %92 : vector<2x32xf32>
    %95 = arith.addf %93, %94 : vector<2x32xf32>
    %96 = math.tanh %95 : vector<2x32xf32>
    %97 = arith.mulf %90, %96 : vector<2x32xf32>
    %cst_34 = arith.constant dense<0.000000e+00> : vector<2x128xf32>
    %98 = tpu.matmul %97, %2, %cst_34 {dimension_numbers = #tpu.dot_dimension_numbers<[1], [0], [0], [1], [0, 0, 1, 1], [], []>, precision = #tpu.contract_precision<fp32>} : vector<2x32xf32>, vector<32x128xf32>, vector<2x128xf32> -> vector<2x128xf32>
    %cst_35 = arith.constant dense<0.000000e+00> : vector<2x128xf32>
    %99 = tpu.matmul %77, %3, %cst_35 {dimension_numbers = #tpu.dot_dimension_numbers<[1], [0], [0], [1], [0, 0, 1, 1], [], []>, precision = #tpu.contract_precision<fp32>} : vector<2x32xf32>, vector<32x128xf32>, vector<2x128xf32> -> vector<2x128xf32>
    %100 = arith.addf %98, %99 : vector<2x128xf32>
    %101 = vector.broadcast %5 : vector<1x128xf32> to vector<2x128xf32>
    %102 = arith.addf %100, %101 : vector<2x128xf32>
    %103 = vector.extract_strided_slice %102 {offsets = [0, 0], sizes = [2, 96], strides = [1, 1]} : vector<2x128xf32> to vector<2x96xf32>
    %104 = arith.negf %103 : vector<2x96xf32>
    %105 = math.exp %104 : vector<2x96xf32>
    %cst_36 = arith.constant 1.000000e+00 : f32
    %106 = vector.broadcast %cst_36 : f32 to vector<2x96xf32>
    %107 = arith.addf %106, %105 : vector<2x96xf32>
    %108 = arith.divf %106, %107 : vector<2x96xf32>
    %109 = vector.extract_strided_slice %108 {offsets = [0, 0], sizes = [2, 32], strides = [1, 1]} : vector<2x96xf32> to vector<2x32xf32>
    %110 = vector.extract_strided_slice %108 {offsets = [0, 32], sizes = [2, 32], strides = [1, 1]} : vector<2x96xf32> to vector<2x32xf32>
    %111 = vector.extract_strided_slice %108 {offsets = [0, 64], sizes = [2, 32], strides = [1, 1]} : vector<2x96xf32> to vector<2x32xf32>
    %112 = vector.extract_strided_slice %102 {offsets = [0, 96], sizes = [2, 32], strides = [1, 1]} : vector<2x128xf32> to vector<2x32xf32>
    %113 = math.tanh %112 : vector<2x32xf32>
    %114 = arith.mulf %110, %75 : vector<2x32xf32>
    %115 = arith.mulf %109, %113 : vector<2x32xf32>
    %116 = arith.addf %114, %115 : vector<2x32xf32>
    %117 = math.tanh %116 : vector<2x32xf32>
    %118 = arith.mulf %111, %117 : vector<2x32xf32>
    %c2_37 = arith.constant 2 : index
    %c0_38 = arith.constant 0 : index
    %119 = vector.load %arg14[%c2_37, %c0_38] : memref<16x32xf32, #tpu.memory_space<vmem>>, vector<2x32xf32>
    tpu.vector_store %arg14[%c2_37, %c0_38], %118 {strides = array<i32>} : memref<16x32xf32, #tpu.memory_space<vmem>>, vector<2x32xf32>,
    %120 = vector.extract_strided_slice %33 {offsets = [4, 0], sizes = [2, 128], strides = [1, 1]} : vector<16x128xf32> to vector<2x128xf32>
    %cst_39 = arith.constant dense<0.000000e+00> : vector<2x128xf32>
    %121 = tpu.matmul %97, %1, %cst_39 {dimension_numbers = #tpu.dot_dimension_numbers<[1], [0], [0], [1], [0, 0, 1, 1], [], []>, precision = #tpu.contract_precision<fp32>} : vector<2x32xf32>, vector<32x128xf32>, vector<2x128xf32> -> vector<2x128xf32>
    %122 = arith.addf %120, %121 : vector<2x128xf32>
    %123 = vector.extract_strided_slice %122 {offsets = [0, 0], sizes = [2, 96], strides = [1, 1]} : vector<2x128xf32> to vector<2x96xf32>
    %124 = arith.negf %123 : vector<2x96xf32>
    %125 = math.exp %124 : vector<2x96xf32>
    %cst_40 = arith.constant 1.000000e+00 : f32
    %126 = vector.broadcast %cst_40 : f32 to vector<2x96xf32>
    %127 = arith.addf %126, %125 : vector<2x96xf32>
    %128 = arith.divf %126, %127 : vector<2x96xf32>
    %129 = vector.extract_strided_slice %128 {offsets = [0, 0], sizes = [2, 32], strides = [1, 1]} : vector<2x96xf32> to vector<2x32xf32>
    %130 = vector.extract_strided_slice %128 {offsets = [0, 32], sizes = [2, 32], strides = [1, 1]} : vector<2x96xf32> to vector<2x32xf32>
    %131 = vector.extract_strided_slice %128 {offsets = [0, 64], sizes = [2, 32], strides = [1, 1]} : vector<2x96xf32> to vector<2x32xf32>
    %132 = vector.extract_strided_slice %122 {offsets = [0, 96], sizes = [2, 32], strides = [1, 1]} : vector<2x128xf32> to vector<2x32xf32>
    %133 = math.tanh %132 : vector<2x32xf32>
    %134 = arith.mulf %130, %95 : vector<2x32xf32>
    %135 = arith.mulf %129, %133 : vector<2x32xf32>
    %136 = arith.addf %134, %135 : vector<2x32xf32>
    %137 = math.tanh %136 : vector<2x32xf32>
    %138 = arith.mulf %131, %137 : vector<2x32xf32>
    %cst_41 = arith.constant dense<0.000000e+00> : vector<2x128xf32>
    %139 = tpu.matmul %138, %2, %cst_41 {dimension_numbers = #tpu.dot_dimension_numbers<[1], [0], [0], [1], [0, 0, 1, 1], [], []>, precision = #tpu.contract_precision<fp32>} : vector<2x32xf32>, vector<32x128xf32>, vector<2x128xf32> -> vector<2x128xf32>
    %cst_42 = arith.constant dense<0.000000e+00> : vector<2x128xf32>
    %140 = tpu.matmul %118, %3, %cst_42 {dimension_numbers = #tpu.dot_dimension_numbers<[1], [0], [0], [1], [0, 0, 1, 1], [], []>, precision = #tpu.contract_precision<fp32>} : vector<2x32xf32>, vector<32x128xf32>, vector<2x128xf32> -> vector<2x128xf32>
    %141 = arith.addf %139, %140 : vector<2x128xf32>
    %142 = vector.broadcast %5 : vector<1x128xf32> to vector<2x128xf32>
    %143 = arith.addf %141, %142 : vector<2x128xf32>
    %144 = vector.extract_strided_slice %143 {offsets = [0, 0], sizes = [2, 96], strides = [1, 1]} : vector<2x128xf32> to vector<2x96xf32>
    %145 = arith.negf %144 : vector<2x96xf32>
    %146 = math.exp %145 : vector<2x96xf32>
    %cst_43 = arith.constant 1.000000e+00 : f32
    %147 = vector.broadcast %cst_43 : f32 to vector<2x96xf32>
    %148 = arith.addf %147, %146 : vector<2x96xf32>
    %149 = arith.divf %147, %148 : vector<2x96xf32>
    %150 = vector.extract_strided_slice %149 {offsets = [0, 0], sizes = [2, 32], strides = [1, 1]} : vector<2x96xf32> to vector<2x32xf32>
    %151 = vector.extract_strided_slice %149 {offsets = [0, 32], sizes = [2, 32], strides = [1, 1]} : vector<2x96xf32> to vector<2x32xf32>
    %152 = vector.extract_strided_slice %149 {offsets = [0, 64], sizes = [2, 32], strides = [1, 1]} : vector<2x96xf32> to vector<2x32xf32>
    %153 = vector.extract_strided_slice %143 {offsets = [0, 96], sizes = [2, 32], strides = [1, 1]} : vector<2x128xf32> to vector<2x32xf32>
    %154 = math.tanh %153 : vector<2x32xf32>
    %155 = arith.mulf %151, %116 : vector<2x32xf32>
    %156 = arith.mulf %150, %154 : vector<2x32xf32>
    %157 = arith.addf %155, %156 : vector<2x32xf32>
    %158 = math.tanh %157 : vector<2x32xf32>
    %159 = arith.mulf %152, %158 : vector<2x32xf32>
    %c4 = arith.constant 4 : index
    %c0_44 = arith.constant 0 : index
    %160 = vector.load %arg14[%c4, %c0_44] : memref<16x32xf32, #tpu.memory_space<vmem>>, vector<2x32xf32>
    tpu.vector_store %arg14[%c4, %c0_44], %159 {strides = array<i32>} : memref<16x32xf32, #tpu.memory_space<vmem>>, vector<2x32xf32>,
    %161 = vector.extract_strided_slice %33 {offsets = [6, 0], sizes = [2, 128], strides = [1, 1]} : vector<16x128xf32> to vector<2x128xf32>
    %cst_45 = arith.constant dense<0.000000e+00> : vector<2x128xf32>
    %162 = tpu.matmul %138, %1, %cst_45 {dimension_numbers = #tpu.dot_dimension_numbers<[1], [0], [0], [1], [0, 0, 1, 1], [], []>, precision = #tpu.contract_precision<fp32>} : vector<2x32xf32>, vector<32x128xf32>, vector<2x128xf32> -> vector<2x128xf32>
    %163 = arith.addf %161, %162 : vector<2x128xf32>
    %164 = vector.extract_strided_slice %163 {offsets = [0, 0], sizes = [2, 96], strides = [1, 1]} : vector<2x128xf32> to vector<2x96xf32>
    %165 = arith.negf %164 : vector<2x96xf32>
    %166 = math.exp %165 : vector<2x96xf32>
    %cst_46 = arith.constant 1.000000e+00 : f32
    %167 = vector.broadcast %cst_46 : f32 to vector<2x96xf32>
    %168 = arith.addf %167, %166 : vector<2x96xf32>
    %169 = arith.divf %167, %168 : vector<2x96xf32>
    %170 = vector.extract_strided_slice %169 {offsets = [0, 0], sizes = [2, 32], strides = [1, 1]} : vector<2x96xf32> to vector<2x32xf32>
    %171 = vector.extract_strided_slice %169 {offsets = [0, 32], sizes = [2, 32], strides = [1, 1]} : vector<2x96xf32> to vector<2x32xf32>
    %172 = vector.extract_strided_slice %169 {offsets = [0, 64], sizes = [2, 32], strides = [1, 1]} : vector<2x96xf32> to vector<2x32xf32>
    %173 = vector.extract_strided_slice %163 {offsets = [0, 96], sizes = [2, 32], strides = [1, 1]} : vector<2x128xf32> to vector<2x32xf32>
    %174 = math.tanh %173 : vector<2x32xf32>
    %175 = arith.mulf %171, %136 : vector<2x32xf32>
    %176 = arith.mulf %170, %174 : vector<2x32xf32>
    %177 = arith.addf %175, %176 : vector<2x32xf32>
    %178 = math.tanh %177 : vector<2x32xf32>
    %179 = arith.mulf %172, %178 : vector<2x32xf32>
    %cst_47 = arith.constant dense<0.000000e+00> : vector<2x128xf32>
    %180 = tpu.matmul %179, %2, %cst_47 {dimension_numbers = #tpu.dot_dimension_numbers<[1], [0], [0], [1], [0, 0, 1, 1], [], []>, precision = #tpu.contract_precision<fp32>} : vector<2x32xf32>, vector<32x128xf32>, vector<2x128xf32> -> vector<2x128xf32>
    %cst_48 = arith.constant dense<0.000000e+00> : vector<2x128xf32>
    %181 = tpu.matmul %159, %3, %cst_48 {dimension_numbers = #tpu.dot_dimension_numbers<[1], [0], [0], [1], [0, 0, 1, 1], [], []>, precision = #tpu.contract_precision<fp32>} : vector<2x32xf32>, vector<32x128xf32>, vector<2x128xf32> -> vector<2x128xf32>
    %182 = arith.addf %180, %181 : vector<2x128xf32>
    %183 = vector.broadcast %5 : vector<1x128xf32> to vector<2x128xf32>
    %184 = arith.addf %182, %183 : vector<2x128xf32>
    %185 = vector.extract_strided_slice %184 {offsets = [0, 0], sizes = [2, 96], strides = [1, 1]} : vector<2x128xf32> to vector<2x96xf32>
    %186 = arith.negf %185 : vector<2x96xf32>
    %187 = math.exp %186 : vector<2x96xf32>
    %cst_49 = arith.constant 1.000000e+00 : f32
    %188 = vector.broadcast %cst_49 : f32 to vector<2x96xf32>
    %189 = arith.addf %188, %187 : vector<2x96xf32>
    %190 = arith.divf %188, %189 : vector<2x96xf32>
    %191 = vector.extract_strided_slice %190 {offsets = [0, 0], sizes = [2, 32], strides = [1, 1]} : vector<2x96xf32> to vector<2x32xf32>
    %192 = vector.extract_strided_slice %190 {offsets = [0, 32], sizes = [2, 32], strides = [1, 1]} : vector<2x96xf32> to vector<2x32xf32>
    %193 = vector.extract_strided_slice %190 {offsets = [0, 64], sizes = [2, 32], strides = [1, 1]} : vector<2x96xf32> to vector<2x32xf32>
    %194 = vector.extract_strided_slice %184 {offsets = [0, 96], sizes = [2, 32], strides = [1, 1]} : vector<2x128xf32> to vector<2x32xf32>
    %195 = math.tanh %194 : vector<2x32xf32>
    %196 = arith.mulf %192, %157 : vector<2x32xf32>
    %197 = arith.mulf %191, %195 : vector<2x32xf32>
    %198 = arith.addf %196, %197 : vector<2x32xf32>
    %199 = math.tanh %198 : vector<2x32xf32>
    %200 = arith.mulf %193, %199 : vector<2x32xf32>
    %c6 = arith.constant 6 : index
    %c0_50 = arith.constant 0 : index
    %201 = vector.load %arg14[%c6, %c0_50] : memref<16x32xf32, #tpu.memory_space<vmem>>, vector<2x32xf32>
    tpu.vector_store %arg14[%c6, %c0_50], %200 {strides = array<i32>} : memref<16x32xf32, #tpu.memory_space<vmem>>, vector<2x32xf32>,
    %202 = vector.extract_strided_slice %33 {offsets = [8, 0], sizes = [2, 128], strides = [1, 1]} : vector<16x128xf32> to vector<2x128xf32>
    %cst_51 = arith.constant dense<0.000000e+00> : vector<2x128xf32>
    %203 = tpu.matmul %179, %1, %cst_51 {dimension_numbers = #tpu.dot_dimension_numbers<[1], [0], [0], [1], [0, 0, 1, 1], [], []>, precision = #tpu.contract_precision<fp32>} : vector<2x32xf32>, vector<32x128xf32>, vector<2x128xf32> -> vector<2x128xf32>
    %204 = arith.addf %202, %203 : vector<2x128xf32>
    %205 = vector.extract_strided_slice %204 {offsets = [0, 0], sizes = [2, 96], strides = [1, 1]} : vector<2x128xf32> to vector<2x96xf32>
    %206 = arith.negf %205 : vector<2x96xf32>
    %207 = math.exp %206 : vector<2x96xf32>
    %cst_52 = arith.constant 1.000000e+00 : f32
    %208 = vector.broadcast %cst_52 : f32 to vector<2x96xf32>
    %209 = arith.addf %208, %207 : vector<2x96xf32>
    %210 = arith.divf %208, %209 : vector<2x96xf32>
    %211 = vector.extract_strided_slice %210 {offsets = [0, 0], sizes = [2, 32], strides = [1, 1]} : vector<2x96xf32> to vector<2x32xf32>
    %212 = vector.extract_strided_slice %210 {offsets = [0, 32], sizes = [2, 32], strides = [1, 1]} : vector<2x96xf32> to vector<2x32xf32>
    %213 = vector.extract_strided_slice %210 {offsets = [0, 64], sizes = [2, 32], strides = [1, 1]} : vector<2x96xf32> to vector<2x32xf32>
    %214 = vector.extract_strided_slice %204 {offsets = [0, 96], sizes = [2, 32], strides = [1, 1]} : vector<2x128xf32> to vector<2x32xf32>
    %215 = math.tanh %214 : vector<2x32xf32>
    %216 = arith.mulf %212, %177 : vector<2x32xf32>
    %217 = arith.mulf %211, %215 : vector<2x32xf32>
    %218 = arith.addf %216, %217 : vector<2x32xf32>
    %219 = math.tanh %218 : vector<2x32xf32>
    %220 = arith.mulf %213, %219 : vector<2x32xf32>
    %cst_53 = arith.constant dense<0.000000e+00> : vector<2x128xf32>
    %221 = tpu.matmul %220, %2, %cst_53 {dimension_numbers = #tpu.dot_dimension_numbers<[1], [0], [0], [1], [0, 0, 1, 1], [], []>, precision = #tpu.contract_precision<fp32>} : vector<2x32xf32>, vector<32x128xf32>, vector<2x128xf32> -> vector<2x128xf32>
    %cst_54 = arith.constant dense<0.000000e+00> : vector<2x128xf32>
    %222 = tpu.matmul %200, %3, %cst_54 {dimension_numbers = #tpu.dot_dimension_numbers<[1], [0], [0], [1], [0, 0, 1, 1], [], []>, precision = #tpu.contract_precision<fp32>} : vector<2x32xf32>, vector<32x128xf32>, vector<2x128xf32> -> vector<2x128xf32>
    %223 = arith.addf %221, %222 : vector<2x128xf32>
    %224 = vector.broadcast %5 : vector<1x128xf32> to vector<2x128xf32>
    %225 = arith.addf %223, %224 : vector<2x128xf32>
    %226 = vector.extract_strided_slice %225 {offsets = [0, 0], sizes = [2, 96], strides = [1, 1]} : vector<2x128xf32> to vector<2x96xf32>
    %227 = arith.negf %226 : vector<2x96xf32>
    %228 = math.exp %227 : vector<2x96xf32>
    %cst_55 = arith.constant 1.000000e+00 : f32
    %229 = vector.broadcast %cst_55 : f32 to vector<2x96xf32>
    %230 = arith.addf %229, %228 : vector<2x96xf32>
    %231 = arith.divf %229, %230 : vector<2x96xf32>
    %232 = vector.extract_strided_slice %231 {offsets = [0, 0], sizes = [2, 32], strides = [1, 1]} : vector<2x96xf32> to vector<2x32xf32>
    %233 = vector.extract_strided_slice %231 {offsets = [0, 32], sizes = [2, 32], strides = [1, 1]} : vector<2x96xf32> to vector<2x32xf32>
    %234 = vector.extract_strided_slice %231 {offsets = [0, 64], sizes = [2, 32], strides = [1, 1]} : vector<2x96xf32> to vector<2x32xf32>
    %235 = vector.extract_strided_slice %225 {offsets = [0, 96], sizes = [2, 32], strides = [1, 1]} : vector<2x128xf32> to vector<2x32xf32>
    %236 = math.tanh %235 : vector<2x32xf32>
    %237 = arith.mulf %233, %198 : vector<2x32xf32>
    %238 = arith.mulf %232, %236 : vector<2x32xf32>
    %239 = arith.addf %237, %238 : vector<2x32xf32>
    %240 = math.tanh %239 : vector<2x32xf32>
    %241 = arith.mulf %234, %240 : vector<2x32xf32>
    %c8 = arith.constant 8 : index
    %c0_56 = arith.constant 0 : index
    %242 = vector.load %arg14[%c8, %c0_56] : memref<16x32xf32, #tpu.memory_space<vmem>>, vector<2x32xf32>
    tpu.vector_store %arg14[%c8, %c0_56], %241 {strides = array<i32>} : memref<16x32xf32, #tpu.memory_space<vmem>>, vector<2x32xf32>,
    %243 = vector.extract_strided_slice %33 {offsets = [10, 0], sizes = [2, 128], strides = [1, 1]} : vector<16x128xf32> to vector<2x128xf32>
    %cst_57 = arith.constant dense<0.000000e+00> : vector<2x128xf32>
    %244 = tpu.matmul %220, %1, %cst_57 {dimension_numbers = #tpu.dot_dimension_numbers<[1], [0], [0], [1], [0, 0, 1, 1], [], []>, precision = #tpu.contract_precision<fp32>} : vector<2x32xf32>, vector<32x128xf32>, vector<2x128xf32> -> vector<2x128xf32>
    %245 = arith.addf %243, %244 : vector<2x128xf32>
    %246 = vector.extract_strided_slice %245 {offsets = [0, 0], sizes = [2, 96], strides = [1, 1]} : vector<2x128xf32> to vector<2x96xf32>
    %247 = arith.negf %246 : vector<2x96xf32>
    %248 = math.exp %247 : vector<2x96xf32>
    %cst_58 = arith.constant 1.000000e+00 : f32
    %249 = vector.broadcast %cst_58 : f32 to vector<2x96xf32>
    %250 = arith.addf %249, %248 : vector<2x96xf32>
    %251 = arith.divf %249, %250 : vector<2x96xf32>
    %252 = vector.extract_strided_slice %251 {offsets = [0, 0], sizes = [2, 32], strides = [1, 1]} : vector<2x96xf32> to vector<2x32xf32>
    %253 = vector.extract_strided_slice %251 {offsets = [0, 32], sizes = [2, 32], strides = [1, 1]} : vector<2x96xf32> to vector<2x32xf32>
    %254 = vector.extract_strided_slice %251 {offsets = [0, 64], sizes = [2, 32], strides = [1, 1]} : vector<2x96xf32> to vector<2x32xf32>
    %255 = vector.extract_strided_slice %245 {offsets = [0, 96], sizes = [2, 32], strides = [1, 1]} : vector<2x128xf32> to vector<2x32xf32>
    %256 = math.tanh %255 : vector<2x32xf32>
    %257 = arith.mulf %253, %218 : vector<2x32xf32>
    %258 = arith.mulf %252, %256 : vector<2x32xf32>
    %259 = arith.addf %257, %258 : vector<2x32xf32>
    %260 = math.tanh %259 : vector<2x32xf32>
    %261 = arith.mulf %254, %260 : vector<2x32xf32>
    %cst_59 = arith.constant dense<0.000000e+00> : vector<2x128xf32>
    %262 = tpu.matmul %261, %2, %cst_59 {dimension_numbers = #tpu.dot_dimension_numbers<[1], [0], [0], [1], [0, 0, 1, 1], [], []>, precision = #tpu.contract_precision<fp32>} : vector<2x32xf32>, vector<32x128xf32>, vector<2x128xf32> -> vector<2x128xf32>
    %cst_60 = arith.constant dense<0.000000e+00> : vector<2x128xf32>
    %263 = tpu.matmul %241, %3, %cst_60 {dimension_numbers = #tpu.dot_dimension_numbers<[1], [0], [0], [1], [0, 0, 1, 1], [], []>, precision = #tpu.contract_precision<fp32>} : vector<2x32xf32>, vector<32x128xf32>, vector<2x128xf32> -> vector<2x128xf32>
    %264 = arith.addf %262, %263 : vector<2x128xf32>
    %265 = vector.broadcast %5 : vector<1x128xf32> to vector<2x128xf32>
    %266 = arith.addf %264, %265 : vector<2x128xf32>
    %267 = vector.extract_strided_slice %266 {offsets = [0, 0], sizes = [2, 96], strides = [1, 1]} : vector<2x128xf32> to vector<2x96xf32>
    %268 = arith.negf %267 : vector<2x96xf32>
    %269 = math.exp %268 : vector<2x96xf32>
    %cst_61 = arith.constant 1.000000e+00 : f32
    %270 = vector.broadcast %cst_61 : f32 to vector<2x96xf32>
    %271 = arith.addf %270, %269 : vector<2x96xf32>
    %272 = arith.divf %270, %271 : vector<2x96xf32>
    %273 = vector.extract_strided_slice %272 {offsets = [0, 0], sizes = [2, 32], strides = [1, 1]} : vector<2x96xf32> to vector<2x32xf32>
    %274 = vector.extract_strided_slice %272 {offsets = [0, 32], sizes = [2, 32], strides = [1, 1]} : vector<2x96xf32> to vector<2x32xf32>
    %275 = vector.extract_strided_slice %272 {offsets = [0, 64], sizes = [2, 32], strides = [1, 1]} : vector<2x96xf32> to vector<2x32xf32>
    %276 = vector.extract_strided_slice %266 {offsets = [0, 96], sizes = [2, 32], strides = [1, 1]} : vector<2x128xf32> to vector<2x32xf32>
    %277 = math.tanh %276 : vector<2x32xf32>
    %278 = arith.mulf %274, %239 : vector<2x32xf32>
    %279 = arith.mulf %273, %277 : vector<2x32xf32>
    %280 = arith.addf %278, %279 : vector<2x32xf32>
    %281 = math.tanh %280 : vector<2x32xf32>
    %282 = arith.mulf %275, %281 : vector<2x32xf32>
    %c10 = arith.constant 10 : index
    %c0_62 = arith.constant 0 : index
    %283 = vector.load %arg14[%c10, %c0_62] : memref<16x32xf32, #tpu.memory_space<vmem>>, vector<2x32xf32>
    tpu.vector_store %arg14[%c10, %c0_62], %282 {strides = array<i32>} : memref<16x32xf32, #tpu.memory_space<vmem>>, vector<2x32xf32>,
    %284 = vector.extract_strided_slice %33 {offsets = [12, 0], sizes = [2, 128], strides = [1, 1]} : vector<16x128xf32> to vector<2x128xf32>
    %cst_63 = arith.constant dense<0.000000e+00> : vector<2x128xf32>
    %285 = tpu.matmul %261, %1, %cst_63 {dimension_numbers = #tpu.dot_dimension_numbers<[1], [0], [0], [1], [0, 0, 1, 1], [], []>, precision = #tpu.contract_precision<fp32>} : vector<2x32xf32>, vector<32x128xf32>, vector<2x128xf32> -> vector<2x128xf32>
    %286 = arith.addf %284, %285 : vector<2x128xf32>
    %287 = vector.extract_strided_slice %286 {offsets = [0, 0], sizes = [2, 96], strides = [1, 1]} : vector<2x128xf32> to vector<2x96xf32>
    %288 = arith.negf %287 : vector<2x96xf32>
    %289 = math.exp %288 : vector<2x96xf32>
    %cst_64 = arith.constant 1.000000e+00 : f32
    %290 = vector.broadcast %cst_64 : f32 to vector<2x96xf32>
    %291 = arith.addf %290, %289 : vector<2x96xf32>
    %292 = arith.divf %290, %291 : vector<2x96xf32>
    %293 = vector.extract_strided_slice %292 {offsets = [0, 0], sizes = [2, 32], strides = [1, 1]} : vector<2x96xf32> to vector<2x32xf32>
    %294 = vector.extract_strided_slice %292 {offsets = [0, 32], sizes = [2, 32], strides = [1, 1]} : vector<2x96xf32> to vector<2x32xf32>
    %295 = vector.extract_strided_slice %292 {offsets = [0, 64], sizes = [2, 32], strides = [1, 1]} : vector<2x96xf32> to vector<2x32xf32>
    %296 = vector.extract_strided_slice %286 {offsets = [0, 96], sizes = [2, 32], strides = [1, 1]} : vector<2x128xf32> to vector<2x32xf32>
    %297 = math.tanh %296 : vector<2x32xf32>
    %298 = arith.mulf %294, %259 : vector<2x32xf32>
    %299 = arith.mulf %293, %297 : vector<2x32xf32>
    %300 = arith.addf %298, %299 : vector<2x32xf32>
    %301 = math.tanh %300 : vector<2x32xf32>
    %302 = arith.mulf %295, %301 : vector<2x32xf32>
    %cst_65 = arith.constant dense<0.000000e+00> : vector<2x128xf32>
    %303 = tpu.matmul %302, %2, %cst_65 {dimension_numbers = #tpu.dot_dimension_numbers<[1], [0], [0], [1], [0, 0, 1, 1], [], []>, precision = #tpu.contract_precision<fp32>} : vector<2x32xf32>, vector<32x128xf32>, vector<2x128xf32> -> vector<2x128xf32>
    %cst_66 = arith.constant dense<0.000000e+00> : vector<2x128xf32>
    %304 = tpu.matmul %282, %3, %cst_66 {dimension_numbers = #tpu.dot_dimension_numbers<[1], [0], [0], [1], [0, 0, 1, 1], [], []>, precision = #tpu.contract_precision<fp32>} : vector<2x32xf32>, vector<32x128xf32>, vector<2x128xf32> -> vector<2x128xf32>
    %305 = arith.addf %303, %304 : vector<2x128xf32>
    %306 = vector.broadcast %5 : vector<1x128xf32> to vector<2x128xf32>
    %307 = arith.addf %305, %306 : vector<2x128xf32>
    %308 = vector.extract_strided_slice %307 {offsets = [0, 0], sizes = [2, 96], strides = [1, 1]} : vector<2x128xf32> to vector<2x96xf32>
    %309 = arith.negf %308 : vector<2x96xf32>
    %310 = math.exp %309 : vector<2x96xf32>
    %cst_67 = arith.constant 1.000000e+00 : f32
    %311 = vector.broadcast %cst_67 : f32 to vector<2x96xf32>
    %312 = arith.addf %311, %310 : vector<2x96xf32>
    %313 = arith.divf %311, %312 : vector<2x96xf32>
    %314 = vector.extract_strided_slice %313 {offsets = [0, 0], sizes = [2, 32], strides = [1, 1]} : vector<2x96xf32> to vector<2x32xf32>
    %315 = vector.extract_strided_slice %313 {offsets = [0, 32], sizes = [2, 32], strides = [1, 1]} : vector<2x96xf32> to vector<2x32xf32>
    %316 = vector.extract_strided_slice %313 {offsets = [0, 64], sizes = [2, 32], strides = [1, 1]} : vector<2x96xf32> to vector<2x32xf32>
    %317 = vector.extract_strided_slice %307 {offsets = [0, 96], sizes = [2, 32], strides = [1, 1]} : vector<2x128xf32> to vector<2x32xf32>
    %318 = math.tanh %317 : vector<2x32xf32>
    %319 = arith.mulf %315, %280 : vector<2x32xf32>
    %320 = arith.mulf %314, %318 : vector<2x32xf32>
    %321 = arith.addf %319, %320 : vector<2x32xf32>
    %322 = math.tanh %321 : vector<2x32xf32>
    %323 = arith.mulf %316, %322 : vector<2x32xf32>
    %c12 = arith.constant 12 : index
    %c0_68 = arith.constant 0 : index
    %324 = vector.load %arg14[%c12, %c0_68] : memref<16x32xf32, #tpu.memory_space<vmem>>, vector<2x32xf32>
    tpu.vector_store %arg14[%c12, %c0_68], %323 {strides = array<i32>} : memref<16x32xf32, #tpu.memory_space<vmem>>, vector<2x32xf32>,
    %325 = vector.extract_strided_slice %33 {offsets = [14, 0], sizes = [2, 128], strides = [1, 1]} : vector<16x128xf32> to vector<2x128xf32>
    %cst_69 = arith.constant dense<0.000000e+00> : vector<2x128xf32>
    %326 = tpu.matmul %302, %1, %cst_69 {dimension_numbers = #tpu.dot_dimension_numbers<[1], [0], [0], [1], [0, 0, 1, 1], [], []>, precision = #tpu.contract_precision<fp32>} : vector<2x32xf32>, vector<32x128xf32>, vector<2x128xf32> -> vector<2x128xf32>
    %327 = arith.addf %325, %326 : vector<2x128xf32>
    %328 = vector.extract_strided_slice %327 {offsets = [0, 0], sizes = [2, 96], strides = [1, 1]} : vector<2x128xf32> to vector<2x96xf32>
    %329 = arith.negf %328 : vector<2x96xf32>
    %330 = math.exp %329 : vector<2x96xf32>
    %cst_70 = arith.constant 1.000000e+00 : f32
    %331 = vector.broadcast %cst_70 : f32 to vector<2x96xf32>
    %332 = arith.addf %331, %330 : vector<2x96xf32>
    %333 = arith.divf %331, %332 : vector<2x96xf32>
    %334 = vector.extract_strided_slice %333 {offsets = [0, 0], sizes = [2, 32], strides = [1, 1]} : vector<2x96xf32> to vector<2x32xf32>
    %335 = vector.extract_strided_slice %333 {offsets = [0, 32], sizes = [2, 32], strides = [1, 1]} : vector<2x96xf32> to vector<2x32xf32>
    %336 = vector.extract_strided_slice %333 {offsets = [0, 64], sizes = [2, 32], strides = [1, 1]} : vector<2x96xf32> to vector<2x32xf32>
    %337 = vector.extract_strided_slice %327 {offsets = [0, 96], sizes = [2, 32], strides = [1, 1]} : vector<2x128xf32> to vector<2x32xf32>
    %338 = math.tanh %337 : vector<2x32xf32>
    %339 = arith.mulf %335, %300 : vector<2x32xf32>
    %340 = arith.mulf %334, %338 : vector<2x32xf32>
    %341 = arith.addf %339, %340 : vector<2x32xf32>
    %342 = math.tanh %341 : vector<2x32xf32>
    %343 = arith.mulf %336, %342 : vector<2x32xf32>
    %cst_71 = arith.constant dense<0.000000e+00> : vector<2x128xf32>
    %344 = tpu.matmul %343, %2, %cst_71 {dimension_numbers = #tpu.dot_dimension_numbers<[1], [0], [0], [1], [0, 0, 1, 1], [], []>, precision = #tpu.contract_precision<fp32>} : vector<2x32xf32>, vector<32x128xf32>, vector<2x128xf32> -> vector<2x128xf32>
    %cst_72 = arith.constant dense<0.000000e+00> : vector<2x128xf32>
    %345 = tpu.matmul %323, %3, %cst_72 {dimension_numbers = #tpu.dot_dimension_numbers<[1], [0], [0], [1], [0, 0, 1, 1], [], []>, precision = #tpu.contract_precision<fp32>} : vector<2x32xf32>, vector<32x128xf32>, vector<2x128xf32> -> vector<2x128xf32>
    %346 = arith.addf %344, %345 : vector<2x128xf32>
    %347 = vector.broadcast %5 : vector<1x128xf32> to vector<2x128xf32>
    %348 = arith.addf %346, %347 : vector<2x128xf32>
    %349 = vector.extract_strided_slice %348 {offsets = [0, 0], sizes = [2, 96], strides = [1, 1]} : vector<2x128xf32> to vector<2x96xf32>
    %350 = arith.negf %349 : vector<2x96xf32>
    %351 = math.exp %350 : vector<2x96xf32>
    %cst_73 = arith.constant 1.000000e+00 : f32
    %352 = vector.broadcast %cst_73 : f32 to vector<2x96xf32>
    %353 = arith.addf %352, %351 : vector<2x96xf32>
    %354 = arith.divf %352, %353 : vector<2x96xf32>
    %355 = vector.extract_strided_slice %354 {offsets = [0, 0], sizes = [2, 32], strides = [1, 1]} : vector<2x96xf32> to vector<2x32xf32>
    %356 = vector.extract_strided_slice %354 {offsets = [0, 32], sizes = [2, 32], strides = [1, 1]} : vector<2x96xf32> to vector<2x32xf32>
    %357 = vector.extract_strided_slice %354 {offsets = [0, 64], sizes = [2, 32], strides = [1, 1]} : vector<2x96xf32> to vector<2x32xf32>
    %358 = vector.extract_strided_slice %348 {offsets = [0, 96], sizes = [2, 32], strides = [1, 1]} : vector<2x128xf32> to vector<2x32xf32>
    %359 = math.tanh %358 : vector<2x32xf32>
    %360 = arith.mulf %356, %321 : vector<2x32xf32>
    %361 = arith.mulf %355, %359 : vector<2x32xf32>
    %362 = arith.addf %360, %361 : vector<2x32xf32>
    %363 = math.tanh %362 : vector<2x32xf32>
    %364 = arith.mulf %357, %363 : vector<2x32xf32>
    %c14 = arith.constant 14 : index
    %c0_74 = arith.constant 0 : index
    %365 = vector.load %arg14[%c14, %c0_74] : memref<16x32xf32, #tpu.memory_space<vmem>>, vector<2x32xf32>
    tpu.vector_store %arg14[%c14, %c0_74], %364 {strides = array<i32>} : memref<16x32xf32, #tpu.memory_space<vmem>>, vector<2x32xf32>,
    %c0_75 = arith.constant 0 : index
    %c0_76 = arith.constant 0 : index
    %366 = vector.load %arg12[%c0_75, %c0_76] : memref<4x32xf32, #tpu.memory_space<vmem>>, vector<2x32xf32>
    tpu.vector_store %arg12[%c0_75, %c0_76], %343 {strides = array<i32>} : memref<4x32xf32, #tpu.memory_space<vmem>>, vector<2x32xf32>,
    %c2_77 = arith.constant 2 : index
    %c0_78 = arith.constant 0 : index
    %367 = vector.load %arg12[%c2_77, %c0_78] : memref<4x32xf32, #tpu.memory_space<vmem>>, vector<2x32xf32>
    tpu.vector_store %arg12[%c2_77, %c0_78], %364 {strides = array<i32>} : memref<4x32xf32, #tpu.memory_space<vmem>>, vector<2x32xf32>,
    %c0_79 = arith.constant 0 : index
    %c0_80 = arith.constant 0 : index
    %368 = vector.load %arg13[%c0_79, %c0_80] : memref<4x32xf32, #tpu.memory_space<vmem>>, vector<2x32xf32>
    tpu.vector_store %arg13[%c0_79, %c0_80], %341 {strides = array<i32>} : memref<4x32xf32, #tpu.memory_space<vmem>>, vector<2x32xf32>,
    %c2_81 = arith.constant 2 : index
    %c0_82 = arith.constant 0 : index
    %369 = vector.load %arg13[%c2_81, %c0_82] : memref<4x32xf32, #tpu.memory_space<vmem>>, vector<2x32xf32>
    tpu.vector_store %arg13[%c2_81, %c0_82], %362 {strides = array<i32>} : memref<4x32xf32, #tpu.memory_space<vmem>>, vector<2x32xf32>,
    %c0_83 = arith.constant 0 : index
    %c0_84 = arith.constant 0 : index
    %370 = vector.load %arg14[%c0_83, %c0_84] : memref<16x32xf32, #tpu.memory_space<vmem>>, vector<16x32xf32>
    %c0_85 = arith.constant 0 : index
    %c0_86 = arith.constant 0 : index
    %371 = vector.load %arg6[%c0_85, %c0_86] : memref<2x32xf32, #tpu.memory_space<vmem>>, vector<1x32xf32>
    %c1_87 = arith.constant 1 : index
    %c0_88 = arith.constant 0 : index
    %372 = vector.load %arg6[%c1_87, %c0_88] : memref<2x32xf32, #tpu.memory_space<vmem>>, vector<1x32xf32>
    %cst_89 = arith.constant dense<0.000000e+00> : vector<16xf32>
    %373 = vector.multi_reduction <add>, %370, %cst_89 [1] : vector<16x32xf32> to vector<16xf32>
    %374 = vector.shape_cast %373 : vector<16xf32> to vector<16x1xf32>
    %cst_90 = arith.constant 3.200000e+01 : f32
    %375 = vector.broadcast %cst_90 : f32 to vector<16x1xf32>
    %376 = arith.divf %374, %375 : vector<16x1xf32>
    %377 = vector.broadcast %376 : vector<16x1xf32> to vector<16x32xf32>
    %378 = arith.subf %370, %377 : vector<16x32xf32>
    %379 = arith.mulf %378, %378 : vector<16x32xf32>
    %cst_91 = arith.constant dense<0.000000e+00> : vector<16xf32>
    %380 = vector.multi_reduction <add>, %379, %cst_91 [1] : vector<16x32xf32> to vector<16xf32>
    %381 = vector.shape_cast %380 : vector<16xf32> to vector<16x1xf32>
    %cst_92 = arith.constant 3.200000e+01 : f32
    %382 = vector.broadcast %cst_92 : f32 to vector<16x1xf32>
    %383 = arith.divf %381, %382 : vector<16x1xf32>
    %384 = vector.broadcast %376 : vector<16x1xf32> to vector<16x32xf32>
    %385 = arith.subf %370, %384 : vector<16x32xf32>
    %cst_93 = arith.constant 9.99999974E-6 : f32
    %386 = vector.broadcast %cst_93 : f32 to vector<16x1xf32>
    %387 = arith.addf %383, %386 : vector<16x1xf32>
    %388 = math.rsqrt %387 : vector<16x1xf32>
    %389 = vector.broadcast %388 : vector<16x1xf32> to vector<16x32xf32>
    %390 = arith.mulf %385, %389 : vector<16x32xf32>
    %391 = vector.broadcast %371 : vector<1x32xf32> to vector<16x32xf32>
    %392 = arith.mulf %390, %391 : vector<16x32xf32>
    %393 = vector.broadcast %372 : vector<1x32xf32> to vector<16x32xf32>
    %394 = arith.addf %392, %393 : vector<16x32xf32>
    %c0_94 = arith.constant 0 : index
    %c0_95 = arith.constant 0 : index
    %395 = vector.load %arg7[%c0_94, %c0_95] : memref<32x32xf32, #tpu.memory_space<vmem>>, vector<32x32xf32>
    %cst_96 = arith.constant dense<0.000000e+00> : vector<16x32xf32>
    %396 = tpu.matmul %394, %395, %cst_96 {dimension_numbers = #tpu.dot_dimension_numbers<[1], [0], [0], [1], [0, 0, 1, 1], [], []>, precision = #tpu.contract_precision<fp32>} : vector<16x32xf32>, vector<32x32xf32>, vector<16x32xf32> -> vector<16x32xf32>
    %c0_97 = arith.constant 0 : index
    %c0_98 = arith.constant 0 : index
    %397 = vector.load %arg8[%c0_97, %c0_98] : memref<1x32xf32, #tpu.memory_space<vmem>>, vector<1x32xf32>
    %398 = vector.broadcast %397 : vector<1x32xf32> to vector<16x32xf32>
    %399 = arith.addf %396, %398 : vector<16x32xf32>
    %cst_99 = arith.constant 0.000000e+00 : f32
    %400 = vector.broadcast %cst_99 : f32 to vector<16x32xf32>
    %401 = arith.maximumf %399, %400 : vector<16x32xf32>
    %c0_100 = arith.constant 0 : index
    %c0_101 = arith.constant 0 : index
    %402 = vector.load %arg9[%c0_100, %c0_101] : memref<32x8xf32, #tpu.memory_space<vmem>>, vector<32x8xf32>
    %cst_102 = arith.constant dense<0.000000e+00> : vector<16x8xf32>
    %403 = tpu.matmul %401, %402, %cst_102 {dimension_numbers = #tpu.dot_dimension_numbers<[1], [0], [0], [1], [0, 0, 1, 1], [], []>, precision = #tpu.contract_precision<fp32>} : vector<16x32xf32>, vector<32x8xf32>, vector<16x8xf32> -> vector<16x8xf32>
    %c0_103 = arith.constant 0 : index
    %c0_104 = arith.constant 0 : index
    %404 = vector.load %arg10[%c0_103, %c0_104] : memref<1x8xf32, #tpu.memory_space<vmem>>, vector<1x8xf32>
    %405 = vector.broadcast %404 : vector<1x8xf32> to vector<16x8xf32>
    %406 = arith.addf %403, %405 : vector<16x8xf32>
    %407 = math.tanh %406 : vector<16x8xf32>
    %c0_105 = arith.constant 0 : index
    %c0_106 = arith.constant 0 : index
    %408 = vector.load %arg11[%c0_105, %c0_106] : memref<16x8xf32, #tpu.memory_space<vmem>>, vector<16x8xf32>
    tpu.vector_store %arg11[%c0_105, %c0_106], %407 {strides = array<i32>} : memref<16x8xf32, #tpu.memory_space<vmem>>, vector<16x8xf32>,
    return
  }
}

</mosaic_0001>

<bundles_post_ra>
// kernel: actor_lstm_forward.1
= control target key start
LH: loop header
LB: loop body
LE: loop exit
PB: predicated region body
PF: predicated region fallthrough
CT: control target
= control target key end

     0   :  { %19 = vsyncpa [#allocation4], 0  ;;  %s19664_s0 = inlined_call_operand.vmem [shape: f32[16,16], index: 0, kind: input, shape index: {}]   ;;  %s19665_s1 = inlined_call_operand.vmem [shape: f32[4,32], index: 1, kind: input, shape index: {}]   ;;  %s19666_s2 = inlined_call_operand.vmem [shape: f32[4,32], index: 2, kind: input, shape index: {}]   ;;  %s19667_s3 = inlined_call_operand.hbm [shape: f32[2,16], index: 3, kind: input, shape index: {}]   ;;  %s19668_s4 = inlined_call_operand.vmem [shape: f32[112,128], index: 4, kind: input, shape index: {}]   ;;  %s19669_s5 = inlined_call_operand.hbm [shape: f32[2,128], index: 5, kind: input, shape index: {}]   ;;  %s19670_s6 = inlined_call_operand.hbm [shape: f32[2,32], index: 6, kind: input, shape index: {}]   ;;  %s19671_s7 = inlined_call_operand.hbm [shape: f32[32,32], index: 7, kind: input, shape index: {}]   ;;  %s19672_s8 = inlined_call_operand.vmem [shape: f32[1,32], index: 8, kind: input, shape index: {}]   ;;  %s19673_s9 = inlined_call_operand.vmem [shape: f32[32,8], index: 9, kind: input, shape index: {}]   ;;  %s19674_s10 = inlined_call_operand.hbm [shape: f32[1,8], index: 10, kind: input, shape index: {}]   ;;  %s19675_s11 = inlined_call_operand.vmem [shape: f32[16,8], index: 11, kind: output, shape index: {0}]   ;;  %s19676_s12 = inlined_call_operand.hbm [shape: f32[4,32], index: 12, kind: output, shape index: {1}]   ;;  %s19677_s13 = inlined_call_operand.hbm [shape: f32[4,32], index: 13, kind: output, shape index: {2}]  }
   0x1   :  { %20 = vsyncpa [#allocation7], 0 }
   0x2   :  { %21 = vsyncpa [#allocation10], 0 }
   0x3   :  { %22 = vsyncpa [#allocation5], 0 }
   0x4   :  { %23 = vsyncpa [#allocation14], 0  ;;  %s18068_s25 = smov [#allocation6]   ;;  %s18069_s27 = smov [#allocation9]  }
   0x5   :  { %s48_s26 = sshll.u32 %s18068_s25, 4  ;;  %s67_s28 = sshll.u32 %s18069_s27, 4  ;;  %s49_s26 = int_to_ptr.vmem [resolvable:$true] %s48_s26  ;;  %s18153_s28 = int_to_ptr.vmem [resolvable:$true] %s67_s28 }
   0x6   :  { %s17904_s14 = scalar_lea.hbm %s19669_s5, 32 }
   0x7   :  { %p17905_p0 = scmp.ne.s32.totalorder %s19669_s5, %s17904_s14  ;;  %p17908_p1 = scmp.lt.u32.totalorder %s17904_s14, %s19669_s5 }
   0x9   :  { %p17910_p2 = pnand %p17908_p1, %p17905_p0 }
   0xb   :  { %17913 = shalt.err (!%p17910_p2)
}
   0xc   :  { %s17914_s19 = scalar_lea.vmem %s49_s26, 32  ;;  %p17919_p4 = scmp.lt.s32.totalorder %s49_s26, %s49_s26 }
   0xd   :  { %p17915_p3 = scmp.ne.s32.totalorder %s49_s26, %s17914_s19  ;;  %p17920_p5 = scmp.lt.s32.totalorder %s17914_s19, %s17914_s19 }
   0xf   :  { %p17921_p6 = por %p17920_p5, %p17919_p4 }
  0x11   :  { %p17922_p7 = pnand %p17921_p6, %p17915_p3 }
  0x13   :  { %17925 = shalt.err (!%p17922_p7)
}
  0x14   :  { %51 = dma.hbm_to_vmem [thread:$0]  %s19669_s5, 32, %s49_s26, [#allocation7]  }
  0x15   :  { %s17926_s24 = scalar_lea.hbm %s19671_s7, 512 }
  0x16   :  { %p17927_p8 = scmp.ne.s32.totalorder %s19671_s7, %s17926_s24  ;;  %p17930_p9 = scmp.lt.u32.totalorder %s17926_s24, %s19671_s7 }
  0x18   :  { %p17932_p10 = pnand %p17930_p9, %p17927_p8 }
  0x1a   :  { %17935 = shalt.err (!%p17932_p10)
}
  0x1b   :  { %s17936_s14 = scalar_lea.vmem %s18153_s28, 512  ;;  %p17941_p12 = scmp.lt.s32.totalorder %s18153_s28, %s18153_s28 }
  0x1c   :  { %p17937_p11 = scmp.ne.s32.totalorder %s18153_s28, %s17936_s14  ;;  %p17942_p13 = scmp.lt.s32.totalorder %s17936_s14, %s17936_s14 }
  0x1e   :  { %p17943_p0 = por %p17942_p13, %p17941_p12 }
  0x20   :  { %p17944_p1 = pnand %p17943_p0, %p17937_p11 }
  0x22   :  { %17947 = shalt.err (!%p17944_p1)
}
  0x23   :  { %s18070_s5 = smov 128   ;;  %s18071_s26 = smov 8  }
  0x24   :  { %73 = dma.hbm_to_vmem [thread:$0]  %s19671_s7, 512, %s18153_s28, [#allocation10], %s18070_s5, %s18070_s5, %s18071_s26  }
  0x25   :  { %s18072_s17 = smov [#allocation3]   ;;  %s18073_s19 = smov [#allocation8]  }
  0x26   :  { %s36_s18 = sshll.u32 %s18072_s17, 4  ;;  %s58_s20 = sshll.u32 %s18073_s19, 4  ;;  %s37_s18 = int_to_ptr.vmem [resolvable:$true] %s36_s18  ;;  %s59_s20 = int_to_ptr.vmem [resolvable:$true] %s58_s20 }
  0x27   :  { %s17948_s23 = scalar_lea.hbm %s19667_s3, 32 }
  0x28   :  { %p17949_p2 = scmp.ne.s32.totalorder %s19667_s3, %s17948_s23  ;;  %p17952_p3 = scmp.lt.u32.totalorder %s17948_s23, %s19667_s3 }
  0x2a   :  { %p17954_p4 = pnand %p17952_p3, %p17949_p2 }
  0x2c   :  { %17957 = shalt.err (!%p17954_p4)
}
  0x2d   :  { %s17958_s7 = scalar_lea.vmem %s37_s18, 32  ;;  %p17963_p6 = scmp.lt.s32.totalorder %s37_s18, %s37_s18 }
  0x2e   :  { %p17959_p5 = scmp.ne.s32.totalorder %s37_s18, %s17958_s7  ;;  %p17964_p7 = scmp.lt.s32.totalorder %s17958_s7, %s17958_s7 }
  0x30   :  { %p17965_p8 = por %p17964_p7, %p17963_p6 }
  0x32   :  { %p17966_p9 = pnand %p17965_p8, %p17959_p5 }
  0x34   :  { %17969 = shalt.err (!%p17966_p9)
}
  0x35   :  { %39 = dma.hbm_to_vmem [thread:$0]  %s19667_s3, 32, %s37_s18, [#allocation4]  }
  0x36   :  { %s17970_s26 = scalar_lea.hbm %s19670_s6, 32 }
  0x37   :  { %p17971_p10 = scmp.ne.s32.totalorder %s19670_s6, %s17970_s26  ;;  %p17974_p11 = scmp.lt.u32.totalorder %s17970_s26, %s19670_s6 }
  0x39   :  { %p17976_p12 = pnand %p17974_p11, %p17971_p10 }
  0x3b   :  { %17979 = shalt.err (!%p17976_p12)
}
  0x3c   :  { %s17980_s21 = scalar_lea.vmem %s59_s20, 32  ;;  %p17985_p0 = scmp.lt.s32.totalorder %s59_s20, %s59_s20 }
  0x3d   :  { %p17981_p13 = scmp.ne.s32.totalorder %s59_s20, %s17980_s21  ;;  %p17986_p1 = scmp.lt.s32.totalorder %s17980_s21, %s17980_s21 }
  0x3f   :  { %p17987_p2 = por %p17986_p1, %p17985_p0 }
  0x41   :  { %p17988_p3 = pnand %p17987_p2, %p17981_p13 }
  0x43   :  { %17991 = shalt.err (!%p17988_p3)
}
  0x44   :  { %61 = dma.hbm_to_vmem [thread:$0]  %s19670_s6, 32, %s59_s20, [#allocation7]  }
  0x45   :  { %s18074_s22 = smov [#allocation11]   ;;  %s17992_s27 = scalar_lea.hbm %s19674_s10, 16 }
  0x46   :  { %s84_s23 = sshll.u32 %s18074_s22, 4  ;;  %p17993_p4 = scmp.ne.s32.totalorder %s19674_s10, %s17992_s27  ;;  %s85_s23 = int_to_ptr.vmem [resolvable:$true] %s84_s23 }
  0x47   :  { %p17996_p5 = scmp.lt.u32.totalorder %s17992_s27, %s19674_s10 }
  0x49   :  { %p17998_p6 = pnand %p17996_p5, %p17993_p4 }
  0x4b   :  { %18001 = shalt.err (!%p17998_p6)
}
  0x4c   :  { %s18002_s14 = scalar_lea.vmem %s85_s23, 16  ;;  %s18006_s6 = scalar_lea.vmem %s85_s23, 32 }
  0x4d   :  { %p18003_p7 = scmp.ne.s32.totalorder %s85_s23, %s18002_s14  ;;  %p18007_p8 = scmp.lt.s32.totalorder %s85_s23, %s85_s23 }
  0x4e   :  { %p18008_p9 = scmp.lt.s32.totalorder %s18006_s6, %s18002_s14 }
  0x50   :  { %p18009_p10 = por %p18008_p9, %p18007_p8 }
  0x52   :  { %p18010_p11 = pnand %p18009_p10, %p18003_p7 }
  0x54   :  { %18013 = shalt.err (!%p18010_p11)
}
  0x55   :  { %87 = dma.hbm_to_vmem [thread:$0]  %s19674_s10, 16, %s85_s23, [#allocation10]  }
  0x56   :  { %18058 = dma.done.wait [#allocation4], 32  }
  0x57   :  { %18059 = vsyncadd [#allocation4], 4294967264 }
  0x58   :  { %18060 = dma.done.wait [#allocation7], 64  }
  0x59   :  { %18061 = vsyncadd [#allocation7], 4294967232 }
  0x5a   :  { %18062 = dma.done.wait [#allocation10], 528  }
  0x5b   :  { %18063 = vsyncadd [#allocation10], 4294966768  ;;  %vm123_vm0 = vcmask 130048   ;;  %v119_v0 = vld [vmem:[%s19664_s0] sm:$0xff]  ;;  %v120_v1 = vld [vmem:[%s19664_s0 + $0x8] sm:$0xff]  ;;  %v18075_v29 = vmov 0.0|0.0  }
  0x5c   :  { %v124_v2 = vsel %vm123_vm0, %v119_v0, 0.0  ;;  %v127_v3 = vsel %vm123_vm0, %v120_v1, 0.0  ;;  %v103_v14 = vld [vmem:[%s19668_s4] sm:$0xff]  ;;  %v104_v15 = vld [vmem:[%s19668_s4 + $0x8] sm:$0xff]  ;;  %s18076_s22 = smov 32   ;;  %v105_v43 = vld [vmem:[%s19668_s4 + $0x10] sm:$0xff] }
  0x5d   :  { %125 = vadd.xlane.f32.xlu0 %v124_v2  ;;  %v174_v16 = vand.u32 4294901760, %v103_v14  ;;  %v177_v17 = vand.u32 4294901760, %v104_v15  ;;  %v676_v31 = vld [vmem:[%s19666_s2] sm:$0x3]  ;;  %v14069_v39 = vld [vmem:[#allocation3] ss:$0 sm:$0xff] }
  0x5e   :  { %v14070_v41 = vld [vmem:[#allocation3 + $0x1] ss:$0 sm:$0xff]  ;;  %v106_v45 = vld [vmem:[%s19668_s4 + $0x18] sm:$0xff]  ;;  %v675_v46 = vld [vmem:[%s19665_s1] sm:$0x3]  ;;  %vm679_vm1 = vcmask 261120  }
  0x5f   :  { %v262_v18 = vsub.f32 %v103_v14, %v174_v16  ;;  %v269_v19 = vsub.f32 %v104_v15, %v177_v17  ;;  %v18236_v24 = vpack.c.bf16 %v177_v17, %v174_v16  ;;  %v684_v49 = vand.u32 4294901760, %v105_v43  ;;  %v107_v55 = vld [vmem:[%s19668_s4 + $0x20] sm:$0xff]  ;;  %v108_v56 = vld [vmem:[%s19668_s4 + $0x28] sm:$0xff]  ;;  %s18082_s0 = smov [#allocation13]  }
  0x60   :  { %v687_v52 = vand.u32 4294901760, %v106_v45  ;;  %v681_v53 = vsel %vm679_vm1, %v675_v46, 0  ;;  %v690_v62 = vand.u32 4294901760, %v107_v55  ;;  %v693_v63 = vand.u32 4294901760, %v108_v56  ;;  %s14052_s10 = sshll.u32 %s18082_s0, 4  ;;  %s14053_s10 = int_to_ptr.vmem [resolvable:$true] %s14052_s10 }
  0x61   :  { %128 = vadd.xlane.f32.xlu0 %v127_v3  ;;  %v263_v20 = vand.u32 4294901760, %v262_v18  ;;  %v270_v21 = vand.u32 4294901760, %v269_v19  ;;  %16668 = vmatprep.subr.bf16.mxu1 %v18236_v24  ;;  %v16675_v28 = vpack.c.bf16 %v269_v19, %v262_v18  ;;  %v18268_v59 = vand.u32 4294901760, %v681_v53 }
  0x62   :  { %16670 = vmatpush3.bf16.msra.mxu1 %v18236_v24  ;;  %v18270_v60 = vsub.f32 %v105_v43, %v684_v49  ;;  %vm18077_vm2 = vmmov 0   ;;  %vm2212_vm3 = vcmask 254976   ;;  %vm12881_vm4 = vcmask 261126  }
  0x63   :  { %v264_v22 = vsub.f32 %v262_v18, %v263_v20  ;;  %v271_v23 = vsub.f32 %v269_v19, %v270_v21  ;;  %16691 = vmatprep.subr.bf16.mxu1 %v18075_v29  ;;  %v18241_v30 = vpack.c.bf16 %v270_v21, %v263_v20  ;;  %v18296_v20 = vpack.c.bf16 %v693_v63, %v690_v62 }
  0x65   :  { %v265_v25 = vand.u32 4294901760, %v264_v22  ;;  %v272_v26 = vand.u32 4294901760, %v271_v23 }
  0x67   :  { %v16671_v27 = vpack.c.bf16 %v272_v26, %v265_v25 }
  0x69   :  { %16672 = vmatprep.subr.bf16.mxu0 %v16671_v27 }
  0x6a   :  { %16674 = vmatpush3.bf16.msra.mxu0 %v16671_v27  ;;  %v18078_v27 = vmov 0.0  }
  0x6b   :  { %16676 = vmatprep.subr.bf16.mxu0 %v16675_v28 }
  0xea   :  { %v126_v4 = vpop.xlane.xlu0 %125 }
  0xeb   :  { %v131_v5 = vmul.f32 0.0625, %v126_v4 }
  0xed   :  { %v133_v6 = vsub.f32 %v119_v0, %v131_v5  ;;  %v18273_v0 = vsub.f32 %v106_v45, %v687_v52  ;;  %v18280_v5 = vsub.f32 %v681_v53, %v18268_v59 }
  0xee   :  { %v129_v7 = vpop.xlane.xlu0 %128 }
  0xef   :  { %v132_v8 = vmul.f32 0.0625, %v129_v7  ;;  %v135_v9 = vmul.f32 %v133_v6, %v133_v6  ;;  %v772_v7 = vand.u32 4294901760, %v18273_v0  ;;  %v754_v14 = vand.u32 4294901760, %v18280_v5 }
  0xf1   :  { %v134_v10 = vsub.f32 %v120_v1, %v132_v8  ;;  %v137_v11 = vsel %vm123_vm0, %v135_v9, 0.0  ;;  %v18284_v8 = vsub.f32 %v107_v55, %v690_v62  ;;  %v18286_v9 = vsub.f32 %v108_v56, %v693_v63 }
  0xf2   :  { %138 = vadd.xlane.f32.xlu1 %v137_v11  ;;  %v773_v16 = vsub.f32 %v18273_v0, %v772_v7  ;;  %v755_v21 = vsub.f32 %v18280_v5, %v754_v14 }
  0xf3   :  { %v136_v12 = vmul.f32 %v134_v10, %v134_v10  ;;  %v779_v17 = vand.u32 4294901760, %v18284_v8  ;;  %v786_v18 = vand.u32 4294901760, %v18286_v9 }
  0xf4   :  { %v774_v23 = vand.u32 4294901760, %v773_v16 }
  0xf5   :  { %v140_v13 = vsel %vm123_vm0, %v136_v12, 0.0  ;;  %v780_v25 = vsub.f32 %v18284_v8, %v779_v17  ;;  %v787_v26 = vsub.f32 %v18286_v9, %v786_v18 }
  0xf6   :  { %141 = vadd.xlane.f32.xlu1 %v140_v13  ;;  %v18289_v13 = vpack.c.bf16 %v687_v52, %v684_v49 }
 0x107   :  { %1177 = vrot.lane.b32.xlu1 %v676_v31, %s18076_s22 }
 0x17f   :  { %v139_v32 = vpop.xlane.xlu1 %138 }
 0x180   :  { %v143_v33 = vmul.f32 0.0625, %v139_v32  ;;  %v781_v32 = vand.u32 4294901760, %v780_v25 }
 0x182   :  { %v145_v34 = vadd.f32 1e-05, %v143_v33  ;;  %v788_v33 = vand.u32 4294901760, %v787_v26 }
 0x183   :  { %v142_v35 = vpop.xlane.xlu1 %141 }
 0x184   :  { %17762 = vrsqrt.f32 %v145_v34  ;;  %v144_v36 = vmul.f32 0.0625, %v142_v35  ;;  %v18315_v34 = vpack.c.bf16 %v788_v33, %v781_v32  ;;  %v18325_v35 = vpack.c.bf16 %v18273_v0, %v18270_v60 }
 0x186   :  { %v146_v37 = vadd.f32 1e-05, %v144_v36 }
 0x188   :  { %17764 = vrsqrt.f32 %v146_v37  ;;  %v14071_v37 = vld [vmem:[#allocation6] ss:$0 sm:$0xff] }
 0x18e   :  { %v17763_v38 = vpop.eup %17762 }
 0x18f   :  { %v149_v40 = vmul.f32 %v17763_v38, %v133_v6  ;;  %v765_v6 = vand.u32 4294901760, %v18270_v60 }
 0x191   :  { %v155_v42 = vmul.f32 %v14069_v39, %v149_v40  ;;  %v766_v15 = vsub.f32 %v18270_v60, %v765_v6  ;;  %v18342_v36 = vpack.c.bf16 %v772_v7, %v765_v6  ;;  %v1178_v7 = vpop.permute.xlu1 %1177 }
 0x192   :  { %v17765_v44 = vpop.eup %17764 }
 0x193   :  { %v150_v47 = vmul.f32 %v17765_v44, %v134_v10  ;;  %v161_v48 = vadd.f32 %v14070_v41, %v155_v42  ;;  %v767_v22 = vand.u32 4294901760, %v766_v15 }
 0x195   :  { %v168_v50 = vsel %vm123_vm0, %v161_v48, 0  ;;  %v156_v51 = vmul.f32 %v14069_v39, %v150_v47  ;;  %v18310_v31 = vpack.c.bf16 %v774_v23, %v767_v22 }
 0x196   :  { %v18258_v54 = vand.u32 4294901760, %v168_v50 }
 0x197   :  { %v162_v57 = vadd.f32 %v14070_v41, %v156_v51 }
 0x198   :  { %14920 = vmatprep.mubr.f32.mxu0 %v18258_v54  ;;  %v241_v58 = vsub.f32 %v168_v50, %v18258_v54 }
 0x199   :  { %v171_v61 = vsel %vm123_vm0, %v162_v57, 0 }
 0x19a   :  { %v18275_v1 = vand.u32 4294901760, %v171_v61  ;;  %v242_v2 = vand.u32 4294901760, %v241_v58 }
 0x19c   :  { %14921 = vmatmul.mubr.f32.vlgmr.msra.gmra.mrb[0].mxu0 %v18275_v1  ;;  %v243_v3 = vsub.f32 %v241_v58, %v242_v2  ;;  %v251_v4 = vsub.f32 %v171_v61, %v18275_v1 }
 0x19d   :  { %16678 = vmatpush3.bf16.msra.mxu0 %v16675_v28  ;;  %14927 = vmatprep.mubr.f32.mxu0 %v241_v58  ;;  %v756_v28 = vand.u32 4294901760, %v755_v21 }
 0x19e   :  { %v244_v10 = vand.u32 4294901760, %v243_v3  ;;  %v252_v11 = vand.u32 4294901760, %v251_v4  ;;  %16680 = vmatprep.subr.bf16.mxu0 %v18236_v24 }
 0x1a0   :  { %14913 = vmatprep.mubr.f32.mxu1 %v244_v10  ;;  %v253_v12 = vsub.f32 %v251_v4, %v252_v11 }
 0x1a2   :  { %v254_v19 = vand.u32 4294901760, %v253_v12  ;;  %v114_v12 = vld [vmem:[%s19668_s4 + $0x58] sm:$0xff] }
 0x1a3   :  { %v1204_v16 = vand.u32 4294901760, %v114_v12 }
 0x1a4   :  { %14914 = vmatmul.mubr.f32.vlgmr.msra.gmra.mrb[0].mxu1 %v254_v19  ;;  %14928 = vmatmul.mubr.f32.vlgmr.msra.gmra.mrb[0].mxu0 %v251_v4  ;;  %v677_v19 = vld [vmem:[%s19665_s1 + $0x2] sm:$0x3] }
 0x1a5   :  { %16693 = vmatpush3.bf16.msra.mxu1 %v18289_v13  ;;  %16682 = vmatpush3.bf16.msra.mxu0 %v18236_v24  ;;  %v1198_v22 = vsel %vm679_vm1, %v677_v19, 0  ;;  %v1288_v26 = vsub.f32 %v114_v12, %v1204_v16 }
 0x1a6   :  { %14934 = vmatprep.mubr.f32.mxu0 %v242_v2  ;;  %16694 = vmatprep.subr.bf16.mxu1 %v18075_v29  ;;  %v18407_v33 = vand.u32 4294901760, %v1198_v22 }
 0x1a7   :  { %14959 = vmatprep.mubr.msk.f32.mxu1 %vm18077_vm2, %v18078_v27  ;;  %16684 = vmatprep.subr.bf16.mxu0 %v18241_v30 }
 0x1a9   :  { %16696 = vmatpush3.bf16.msra.mxu1 %v18296_v20 }
 0x1aa   :  { %16697 = vmatprep.subr.bf16.mxu1 %v18075_v29 }
 0x1ac   :  { %14935 = vmatmul.mubr.f32.vlgmr.msra.gmra.mrb[0].mxu0 %v252_v11  ;;  %14960 = vmatmul.mubr.f32.vlgmr.msra.gmra.mrb[2].mxu1 %v756_v28  ;;  %v113_v11 = vld [vmem:[%s19668_s4 + $0x50] sm:$0xff] }
 0x1ad   :  { %16699 = vmatpush3.bf16.msra.mxu1 %v18310_v31  ;;  %16686 = vmatpush3.bf16.msra.mxu0 %v18241_v30  ;;  %v18334_v30 = vpack.c.bf16 %v18286_v9, %v18284_v8  ;;  %v1201_v15 = vand.u32 4294901760, %v113_v11 }
 0x1ae   :  { %14941 = vmatprep.mubr.f32.mxu0 %v18258_v54  ;;  %16700 = vmatprep.subr.bf16.mxu1 %v18075_v29 }
 0x1af   :  { %14970 = vmatprep.mubr.msk.f32.mxu1 %vm18077_vm2, %v18078_v27  ;;  %16688 = vmatprep.subr.bf16.mxu0 %v18236_v24  ;;  %v18405_v23 = vpack.c.bf16 %v1204_v16, %v1201_v15  ;;  %v1281_v25 = vsub.f32 %v113_v11, %v1201_v15 }
 0x1b1   :  { %16702 = vmatpush3.bf16.msra.mxu1 %v18315_v34 }
 0x1b2   :  { %16703 = vmatprep.subr.bf16.mxu1 %v18075_v29 }
 0x1b4   :  { %14971 = vmatmul.mubr.f32.vlgmr.msra.gmra.mrb[4].mxu1 %v18268_v59  ;;  %14942 = vmatmul.mubr.f32.vlgmr.msra.gmra.mrb[0].mxu0 %v18275_v1 }
 0x1b5   :  { %16705 = vmatpush3.bf16.msra.mxu1 %v18325_v35  ;;  %16690 = vmatpush3.bf16.msra.mxu0 %v18236_v24  ;;  %v18349_v24 = vpack.c.bf16 %v786_v18, %v779_v17  ;;  %v116_v17 = vld [vmem:[%s19668_s4 + $0x68] sm:$0xff] }
 0x1b6   :  { %14948 = vmatprep.mubr.f32.mxu0 %v18258_v54  ;;  %16706 = vmatprep.subr.bf16.mxu1 %v18075_v29  ;;  %v1210_v21 = vand.u32 4294901760, %v116_v17 }
 0x1b7   :  { %14981 = vmatprep.mubr.msk.f32.mxu1 %vm18077_vm2, %v18078_v27  ;;  %16709 = vmatprep.subr.bf16.mxu0 %v18075_v29 }
 0x1b8   :  { %v1302_v32 = vsub.f32 %v116_v17, %v1210_v21 }
 0x1b9   :  { %16708 = vmatpush3.bf16.msra.mxu1 %v18334_v30 }
 0x1ba   :  { %16715 = vmatprep.subr.bf16.mxu1 %v18075_v29 }
 0x1bc   :  { %14982 = vmatmul.mubr.f32.vlgmr.msra.gmra.mrb[6].mxu1 %v18280_v5  ;;  %14949 = vmatmul.mubr.f32.vlgmr.msra.gmra.mrb[0].mxu0 %v18275_v1 }
 0x1bd   :  { %16711 = vmatpush3.bf16.msra.mxu0 %v18289_v13  ;;  %16717 = vmatpush3.bf16.msra.mxu1 %v18342_v36 }
 0x1be   :  { %16712 = vmatprep.subr.bf16.mxu0 %v18075_v29  ;;  %16718 = vmatprep.subr.bf16.mxu1 %v18075_v29 }
 0x1bf   :  { %14992 = vmatprep.mubr.msk.f32.mxu0 %vm18077_vm2, %v18078_v27  ;;  %15003 = vmatprep.mubr.msk.f32.mxu1 %vm18077_vm2, %v18078_v27 }
 0x1c1   :  { %16714 = vmatpush3.bf16.msra.mxu0 %v18296_v20  ;;  %16720 = vmatpush3.bf16.msra.mxu1 %v18349_v24 }
 0x1c2   :  { %16721 = vmatprep.subr.bf16.mxu0 %v18075_v29  ;;  %16727 = vmatprep.subr.bf16.mxu1 %v18075_v29 }
 0x1c4   :  { %14993 = vmatmul.mubr.f32.vlgmr.msra.gmra.mrb[2].mxu0 %v754_v14  ;;  %15004 = vmatmul.mubr.f32.vlgmr.msra.gmra.mrb[8].mxu1 %v18268_v59  ;;  %v115_v14 = vld [vmem:[%s19668_s4 + $0x60] sm:$0xff] }
 0x1c5   :  { %16723 = vmatpush3.bf16.msra.mxu0 %v18289_v13  ;;  %15014 = vmatprep.mubr.msk.f32.mxu0 %vm18077_vm2, %v18078_v27  ;;  %v1207_v18 = vand.u32 4294901760, %v115_v14 }
 0x1c6   :  { %16724 = vmatprep.subr.bf16.mxu0 %v18075_v29  ;;  %15025 = vmatprep.mubr.msk.f32.mxu1 %vm18077_vm2, %v18078_v27 }
 0x1c7   :  { %v1295_v28 = vsub.f32 %v115_v14, %v1207_v18  ;;  %16729 = vmatpush3.bf16.msra.mxu1 %v18405_v23 }
 0x1c8   :  { %16730 = vmatprep.subr.bf16.mxu1 %v18075_v29 }
 0x1c9   :  { %16726 = vmatpush3.bf16.msra.mxu0 %v18296_v20 }
 0x1ca   :  { %16733 = vmatprep.subr.bf16.mxu0 %v18075_v29 }
 0x1cc   :  { %15015 = vmatmul.mubr.f32.vlgmr.msra.gmra.mrb[4].mxu0 %v18268_v59 }
 0x1cd   :  { %15036 = vmatprep.mubr.msk.f32.mxu0 %vm18077_vm2, %v18078_v27 }
 0x277   :  { %v14915_v38 = vpop.f32.mrb[0].mxu1 }
 0x278   :  { %v257_v39 = vadd.f32 %v14915_v38, %v14071_v37  ;;  %v246_v40 = vpop.f32.mrb[1].mxu1  ;;  %v1289_v38 = vand.u32 4294901760, %v1288_v26 }
 0x279   :  { %v247_v46 = vadd.f32 %v14071_v37, %v246_v40  ;;  %v1282_v37 = vand.u32 4294901760, %v1281_v25  ;;  %v1296_v40 = vand.u32 4294901760, %v1295_v28 }
 0x27f   :  { %v758_v41 = vpop.f32.mrb[2].mxu1 }
 0x280   :  { %v14961_v42 = vpop.f32.mrb[3].mxu1 }
 0x281   :  { %v1270_v42 = vsub.f32 %v1198_v22, %v18407_v33 }
 0x287   :  { %v849_v43 = vpop.f32.mrb[4].mxu1 }
 0x288   :  { %v850_v44 = vadd.f32 %v849_v43, %v758_v41  ;;  %v14972_v45 = vpop.f32.mrb[5].mxu1  ;;  %v1303_v41 = vand.u32 4294901760, %v1302_v32  ;;  %v1283_v43 = vsub.f32 %v1281_v25, %v1282_v37 }
 0x289   :  { %v1297_v45 = vsub.f32 %v1295_v28, %v1296_v40 }
 0x28a   :  { %v18465_v15 = vpack.c.bf16 %v1303_v41, %v1296_v40 }
 0x28f   :  { %v929_v47 = vpop.f32.mrb[6].mxu1  ;;  %v14950_v48 = vpop.f32.mrb[0].mxu0 }
 0x290   :  { %v930_v49 = vadd.f32 %v929_v47, %v850_v44  ;;  %v18375_v50 = vadd.f32 %v14950_v48, %v257_v39  ;;  %v665_v51 = vpop.f32.mrb[1].mxu0  ;;  %v14983_v52 = vpop.f32.mrb[7].mxu1  ;;  %v18410_v39 = vpack.c.bf16 %v1210_v21, %v1207_v18  ;;  %v1290_v44 = vsub.f32 %v1288_v26, %v1289_v38 }
 0x291   :  { %v18377_v53 = vadd.f32 %v665_v51, %v247_v46  ;;  %v1304_v46 = vsub.f32 %v1302_v32, %v1303_v41  ;;  %v1271_v47 = vand.u32 4294901760, %v1270_v42  ;;  %v1284_v48 = vand.u32 4294901760, %v1283_v43 }
 0x292   :  { %16732 = vmatpush3.bf16.msra.mxu1 %v18410_v39  ;;  %v1298_v51 = vand.u32 4294901760, %v1297_v45 }
 0x293   :  { %16739 = vmatprep.subr.bf16.mxu1 %v18075_v29 }
 0x297   :  { %v1006_v54 = vpop.f32.mrb[2].mxu0  ;;  %v1089_v55 = vpop.f32.mrb[8].mxu1 }
 0x298   :  { %v1007_v56 = vadd.f32 %v1006_v54, %v930_v49  ;;  %v14994_v57 = vpop.f32.mrb[3].mxu0  ;;  %v15005_v58 = vpop.f32.mrb[9].mxu1  ;;  %v1291_v49 = vand.u32 4294901760, %v1290_v44  ;;  %v1305_v54 = vand.u32 4294901760, %v1304_v46 }
 0x299   :  { %v110_v57 = vld [vmem:[%s19668_s4 + $0x38] sm:$0xff] }
 0x29a   :  { %v1090_v59 = vadd.f32 %v1089_v55, %v1007_v56  ;;  %v1272_v55 = vsub.f32 %v1270_v42, %v1271_v47  ;;  %v109_v56 = vld [vmem:[%s19668_s4 + $0x30] sm:$0xff]  ;;  %v18423_v58 = vpack.c.bf16 %v1291_v49, %v1284_v48 }
 0x29c   :  { %16735 = vmatpush3.bf16.msra.mxu0 %v18423_v58 }
 0x29d   :  { %16736 = vmatprep.subr.bf16.mxu0 %v18075_v29 }
 0x29f   :  { %v1164_v60 = vpop.f32.mrb[4].mxu0 }
 0x2a0   :  { %v1165_v61 = vadd.f32 %v1164_v60, %v1090_v59  ;;  %v15016_v62 = vpop.f32.mrb[5].mxu0  ;;  %v18425_v59 = vpack.c.bf16 %v1288_v26, %v1281_v25  ;;  %v1273_v60 = vand.u32 4294901760, %v1272_v55 }
 0x2a1   :  { %v1691_v62 = vand.u32 4294901760, %v109_v56 }
 0x2a2   :  { %v1168_v63 = vadd.f32 %v18377_v53, %v1165_v61  ;;  %v18428_v61 = vpack.c.bf16 %v1305_v54, %v1298_v51  ;;  %15026 = vmatmul.mubr.f32.vlgmr.msra.gmra.mrb[10].mxu1 %v1273_v60 }
 0x2a3   :  { %16741 = vmatpush3.bf16.msra.mxu1 %v18425_v59  ;;  %15047 = vmatprep.mubr.msk.f32.mxu1 %vm18077_vm2, %v18078_v27 }
 0x2a4   :  { %17766 = vtanh.f32 %v1168_v63  ;;  %v14072_v1 = vmul.f32 -1.442695, %v1168_v63  ;;  %v1694_v63 = vand.u32 4294901760, %v110_v57  ;;  %16742 = vmatprep.subr.bf16.mxu1 %v18075_v29  ;;  %16738 = vmatpush3.bf16.msra.mxu0 %v18428_v61 }
 0x2a5   :  { %16745 = vmatprep.subr.bf16.mxu0 %v18075_v29 }
 0x2a6   :  { %17768 = vpow2.f32 %v14072_v1  ;;  %v112_v1 = vld [vmem:[%s19668_s4 + $0x48] sm:$0xff]  ;;  %v18481_v21 = vpack.c.bf16 %v1694_v63, %v1691_v62 }
 0x2a7   :  { %15037 = vmatmul.mubr.f32.vlgmr.msra.gmra.mrb[6].mxu0 %v18407_v33 }
 0x2a8   :  { %16747 = vmatpush3.bf16.msra.mxu0 %v18405_v23  ;;  %15058 = vmatprep.mubr.msk.f32.mxu0 %vm18077_vm2, %v18078_v27 }
 0x2a9   :  { %16748 = vmatprep.subr.bf16.mxu0 %v18075_v29 }
 0x2ac   :  { %16750 = vmatpush3.bf16.msra.mxu0 %v18410_v39 }
 0x2ad   :  { %16757 = vmatprep.subr.bf16.mxu0 %v18075_v29 }
 0x2ae   :  { %v17767_v0 = vpop.eup %17766 }
 0x2af   :  { %1182 = vrot.lane.b32.xlu0 %v17767_v0, %s18076_s22  ;;  %v111_v0 = vld [vmem:[%s19668_s4 + $0x40] sm:$0xff]  ;;  %15059 = vmatmul.mubr.f32.vlgmr.msra.gmra.mrb[8].mxu0 %v1271_v47  ;;  %s18079_s4 = smov 64  }
 0x2b0   :  { %v17769_v2 = vpop.eup %17768  ;;  %16759 = vmatpush3.bf16.msra.mxu0 %v18405_v23  ;;  %15080 = vmatprep.mubr.msk.f32.mxu0 %vm18077_vm2, %v18078_v27 }
 0x2b1   :  { %v1172_v3 = vadd.f32 1.0, %v17769_v2  ;;  %v18438_v2 = vpack.c.bf16 %v1302_v32, %v1295_v28  ;;  %16760 = vmatprep.subr.bf16.mxu0 %v18075_v29 }
 0x2b3   :  { %17770 = vrcp.f32 %v1172_v3  ;;  %v18444_v3 = vsub.f32 %v109_v56, %v1691_v62  ;;  %16744 = vmatpush3.bf16.msra.mxu1 %v18438_v2 }
 0x2b4   :  { %16751 = vmatprep.subr.bf16.mxu1 %v18075_v29  ;;  %16762 = vmatpush3.bf16.msra.mxu0 %v18410_v39 }
 0x2b5   :  { %16769 = vmatprep.subr.bf16.mxu0 %v18075_v29 }
 0x2b6   :  { %15048 = vmatmul.mubr.f32.vlgmr.msra.gmra.mrb[12].mxu1 %v1270_v42 }
 0x2b7   :  { %15069 = vmatprep.mubr.msk.f32.mxu1 %vm18077_vm2, %v18078_v27  ;;  %15081 = vmatmul.mubr.f32.vlgmr.msra.gmra.mrb[10].mxu0 %v18407_v33 }
 0x2b8   :  { %15102 = vmatprep.mubr.msk.f32.mxu0 %vm18077_vm2, %v18078_v27 }
 0x2bd   :  { %v18381_v4 = vpop.eup %17770 }
 0x2be   :  { %v1180_v8 = vmul.f32 %v18381_v4, %v1178_v7  ;;  %v1700_v7 = vand.u32 4294901760, %v112_v1 }
 0x2c0   :  { %v18461_v14 = vsub.f32 %v112_v1, %v1700_v7 }
 0x2c2   :  { %v1793_v19 = vand.u32 4294901760, %v18461_v14 }
 0x2c4   :  { %v1794_v28 = vsub.f32 %v18461_v14, %v1793_v19 }
 0x2c6   :  { %v1795_v40 = vand.u32 4294901760, %v1794_v28 }
 0x321   :  { %v1183_v5 = vpop.permute.xlu0 %1182 }
 0x322   :  { %v1185_v6 = vmul.f32 %v18381_v4, %v1183_v5  ;;  %v18446_v5 = vsub.f32 %v110_v57, %v1694_v63 }
 0x324   :  { %1187 = vrot.lane.b32.xlu1 %v1185_v6, %s18076_s22  ;;  %v1697_v6 = vand.u32 4294901760, %v111_v0  ;;  %v1779_v11 = vand.u32 4294901760, %v18446_v5 }
 0x326   :  { %v18459_v12 = vsub.f32 %v111_v0, %v1697_v6  ;;  %v1780_v17 = vsub.f32 %v18446_v5, %v1779_v11  ;;  %v18495_v32 = vpack.c.bf16 %v1700_v7, %v1697_v6 }
 0x328   :  { %v1786_v18 = vand.u32 4294901760, %v18459_v12  ;;  %v1781_v25 = vand.u32 4294901760, %v1780_v17 }
 0x32a   :  { %v1787_v26 = vsub.f32 %v18459_v12, %v1786_v18 }
 0x37a   :  { %v1366_v45 = vpop.f32.mrb[6].mxu0 }
 0x37b   :  { %v15038_v47 = vpop.f32.mrb[7].mxu0 }
 0x396   :  { %v1188_v9 = vpop.permute.xlu1 %1187 }
 0x397   :  { %v18386_v10 = vadd.f32 %v1188_v9, %v1180_v8  ;;  %v18450_v8 = vpack.c.bf16 %v1289_v38, %v1282_v37  ;;  %v1772_v9 = vand.u32 4294901760, %v18444_v3  ;;  %v1788_v38 = vand.u32 4294901760, %v1787_v26 }
 0x398   :  { %v18539_v26 = vpack.c.bf16 %v18461_v14, %v18459_v12 }
 0x399   :  { %17772 = vtanh.f32 %v18386_v10  ;;  %16753 = vmatpush3.bf16.msra.mxu1 %v18450_v8  ;;  %v1773_v16 = vsub.f32 %v18444_v3, %v1772_v9  ;;  %v18509_v41 = vpack.c.bf16 %v1795_v40, %v1788_v38  ;;  %v18553_v28 = vpack.c.bf16 %v1779_v11, %v1772_v9 }
 0x39a   :  { %16754 = vmatprep.subr.bf16.mxu1 %v18075_v29  ;;  %v18563_v38 = vpack.c.bf16 %v1793_v19, %v1786_v18 }
 0x39b   :  { %v1774_v22 = vand.u32 4294901760, %v1773_v16 }
 0x39d   :  { %16756 = vmatpush3.bf16.msra.mxu1 %v18465_v15  ;;  %v18502_v37 = vpack.c.bf16 %v1781_v25, %v1774_v22  ;;  %v18532_v22 = vpack.c.bf16 %v18446_v5, %v18444_v3 }
 0x39e   :  { %16763 = vmatprep.subr.bf16.mxu1 %v18075_v29 }
 0x39f   :  { %16771 = vmatpush3.bf16.msra.mxu0 %v18502_v37 }
 0x3a0   :  { %15070 = vmatmul.mubr.f32.vlgmr.msra.gmra.mrb[14].mxu1 %v18407_v33  ;;  %16772 = vmatprep.subr.bf16.mxu0 %v18075_v29  ;;  %v1275_v33 = vpop.f32.mrb[10].mxu1 }
 0x3a1   :  { %16765 = vmatpush3.bf16.msra.mxu1 %v18481_v21  ;;  %15091 = vmatprep.mubr.msk.f32.mxu1 %vm18077_vm2, %v18078_v27  ;;  %v15027_v44 = vpop.f32.mrb[11].mxu1  ;;  %v1367_v46 = vadd.f32 %v1366_v45, %v1275_v33 }
 0x3a2   :  { %16766 = vmatprep.subr.bf16.mxu1 %v18075_v29  ;;  %v1446_v48 = vpop.f32.mrb[12].mxu1 }
 0x3a3   :  { %v17773_v52 = vpop.eup %17772  ;;  %16774 = vmatpush3.bf16.msra.mxu0 %v18509_v41  ;;  %v1447_v49 = vadd.f32 %v1446_v48, %v1367_v46  ;;  %v15049_v51 = vpop.f32.mrb[13].mxu1 }
 0x3a4   :  { %1193 = vrot.lane.b32.xlu1 %v17773_v52, %s18076_s22  ;;  %16781 = vmatprep.subr.bf16.mxu0 %v18075_v29  ;;  %v1523_v52 = vpop.f32.mrb[8].mxu0 }
 0x3a5   :  { %16768 = vmatpush3.bf16.msra.mxu1 %v18495_v32  ;;  %v1524_v54 = vadd.f32 %v1523_v52, %v1447_v49  ;;  %v15060_v55 = vpop.f32.mrb[9].mxu0  ;;  %v18623_v49 = vld [vmem:[#allocation6 + $0x1] ss:$0 sm:$0xff] }
 0x3a6   :  { %16775 = vmatprep.subr.bf16.mxu1 %v18075_v29  ;;  %v1681_v1 = vpop.f32.mrb[10].mxu0  ;;  %v678_v55 = vld [vmem:[%s19666_s2 + $0x2] sm:$0x3]  ;;  %s18080_s2 = smov 96  }
 0x3a7   :  { %v15082_v16 = vpop.f32.mrb[11].mxu0 }
 0x416   :  { %v1194_v42 = vpop.permute.xlu1 %1193 }
 0x417   :  { %v1196_v43 = vmul.f32 %v18381_v4, %v1194_v42 }
 0x419   :  { %1686 = vrot.lane.b32.xlu0 %v1196_v43, %s18079_s4 }
 0x473   :  { %v1606_v56 = vpop.f32.mrb[14].mxu1 }
 0x474   :  { %v1607_v60 = vadd.f32 %v1606_v56, %v1524_v54  ;;  %v15071_v62 = vpop.f32.mrb[15].mxu1 }
 0x476   :  { %v18527_v7 = vadd.f32 %v1681_v1, %v1607_v60 }
 0x48b   :  { %v1687_v57 = vpop.permute.xlu0 %1686 }
 0x48c   :  { %v1688_v4 = vsel %vm679_vm1, %v1687_v57, 0 }
 0x48d   :  { %v18519_v63 = vand.u32 4294901760, %v1688_v4 }
 0x48f   :  { %v1760_v0 = vsub.f32 %v1688_v4, %v18519_v63  ;;  %15103 = vmatmul.mubr.f32.vlgmr.msra.gmra.mrb[12].mxu0 %v18519_v63 }
 0x490   :  { %16783 = vmatpush3.bf16.msra.mxu0 %v18481_v21  ;;  %15124 = vmatprep.mubr.msk.f32.mxu0 %vm18077_vm2, %v18078_v27 }
 0x491   :  { %16784 = vmatprep.subr.bf16.mxu0 %v18075_v29  ;;  %v1761_v6 = vand.u32 4294901760, %v1760_v0 }
 0x493   :  { %v1762_v17 = vsub.f32 %v1760_v0, %v1761_v6 }
 0x494   :  { %16786 = vmatpush3.bf16.msra.mxu0 %v18495_v32 }
 0x495   :  { %16793 = vmatprep.subr.bf16.mxu0 %v18075_v29  ;;  %v1763_v25 = vand.u32 4294901760, %v1762_v17 }
 0x497   :  { %15125 = vmatmul.mubr.f32.vlgmr.msra.gmra.mrb[14].mxu0 %v1761_v6  ;;  %15092 = vmatmul.mubr.f32.vlgmr.msra.gmra.mrb[16].mxu1 %v1763_v25 }
 0x498   :  { %16777 = vmatpush3.bf16.msra.mxu1 %v18532_v22  ;;  %16795 = vmatpush3.bf16.msra.mxu0 %v18481_v21 }
 0x499   :  { %16778 = vmatprep.subr.bf16.mxu1 %v18075_v29  ;;  %16796 = vmatprep.subr.bf16.mxu0 %v18075_v29 }
 0x49a   :  { %15113 = vmatprep.mubr.msk.f32.mxu1 %vm18077_vm2, %v18078_v27  ;;  %15146 = vmatprep.mubr.msk.f32.mxu0 %vm18077_vm2, %v18078_v27 }
 0x49c   :  { %16780 = vmatpush3.bf16.msra.mxu1 %v18539_v26  ;;  %16798 = vmatpush3.bf16.msra.mxu0 %v18495_v32 }
 0x49d   :  { %16787 = vmatprep.subr.bf16.mxu1 %v18075_v29  ;;  %16835 = vmatprep.subr.bf16.mxu0 %v18075_v29 }
 0x49f   :  { %15114 = vmatmul.mubr.f32.vlgmr.msra.gmra.mrb[18].mxu1 %v1760_v0  ;;  %15147 = vmatmul.mubr.f32.vlgmr.msra.gmra.mrb[16].mxu0 %v18519_v63 }
 0x4a0   :  { %16789 = vmatpush3.bf16.msra.mxu1 %v18553_v28  ;;  %15135 = vmatprep.mubr.msk.f32.mxu1 %vm18077_vm2, %v18078_v27 }
 0x4a1   :  { %16790 = vmatprep.subr.bf16.mxu1 %v18075_v29  ;;  %16837 = vmatpush3.bf16.msra.mxu0 %v18405_v23 }
 0x4a2   :  { %16838 = vmatprep.subr.bf16.mxu0 %v18075_v29  ;;  %15223 = vmatprep.mubr.msk.f32.mxu0 %vm18077_vm2, %v18078_v27 }
 0x4a4   :  { %16792 = vmatpush3.bf16.msra.mxu1 %v18563_v38 }
 0x4a5   :  { %16799 = vmatprep.subr.bf16.mxu1 %v18075_v29  ;;  %16840 = vmatpush3.bf16.msra.mxu0 %v18410_v39 }
 0x4a6   :  { %16841 = vmatprep.subr.bf16.mxu0 %v18075_v29 }
 0x4a7   :  { %15136 = vmatmul.mubr.f32.vlgmr.msra.gmra.mrb[20].mxu1 %v18519_v63 }
 0x4a8   :  { %16801 = vmatpush3.bf16.msra.mxu1 %v18289_v13  ;;  %15157 = vmatprep.mubr.msk.f32.mxu1 %vm18077_vm2, %v18078_v27 }
 0x4a9   :  { %16802 = vmatprep.subr.bf16.mxu1 %v18075_v29 }
 0x4ac   :  { %16804 = vmatpush3.bf16.msra.mxu1 %v18296_v20 }
 0x4ad   :  { %16805 = vmatprep.subr.bf16.mxu1 %v18075_v29 }
 0x4af   :  { %15158 = vmatmul.mubr.f32.vlgmr.msra.gmra.mrb[22].mxu1 %v1763_v25 }
 0x4b0   :  { %16807 = vmatpush3.bf16.msra.mxu1 %v18310_v31  ;;  %15168 = vmatprep.mubr.msk.f32.mxu1 %vm18077_vm2, %v18078_v27 }
 0x4b1   :  { %16808 = vmatprep.subr.bf16.mxu1 %v18075_v29 }
 0x4b4   :  { %16810 = vmatpush3.bf16.msra.mxu1 %v18315_v34 }
 0x4b5   :  { %16811 = vmatprep.subr.bf16.mxu1 %v18075_v29 }
 0x4b7   :  { %15169 = vmatmul.mubr.f32.vlgmr.msra.gmra.mrb[22].mxu1 %v18519_v63 }
 0x4b8   :  { %16813 = vmatpush3.bf16.msra.mxu1 %v18325_v35  ;;  %15179 = vmatprep.mubr.msk.f32.mxu1 %vm18077_vm2, %v18078_v27 }
 0x4b9   :  { %16814 = vmatprep.subr.bf16.mxu1 %v18075_v29 }
 0x4bc   :  { %16816 = vmatpush3.bf16.msra.mxu1 %v18334_v30 }
 0x4bd   :  { %16817 = vmatprep.subr.bf16.mxu1 %v18075_v29 }
 0x4bf   :  { %15180 = vmatmul.mubr.f32.vlgmr.msra.gmra.mrb[22].mxu1 %v1760_v0 }
 0x4c0   :  { %16819 = vmatpush3.bf16.msra.mxu1 %v18289_v13  ;;  %15190 = vmatprep.mubr.msk.f32.mxu1 %vm18077_vm2, %v18078_v27 }
 0x4c1   :  { %16820 = vmatprep.subr.bf16.mxu1 %v18075_v29 }
 0x4c4   :  { %16822 = vmatpush3.bf16.msra.mxu1 %v18296_v20 }
 0x4c5   :  { %16823 = vmatprep.subr.bf16.mxu1 %v18075_v29 }
 0x4c7   :  { %15191 = vmatmul.mubr.f32.vlgmr.msra.gmra.mrb[22].mxu1 %v1761_v6 }
 0x4c8   :  { %16825 = vmatpush3.bf16.msra.mxu1 %v18342_v36  ;;  %15201 = vmatprep.mubr.msk.f32.mxu1 %vm18077_vm2, %v18078_v27 }
 0x4c9   :  { %16826 = vmatprep.subr.bf16.mxu1 %v18075_v29 }
 0x4cc   :  { %16828 = vmatpush3.bf16.msra.mxu1 %v18349_v24 }
 0x4cd   :  { %16829 = vmatprep.subr.bf16.mxu1 %v18075_v29 }
 0x4cf   :  { %15202 = vmatmul.mubr.f32.vlgmr.msra.gmra.mrb[22].mxu1 %v18519_v63 }
 0x4d0   :  { %16831 = vmatpush3.bf16.msra.mxu1 %v18289_v13  ;;  %15212 = vmatprep.mubr.msk.f32.mxu1 %vm18077_vm2, %v18078_v27 }
 0x4d1   :  { %16832 = vmatprep.subr.bf16.mxu1 %v18075_v29 }
 0x4d4   :  { %16834 = vmatpush3.bf16.msra.mxu1 %v18296_v20 }
 0x4d5   :  { %16871 = vmatprep.subr.bf16.mxu1 %v18075_v29 }
 0x4d7   :  { %15213 = vmatmul.mubr.f32.vlgmr.msra.gmra.mrb[22].mxu1 %v18519_v63 }
 0x4d8   :  { %16873 = vmatpush3.bf16.msra.mxu1 %v18481_v21  ;;  %15289 = vmatprep.mubr.msk.f32.mxu1 %vm18077_vm2, %v18078_v27 }
 0x4d9   :  { %16874 = vmatprep.subr.bf16.mxu1 %v18075_v29 }
 0x4dc   :  { %16876 = vmatpush3.bf16.msra.mxu1 %v18495_v32 }
 0x4dd   :  { %16883 = vmatprep.subr.bf16.mxu1 %v18075_v29 }
 0x562   :  { %v1856_v3 = vpop.f32.mrb[12].mxu0 }
 0x563   :  { %v15104_v5 = vpop.f32.mrb[13].mxu0 }
 0x56a   :  { %v2013_v9 = vpop.f32.mrb[14].mxu0  ;;  %v1765_v11 = vpop.f32.mrb[16].mxu1 }
 0x56b   :  { %v1766_v12 = vadd.f32 %v1765_v11, %v18527_v7  ;;  %v15126_v14 = vpop.f32.mrb[15].mxu0  ;;  %v15093_v18 = vpop.f32.mrb[17].mxu1 }
 0x56d   :  { %v1857_v19 = vadd.f32 %v1856_v3, %v1766_v12 }
 0x572   :  { %v1936_v40 = vpop.f32.mrb[18].mxu1  ;;  %v2171_v42 = vpop.f32.mrb[16].mxu0 }
 0x573   :  { %v1937_v43 = vadd.f32 %v1936_v40, %v1857_v19  ;;  %v15115_v33 = vpop.f32.mrb[19].mxu1  ;;  %v15148_v44 = vpop.f32.mrb[17].mxu0 }
 0x575   :  { %v2014_v45 = vadd.f32 %v2013_v9, %v1937_v43 }
 0x57a   :  { %v2096_v46 = vpop.f32.mrb[20].mxu1 }
 0x57b   :  { %v2097_v47 = vadd.f32 %v2096_v46, %v2014_v45  ;;  %v15137_v48 = vpop.f32.mrb[21].mxu1 }
 0x57d   :  { %v2172_v51 = vadd.f32 %v2171_v42, %v2097_v47  ;;  %v2711_v42 = vrot.slane %v18386_v10, 6 }
 0x57f   :  { %v2179_v52 = vadd.f32 %v18623_v49, %v2172_v51 }
 0x581   :  { %17774 = vtanh.f32 %v2179_v52  ;;  %v14074_v63 = vmul.f32 -1.442695, %v2179_v52 }
 0x58b   :  { %v17775_v54 = vpop.eup %17774 }
 0x58c   :  { %2193 = vrot.lane.b32.xlu1 %v17775_v54, %s18076_s22 }
 0x590   :  { %2188 = vrot.lane.b32.xlu1 %v678_v55, %s18076_s22 }
 0x5aa   :  { %v2695_v56 = vpop.f32.mrb[22].mxu1 }
 0x5ab   :  { %v2700_v57 = vrot.slane %v2695_v56, 6  ;;  %v15214_v60 = vpop.f32.mrb[23].mxu1 }
 0x5ad   :  { %v2702_v62 = vadd.f32 %v18377_v53, %v2700_v57 }
 0x5af   :  { %17776 = vtanh.f32 %v2702_v62  ;;  %v14075_v17 = vmul.f32 -1.442695, %v2702_v62 }
 0x5b0   :  { %17778 = vpow2.f32 %v14074_v63 }
 0x5b9   :  { %v17777_v4 = vpop.eup %17776 }
 0x5ba   :  { %2715 = vrot.lane.b32.xlu0 %v17777_v4, %s18076_s22  ;;  %v17779_v0 = vpop.eup %17778 }
 0x5bb   :  { %v2183_v1 = vadd.f32 1.0, %v17779_v0 }
 0x5bd   :  { %17780 = vrcp.f32 %v2183_v1 }
 0x5be   :  { %17782 = vpow2.f32 %v14075_v17 }
 0x5c7   :  { %v17781_v6 = vpop.eup %17780 }
 0x5c8   :  { %v17783_v25 = vpop.eup %17782 }
 0x5c9   :  { %v2706_v3 = vadd.f32 1.0, %v17783_v25 }
 0x5cb   :  { %17784 = vrcp.f32 %v2706_v3 }
 0x5d5   :  { %v17785_v5 = vpop.eup %17784 }
 0x5d6   :  { %v2713_v43 = vmul.f32 %v17785_v5, %v2711_v42 }
 0x5fe   :  { %v2194_v7 = vpop.permute.xlu1 %2193 }
 0x5ff   :  { %v2196_v16 = vmul.f32 %v17781_v6, %v2194_v7 }
 0x601   :  { %2198 = vrot.lane.b32.xlu0 %v2196_v16, %s18076_s22 }
 0x602   :  { %v2189_v12 = vpop.permute.xlu1 %2188 }
 0x603   :  { %v2191_v14 = vmul.f32 %v17781_v6, %v2189_v12 }
 0x62c   :  { %v2716_v9 = vpop.permute.xlu0 %2715 }
 0x62d   :  { %v2718_v11 = vmul.f32 %v17785_v5, %v2716_v9 }
 0x62f   :  { %2720 = vrot.lane.b32.xlu1 %v2718_v11, %s18076_s22 }
 0x673   :  { %v2199_v18 = vpop.permute.xlu0 %2198 }
 0x674   :  { %v18635_v19 = vadd.f32 %v2199_v18, %v2191_v14 }
 0x676   :  { %17786 = vtanh.f32 %v18635_v19 }
 0x680   :  { %v17787_v40 = vpop.eup %17786 }
 0x681   :  { %2204 = vrot.lane.b32.xlu0 %v17787_v40, %s18076_s22 }
 0x6a1   :  { %v2721_v33 = vpop.permute.xlu1 %2720 }
 0x6a2   :  { %v18640_v44 = vadd.f32 %v2721_v33, %v2713_v43 }
 0x6a4   :  { %17788 = vtanh.f32 %v18640_v44 }
 0x6ae   :  { %v17789_v45 = vpop.eup %17788 }
 0x6af   :  { %2726 = vrot.lane.b32.xlu1 %v17789_v45, %s18076_s22 }
 0x6f3   :  { %v2205_v46 = vpop.permute.xlu0 %2204 }
 0x6f4   :  { %v2207_v47 = vmul.f32 %v17781_v6, %v2205_v46 }
 0x6f6   :  { %2209 = vrot.lane.b32.xlu0 %v2207_v47, %s18079_s4 }
 0x721   :  { %v2727_v48 = vpop.permute.xlu1 %2726 }
 0x722   :  { %v2729_v51 = vmul.f32 %v17785_v5, %v2727_v48 }
 0x724   :  { %v3218_v52 = vrot.slane %v2729_v51, 2 }
 0x726   :  { %3219 = vrot.lane.b32.xlu1 %v3218_v52, %s18079_s4 }
 0x768   :  { %v2210_v10 = vpop.permute.xlu0 %2209 }
 0x769   :  { %2213 = vst.msk [vmem:[#allocation2] sm:$0x3] %vm2212_vm3, %v2210_v10  ;;  %v2730_v54 = vsel %vm679_vm1, %v2210_v10, 0 }
 0x76a   :  { %v2801_v55 = vand.u32 4294901760, %v2730_v54 }
 0x76c   :  { %v2802_v56 = vsub.f32 %v2730_v54, %v2801_v55 }
 0x76e   :  { %v2803_v57 = vand.u32 4294901760, %v2802_v56 }
 0x770   :  { %v2804_v60 = vsub.f32 %v2802_v56, %v2803_v57 }
 0x772   :  { %v2805_v62 = vand.u32 4294901760, %v2804_v60 }
 0x774   :  { %15224 = vmatmul.mubr.f32.vlgmr.msra.gmra.mrb[18].mxu0 %v2805_v62 }
 0x775   :  { %16843 = vmatpush3.bf16.msra.mxu0 %v18423_v58  ;;  %15234 = vmatprep.mubr.msk.f32.mxu0 %vm18077_vm2, %v18078_v27 }
 0x776   :  { %16844 = vmatprep.subr.bf16.mxu0 %v18075_v29 }
 0x779   :  { %16846 = vmatpush3.bf16.msra.mxu0 %v18428_v61 }
 0x77a   :  { %16847 = vmatprep.subr.bf16.mxu0 %v18075_v29 }
 0x77c   :  { %15235 = vmatmul.mubr.f32.vlgmr.msra.gmra.mrb[20].mxu0 %v2801_v55 }
 0x77d   :  { %16849 = vmatpush3.bf16.msra.mxu0 %v18425_v59  ;;  %15245 = vmatprep.mubr.msk.f32.mxu0 %vm18077_vm2, %v18078_v27 }
 0x77e   :  { %16850 = vmatprep.subr.bf16.mxu0 %v18075_v29 }
 0x781   :  { %16852 = vmatpush3.bf16.msra.mxu0 %v18438_v2 }
 0x782   :  { %16853 = vmatprep.subr.bf16.mxu0 %v18075_v29 }
 0x784   :  { %15246 = vmatmul.mubr.f32.vlgmr.msra.gmra.mrb[22].mxu0 %v2802_v56 }
 0x785   :  { %16855 = vmatpush3.bf16.msra.mxu0 %v18405_v23  ;;  %15256 = vmatprep.mubr.msk.f32.mxu0 %vm18077_vm2, %v18078_v27 }
 0x786   :  { %16856 = vmatprep.subr.bf16.mxu0 %v18075_v29 }
 0x789   :  { %16858 = vmatpush3.bf16.msra.mxu0 %v18410_v39 }
 0x78a   :  { %16859 = vmatprep.subr.bf16.mxu0 %v18075_v29 }
 0x78c   :  { %15257 = vmatmul.mubr.f32.vlgmr.msra.gmra.mrb[24].mxu0 %v2803_v57 }
 0x78d   :  { %16861 = vmatpush3.bf16.msra.mxu0 %v18450_v8  ;;  %15267 = vmatprep.mubr.msk.f32.mxu0 %vm18077_vm2, %v18078_v27 }
 0x78e   :  { %16862 = vmatprep.subr.bf16.mxu0 %v18075_v29 }
 0x791   :  { %16864 = vmatpush3.bf16.msra.mxu0 %v18465_v15 }
 0x792   :  { %16865 = vmatprep.subr.bf16.mxu0 %v18075_v29 }
 0x794   :  { %15268 = vmatmul.mubr.f32.vlgmr.msra.gmra.mrb[26].mxu0 %v2801_v55 }
 0x795   :  { %16867 = vmatpush3.bf16.msra.mxu0 %v18405_v23  ;;  %15278 = vmatprep.mubr.msk.f32.mxu0 %vm18077_vm2, %v18078_v27 }
 0x796   :  { %16868 = vmatprep.subr.bf16.mxu0 %v18075_v29 }
 0x798   :  { %v3220_v4 = vpop.permute.xlu1 %3219 }
 0x799   :  { %16870 = vmatpush3.bf16.msra.mxu0 %v18410_v39  ;;  %v3221_v63 = vsel %vm679_vm1, %v3220_v4, 0 }
 0x79a   :  { %v18678_v0 = vand.u32 4294901760, %v3221_v63  ;;  %16877 = vmatprep.subr.bf16.mxu0 %v18075_v29 }
 0x79c   :  { %v3293_v1 = vsub.f32 %v3221_v63, %v18678_v0  ;;  %15279 = vmatmul.mubr.f32.vlgmr.msra.gmra.mrb[28].mxu0 %v2801_v55 }
 0x79d   :  { %16879 = vmatpush3.bf16.msra.mxu0 %v18502_v37  ;;  %15300 = vmatprep.mubr.msk.f32.mxu0 %vm18077_vm2, %v18078_v27 }
 0x79e   :  { %v3294_v6 = vand.u32 4294901760, %v3293_v1  ;;  %16880 = vmatprep.subr.bf16.mxu0 %v18075_v29 }
 0x7a0   :  { %v3295_v7 = vsub.f32 %v3293_v1, %v3294_v6 }
 0x7a1   :  { %16882 = vmatpush3.bf16.msra.mxu0 %v18509_v41 }
 0x7a2   :  { %16889 = vmatprep.subr.bf16.mxu0 %v18075_v29  ;;  %v3296_v16 = vand.u32 4294901760, %v3295_v7 }
 0x7a4   :  { %15301 = vmatmul.mubr.f32.vlgmr.msra.gmra.mrb[30].mxu0 %v18678_v0  ;;  %15290 = vmatmul.mubr.f32.vlgmr.msra.gmra.mrb[24].mxu1 %v3296_v16 }
 0x7a5   :  { %16885 = vmatpush3.bf16.msra.mxu1 %v18532_v22  ;;  %16891 = vmatpush3.bf16.msra.mxu0 %v18481_v21 }
 0x7a6   :  { %16886 = vmatprep.subr.bf16.mxu1 %v18075_v29  ;;  %16892 = vmatprep.subr.bf16.mxu0 %v18075_v29 }
 0x7a7   :  { %15311 = vmatprep.mubr.msk.f32.mxu1 %vm18077_vm2, %v18078_v27  ;;  %15322 = vmatprep.mubr.msk.f32.mxu0 %vm18077_vm2, %v18078_v27 }
 0x7a9   :  { %16888 = vmatpush3.bf16.msra.mxu1 %v18539_v26  ;;  %16894 = vmatpush3.bf16.msra.mxu0 %v18495_v32 }
 0x7aa   :  { %16895 = vmatprep.subr.bf16.mxu1 %v18075_v29  ;;  %16901 = vmatprep.subr.bf16.mxu0 %v18075_v29 }
 0x7ac   :  { %15312 = vmatmul.mubr.f32.vlgmr.msra.gmra.mrb[26].mxu1 %v3293_v1  ;;  %15323 = vmatmul.mubr.f32.vlgmr.msra.gmra.mrb[32].mxu0 %v3294_v6 }
 0x7ad   :  { %16897 = vmatpush3.bf16.msra.mxu1 %v18553_v28  ;;  %16903 = vmatpush3.bf16.msra.mxu0 %v18481_v21 }
 0x7ae   :  { %16898 = vmatprep.subr.bf16.mxu1 %v18075_v29  ;;  %16904 = vmatprep.subr.bf16.mxu0 %v18075_v29 }
 0x7af   :  { %15333 = vmatprep.mubr.msk.f32.mxu1 %vm18077_vm2, %v18078_v27  ;;  %15344 = vmatprep.mubr.msk.f32.mxu0 %vm18077_vm2, %v18078_v27 }
 0x7b1   :  { %16900 = vmatpush3.bf16.msra.mxu1 %v18563_v38  ;;  %16906 = vmatpush3.bf16.msra.mxu0 %v18495_v32 }
 0x7b2   :  { %16907 = vmatprep.subr.bf16.mxu1 %v18075_v29  ;;  %16943 = vmatprep.subr.bf16.mxu0 %v18075_v29 }
 0x7b4   :  { %15334 = vmatmul.mubr.f32.vlgmr.msra.gmra.mrb[28].mxu1 %v18678_v0  ;;  %15345 = vmatmul.mubr.f32.vlgmr.msra.gmra.mrb[34].mxu0 %v18678_v0 }
 0x7b5   :  { %16909 = vmatpush3.bf16.msra.mxu1 %v18289_v13  ;;  %15355 = vmatprep.mubr.msk.f32.mxu1 %vm18077_vm2, %v18078_v27 }
 0x7b6   :  { %16910 = vmatprep.subr.bf16.mxu1 %v18075_v29  ;;  %16945 = vmatpush3.bf16.msra.mxu0 %v18405_v23 }
 0x7b7   :  { %16946 = vmatprep.subr.bf16.mxu0 %v18075_v29  ;;  %15421 = vmatprep.mubr.msk.f32.mxu0 %vm18077_vm2, %v18078_v27 }
 0x7b9   :  { %16912 = vmatpush3.bf16.msra.mxu1 %v18296_v20 }
 0x7ba   :  { %16913 = vmatprep.subr.bf16.mxu1 %v18075_v29  ;;  %16948 = vmatpush3.bf16.msra.mxu0 %v18410_v39 }
 0x7bb   :  { %16949 = vmatprep.subr.bf16.mxu0 %v18075_v29 }
 0x7bc   :  { %15356 = vmatmul.mubr.f32.vlgmr.msra.gmra.mrb[30].mxu1 %v3296_v16 }
 0x7bd   :  { %16915 = vmatpush3.bf16.msra.mxu1 %v18310_v31  ;;  %15366 = vmatprep.mubr.msk.f32.mxu1 %vm18077_vm2, %v18078_v27 }
 0x7be   :  { %16916 = vmatprep.subr.bf16.mxu1 %v18075_v29 }
 0x7c1   :  { %16918 = vmatpush3.bf16.msra.mxu1 %v18315_v34 }
 0x7c2   :  { %16919 = vmatprep.subr.bf16.mxu1 %v18075_v29 }
 0x7c4   :  { %15367 = vmatmul.mubr.f32.vlgmr.msra.gmra.mrb[30].mxu1 %v18678_v0 }
 0x7c5   :  { %16921 = vmatpush3.bf16.msra.mxu1 %v18325_v35  ;;  %15377 = vmatprep.mubr.msk.f32.mxu1 %vm18077_vm2, %v18078_v27 }
 0x7c6   :  { %16922 = vmatprep.subr.bf16.mxu1 %v18075_v29 }
 0x7c9   :  { %16924 = vmatpush3.bf16.msra.mxu1 %v18334_v30 }
 0x7ca   :  { %16925 = vmatprep.subr.bf16.mxu1 %v18075_v29 }
 0x7cc   :  { %15378 = vmatmul.mubr.f32.vlgmr.msra.gmra.mrb[30].mxu1 %v3293_v1 }
 0x7cd   :  { %16927 = vmatpush3.bf16.msra.mxu1 %v18289_v13  ;;  %15388 = vmatprep.mubr.msk.f32.mxu1 %vm18077_vm2, %v18078_v27 }
 0x7ce   :  { %16928 = vmatprep.subr.bf16.mxu1 %v18075_v29 }
 0x7d1   :  { %16930 = vmatpush3.bf16.msra.mxu1 %v18296_v20 }
 0x7d2   :  { %16931 = vmatprep.subr.bf16.mxu1 %v18075_v29 }
 0x7d4   :  { %15389 = vmatmul.mubr.f32.vlgmr.msra.gmra.mrb[30].mxu1 %v3294_v6 }
 0x7d5   :  { %16933 = vmatpush3.bf16.msra.mxu1 %v18342_v36  ;;  %15399 = vmatprep.mubr.msk.f32.mxu1 %vm18077_vm2, %v18078_v27 }
 0x7d6   :  { %16934 = vmatprep.subr.bf16.mxu1 %v18075_v29 }
 0x7d9   :  { %16936 = vmatpush3.bf16.msra.mxu1 %v18349_v24 }
 0x7da   :  { %16937 = vmatprep.subr.bf16.mxu1 %v18075_v29 }
 0x7dc   :  { %15400 = vmatmul.mubr.f32.vlgmr.msra.gmra.mrb[30].mxu1 %v18678_v0 }
 0x7dd   :  { %16939 = vmatpush3.bf16.msra.mxu1 %v18289_v13  ;;  %15410 = vmatprep.mubr.msk.f32.mxu1 %vm18077_vm2, %v18078_v27 }
 0x7de   :  { %16940 = vmatprep.subr.bf16.mxu1 %v18075_v29 }
 0x7e1   :  { %16942 = vmatpush3.bf16.msra.mxu1 %v18296_v20 }
 0x7e2   :  { %16979 = vmatprep.subr.bf16.mxu1 %v18075_v29 }
 0x7e4   :  { %15411 = vmatmul.mubr.f32.vlgmr.msra.gmra.mrb[30].mxu1 %v18678_v0 }
 0x7e5   :  { %16981 = vmatpush3.bf16.msra.mxu1 %v18481_v21  ;;  %15487 = vmatprep.mubr.msk.f32.mxu1 %vm18077_vm2, %v18078_v27 }
 0x7e6   :  { %16982 = vmatprep.subr.bf16.mxu1 %v18075_v29 }
 0x7e9   :  { %16984 = vmatpush3.bf16.msra.mxu1 %v18495_v32 }
 0x7ea   :  { %16991 = vmatprep.subr.bf16.mxu1 %v18075_v29 }
 0x847   :  { %v2807_v17 = vpop.f32.mrb[18].mxu0 }
 0x848   :  { %v15225_v25 = vpop.f32.mrb[19].mxu0 }
 0x84f   :  { %v2898_v3 = vpop.f32.mrb[20].mxu0 }
 0x850   :  { %v2899_v5 = vadd.f32 %v2898_v3, %v2807_v17  ;;  %v15236_v9 = vpop.f32.mrb[21].mxu0 }
 0x857   :  { %v2978_v11 = vpop.f32.mrb[22].mxu0 }
 0x858   :  { %v2979_v12 = vadd.f32 %v2978_v11, %v2899_v5  ;;  %v15247_v14 = vpop.f32.mrb[23].mxu0 }
 0x85f   :  { %v3055_v18 = vpop.f32.mrb[24].mxu0 }
 0x860   :  { %v3056_v40 = vadd.f32 %v3055_v18, %v2979_v12  ;;  %v15258_v42 = vpop.f32.mrb[25].mxu0 }
 0x867   :  { %v3138_v43 = vpop.f32.mrb[26].mxu0 }
 0x868   :  { %v3139_v33 = vadd.f32 %v3138_v43, %v3056_v40  ;;  %v15269_v45 = vpop.f32.mrb[27].mxu0 }
 0x86f   :  { %v3213_v46 = vpop.f32.mrb[28].mxu0 }
 0x870   :  { %v3214_v47 = vadd.f32 %v3213_v46, %v3139_v33  ;;  %v15280_v48 = vpop.f32.mrb[29].mxu0 }
 0x877   :  { %v3389_v51 = vpop.f32.mrb[30].mxu0  ;;  %v3298_v52 = vpop.f32.mrb[24].mxu1 }
 0x878   :  { %v3299_v10 = vadd.f32 %v3298_v52, %v3214_v47  ;;  %v15302_v54 = vpop.f32.mrb[31].mxu0  ;;  %v15291_v55 = vpop.f32.mrb[25].mxu1 }
 0x87a   :  { %v3390_v56 = vadd.f32 %v3389_v51, %v3299_v10 }
 0x87f   :  { %v3469_v57 = vpop.f32.mrb[26].mxu1  ;;  %v3546_v60 = vpop.f32.mrb[32].mxu0 }
 0x880   :  { %v3470_v62 = vadd.f32 %v3469_v57, %v3390_v56  ;;  %v15313_v4 = vpop.f32.mrb[27].mxu1  ;;  %v15324_v63 = vpop.f32.mrb[33].mxu0 }
 0x882   :  { %v3547_v0 = vadd.f32 %v3546_v60, %v3470_v62  ;;  %v4235_v62 = vrot.slane %v18640_v44, 6 }
 0x887   :  { %v3629_v1 = vpop.f32.mrb[28].mxu1  ;;  %v3704_v6 = vpop.f32.mrb[34].mxu0 }
 0x888   :  { %v3630_v7 = vadd.f32 %v3629_v1, %v3547_v0  ;;  %v15335_v16 = vpop.f32.mrb[29].mxu1  ;;  %v15346_v17 = vpop.f32.mrb[35].mxu0 }
 0x88a   :  { %v3705_v25 = vadd.f32 %v3704_v6, %v3630_v7 }
 0x88c   :  { %v3708_v3 = vadd.f32 %v18623_v49, %v3705_v25 }
 0x88e   :  { %17790 = vtanh.f32 %v3708_v3  ;;  %v14076_v40 = vmul.f32 -1.442695, %v3708_v3 }
 0x898   :  { %v17791_v5 = vpop.eup %17790 }
 0x899   :  { %3718 = vrot.lane.b32.xlu0 %v17791_v5, %s18076_s22 }
 0x8b7   :  { %v4219_v9 = vpop.f32.mrb[30].mxu1 }
 0x8b8   :  { %v4224_v11 = vrot.slane %v4219_v9, 4  ;;  %v15412_v12 = vpop.f32.mrb[31].mxu1 }
 0x8ba   :  { %v4226_v14 = vadd.f32 %v18377_v53, %v4224_v11 }
 0x8bc   :  { %17792 = vtanh.f32 %v4226_v14  ;;  %v14077_v47 = vmul.f32 -1.442695, %v4226_v14 }
 0x8bd   :  { %17794 = vpow2.f32 %v14076_v40 }
 0x8c6   :  { %v17793_v18 = vpop.eup %17792 }
 0x8c7   :  { %4239 = vrot.lane.b32.xlu1 %v17793_v18, %s18076_s22  ;;  %v17795_v42 = vpop.eup %17794 }
 0x8c8   :  { %v3712_v43 = vadd.f32 1.0, %v17795_v42 }
 0x8ca   :  { %17796 = vrcp.f32 %v3712_v43 }
 0x8cb   :  { %17798 = vpow2.f32 %v14077_v47 }
 0x8d4   :  { %v17797_v33 = vpop.eup %17796 }
 0x8d5   :  { %v17799_v48 = vpop.eup %17798  ;;  %v3716_v55 = vmul.f32 %v17797_v33, %v18635_v19 }
 0x8d6   :  { %v4230_v51 = vadd.f32 1.0, %v17799_v48 }
 0x8d8   :  { %17800 = vrcp.f32 %v4230_v51 }
 0x8e2   :  { %v17801_v52 = vpop.eup %17800 }
 0x8e3   :  { %v4237_v4 = vmul.f32 %v17801_v52, %v4235_v62 }
 0x90b   :  { %v3719_v45 = vpop.permute.xlu0 %3718 }
 0x90c   :  { %v3721_v46 = vmul.f32 %v17797_v33, %v3719_v45 }
 0x90e   :  { %3723 = vrot.lane.b32.xlu0 %v3721_v46, %s18076_s22 }
 0x939   :  { %v4240_v10 = vpop.permute.xlu1 %4239 }
 0x93a   :  { %v4242_v54 = vmul.f32 %v17801_v52, %v4240_v10 }
 0x93c   :  { %4244 = vrot.lane.b32.xlu1 %v4242_v54, %s18076_s22 }
 0x980   :  { %v3724_v56 = vpop.permute.xlu0 %3723 }
 0x981   :  { %v18773_v57 = vadd.f32 %v3724_v56, %v3716_v55 }
 0x983   :  { %17802 = vtanh.f32 %v18773_v57 }
 0x98d   :  { %v17803_v60 = vpop.eup %17802 }
 0x98e   :  { %3729 = vrot.lane.b32.xlu0 %v17803_v60, %s18076_s22 }
 0x9ae   :  { %v4245_v63 = vpop.permute.xlu1 %4244 }
 0x9af   :  { %v18778_v0 = vadd.f32 %v4245_v63, %v4237_v4 }
 0x9b1   :  { %17804 = vtanh.f32 %v18778_v0 }
 0x9bb   :  { %v17805_v1 = vpop.eup %17804 }
 0x9bc   :  { %4250 = vrot.lane.b32.xlu1 %v17805_v1, %s18076_s22 }
 0xa00   :  { %v3730_v19 = vpop.permute.xlu0 %3729 }
 0xa01   :  { %v3732_v6 = vmul.f32 %v17797_v33, %v3730_v19 }
 0xa03   :  { %3734 = vrot.lane.b32.xlu0 %v3732_v6, %s18079_s4 }
 0xa2e   :  { %v4251_v7 = vpop.permute.xlu1 %4250 }
 0xa2f   :  { %v4253_v16 = vmul.f32 %v17801_v52, %v4251_v7 }
 0xa31   :  { %v4742_v17 = vrot.slane %v4253_v16, 4 }
 0xa33   :  { %4743 = vrot.lane.b32.xlu1 %v4742_v17, %s18079_s4 }
 0xa75   :  { %v3735_v25 = vpop.permute.xlu0 %3734 }
 0xa76   :  { %3737 = vst.msk [vmem:[#allocation2 + $0x2] sm:$0x3] %vm2212_vm3, %v3735_v25  ;;  %v4254_v44 = vsel %vm679_vm1, %v3735_v25, 0 }
 0xa77   :  { %v4325_v3 = vand.u32 4294901760, %v4254_v44 }
 0xa79   :  { %v4326_v5 = vsub.f32 %v4254_v44, %v4325_v3 }
 0xa7b   :  { %v4327_v9 = vand.u32 4294901760, %v4326_v5 }
 0xa7d   :  { %v4328_v11 = vsub.f32 %v4326_v5, %v4327_v9 }
 0xa7f   :  { %v4329_v12 = vand.u32 4294901760, %v4328_v11 }
 0xa81   :  { %15422 = vmatmul.mubr.f32.vlgmr.msra.gmra.mrb[36].mxu0 %v4329_v12 }
 0xa82   :  { %16951 = vmatpush3.bf16.msra.mxu0 %v18423_v58  ;;  %15432 = vmatprep.mubr.msk.f32.mxu0 %vm18077_vm2, %v18078_v27 }
 0xa83   :  { %16952 = vmatprep.subr.bf16.mxu0 %v18075_v29 }
 0xa86   :  { %16954 = vmatpush3.bf16.msra.mxu0 %v18428_v61 }
 0xa87   :  { %16955 = vmatprep.subr.bf16.mxu0 %v18075_v29 }
 0xa89   :  { %15433 = vmatmul.mubr.f32.vlgmr.msra.gmra.mrb[38].mxu0 %v4325_v3 }
 0xa8a   :  { %16957 = vmatpush3.bf16.msra.mxu0 %v18425_v59  ;;  %15443 = vmatprep.mubr.msk.f32.mxu0 %vm18077_vm2, %v18078_v27 }
 0xa8b   :  { %16958 = vmatprep.subr.bf16.mxu0 %v18075_v29 }
 0xa8e   :  { %16960 = vmatpush3.bf16.msra.mxu0 %v18438_v2 }
 0xa8f   :  { %16961 = vmatprep.subr.bf16.mxu0 %v18075_v29 }
 0xa91   :  { %15444 = vmatmul.mubr.f32.vlgmr.msra.gmra.mrb[40].mxu0 %v4326_v5 }
 0xa92   :  { %16963 = vmatpush3.bf16.msra.mxu0 %v18405_v23  ;;  %15454 = vmatprep.mubr.msk.f32.mxu0 %vm18077_vm2, %v18078_v27 }
 0xa93   :  { %16964 = vmatprep.subr.bf16.mxu0 %v18075_v29 }
 0xa96   :  { %16966 = vmatpush3.bf16.msra.mxu0 %v18410_v39 }
 0xa97   :  { %16967 = vmatprep.subr.bf16.mxu0 %v18075_v29 }
 0xa99   :  { %15455 = vmatmul.mubr.f32.vlgmr.msra.gmra.mrb[42].mxu0 %v4327_v9 }
 0xa9a   :  { %16969 = vmatpush3.bf16.msra.mxu0 %v18450_v8  ;;  %15465 = vmatprep.mubr.msk.f32.mxu0 %vm18077_vm2, %v18078_v27 }
 0xa9b   :  { %16970 = vmatprep.subr.bf16.mxu0 %v18075_v29 }
 0xa9e   :  { %16972 = vmatpush3.bf16.msra.mxu0 %v18465_v15 }
 0xa9f   :  { %16973 = vmatprep.subr.bf16.mxu0 %v18075_v29 }
 0xaa1   :  { %15466 = vmatmul.mubr.f32.vlgmr.msra.gmra.mrb[44].mxu0 %v4325_v3 }
 0xaa2   :  { %16975 = vmatpush3.bf16.msra.mxu0 %v18405_v23  ;;  %15476 = vmatprep.mubr.msk.f32.mxu0 %vm18077_vm2, %v18078_v27 }
 0xaa3   :  { %16976 = vmatprep.subr.bf16.mxu0 %v18075_v29 }
 0xaa5   :  { %v4744_v14 = vpop.permute.xlu1 %4743 }
 0xaa6   :  { %16978 = vmatpush3.bf16.msra.mxu0 %v18410_v39  ;;  %v4745_v18 = vsel %vm679_vm1, %v4744_v14, 0 }
 0xaa7   :  { %v18816_v40 = vand.u32 4294901760, %v4745_v18  ;;  %16985 = vmatprep.subr.bf16.mxu0 %v18075_v29 }
 0xaa9   :  { %v4817_v42 = vsub.f32 %v4745_v18, %v18816_v40  ;;  %15477 = vmatmul.mubr.f32.vlgmr.msra.gmra.mrb[46].mxu0 %v4325_v3 }
 0xaaa   :  { %16987 = vmatpush3.bf16.msra.mxu0 %v18502_v37  ;;  %15498 = vmatprep.mubr.msk.f32.mxu0 %vm18077_vm2, %v18078_v27 }
 0xaab   :  { %v4818_v43 = vand.u32 4294901760, %v4817_v42  ;;  %16988 = vmatprep.subr.bf16.mxu0 %v18075_v29 }
 0xaad   :  { %v4819_v33 = vsub.f32 %v4817_v42, %v4818_v43 }
 0xaae   :  { %16990 = vmatpush3.bf16.msra.mxu0 %v18509_v41 }
 0xaaf   :  { %16997 = vmatprep.subr.bf16.mxu0 %v18075_v29  ;;  %v4820_v45 = vand.u32 4294901760, %v4819_v33 }
 0xab1   :  { %15499 = vmatmul.mubr.f32.vlgmr.msra.gmra.mrb[48].mxu0 %v18816_v40  ;;  %15488 = vmatmul.mubr.f32.vlgmr.msra.gmra.mrb[32].mxu1 %v4820_v45 }
 0xab2   :  { %16993 = vmatpush3.bf16.msra.mxu1 %v18532_v22  ;;  %16999 = vmatpush3.bf16.msra.mxu0 %v18481_v21 }
 0xab3   :  { %16994 = vmatprep.subr.bf16.mxu1 %v18075_v29  ;;  %17000 = vmatprep.subr.bf16.mxu0 %v18075_v29 }
 0xab4   :  { %15509 = vmatprep.mubr.msk.f32.mxu1 %vm18077_vm2, %v18078_v27  ;;  %15520 = vmatprep.mubr.msk.f32.mxu0 %vm18077_vm2, %v18078_v27 }
 0xab6   :  { %16996 = vmatpush3.bf16.msra.mxu1 %v18539_v26  ;;  %17002 = vmatpush3.bf16.msra.mxu0 %v18495_v32 }
 0xab7   :  { %17003 = vmatprep.subr.bf16.mxu1 %v18075_v29  ;;  %17009 = vmatprep.subr.bf16.mxu0 %v18075_v29 }
 0xab9   :  { %15510 = vmatmul.mubr.f32.vlgmr.msra.gmra.mrb[34].mxu1 %v4817_v42  ;;  %15521 = vmatmul.mubr.f32.vlgmr.msra.gmra.mrb[50].mxu0 %v4818_v43 }
 0xaba   :  { %17005 = vmatpush3.bf16.msra.mxu1 %v18553_v28  ;;  %17011 = vmatpush3.bf16.msra.mxu0 %v18481_v21 }
 0xabb   :  { %17006 = vmatprep.subr.bf16.mxu1 %v18075_v29  ;;  %17012 = vmatprep.subr.bf16.mxu0 %v18075_v29 }
 0xabc   :  { %15531 = vmatprep.mubr.msk.f32.mxu1 %vm18077_vm2, %v18078_v27  ;;  %15542 = vmatprep.mubr.msk.f32.mxu0 %vm18077_vm2, %v18078_v27 }
 0xabe   :  { %17008 = vmatpush3.bf16.msra.mxu1 %v18563_v38  ;;  %17014 = vmatpush3.bf16.msra.mxu0 %v18495_v32 }
 0xabf   :  { %17015 = vmatprep.subr.bf16.mxu1 %v18075_v29  ;;  %17051 = vmatprep.subr.bf16.mxu0 %v18075_v29 }
 0xac1   :  { %15532 = vmatmul.mubr.f32.vlgmr.msra.gmra.mrb[36].mxu1 %v18816_v40  ;;  %15543 = vmatmul.mubr.f32.vlgmr.msra.gmra.mrb[52].mxu0 %v18816_v40 }
 0xac2   :  { %17017 = vmatpush3.bf16.msra.mxu1 %v18289_v13  ;;  %15553 = vmatprep.mubr.msk.f32.mxu1 %vm18077_vm2, %v18078_v27 }
 0xac3   :  { %17018 = vmatprep.subr.bf16.mxu1 %v18075_v29  ;;  %17053 = vmatpush3.bf16.msra.mxu0 %v18405_v23 }
 0xac4   :  { %17054 = vmatprep.subr.bf16.mxu0 %v18075_v29  ;;  %15619 = vmatprep.mubr.msk.f32.mxu0 %vm18077_vm2, %v18078_v27 }
 0xac6   :  { %17020 = vmatpush3.bf16.msra.mxu1 %v18296_v20 }
 0xac7   :  { %17021 = vmatprep.subr.bf16.mxu1 %v18075_v29  ;;  %17056 = vmatpush3.bf16.msra.mxu0 %v18410_v39 }
 0xac8   :  { %17057 = vmatprep.subr.bf16.mxu0 %v18075_v29 }
 0xac9   :  { %15554 = vmatmul.mubr.f32.vlgmr.msra.gmra.mrb[38].mxu1 %v4820_v45 }
 0xaca   :  { %17023 = vmatpush3.bf16.msra.mxu1 %v18310_v31  ;;  %15564 = vmatprep.mubr.msk.f32.mxu1 %vm18077_vm2, %v18078_v27 }
 0xacb   :  { %17024 = vmatprep.subr.bf16.mxu1 %v18075_v29 }
 0xace   :  { %17026 = vmatpush3.bf16.msra.mxu1 %v18315_v34 }
 0xacf   :  { %17027 = vmatprep.subr.bf16.mxu1 %v18075_v29 }
 0xad1   :  { %15565 = vmatmul.mubr.f32.vlgmr.msra.gmra.mrb[38].mxu1 %v18816_v40 }
 0xad2   :  { %17029 = vmatpush3.bf16.msra.mxu1 %v18325_v35  ;;  %15575 = vmatprep.mubr.msk.f32.mxu1 %vm18077_vm2, %v18078_v27 }
 0xad3   :  { %17030 = vmatprep.subr.bf16.mxu1 %v18075_v29 }
 0xad6   :  { %17032 = vmatpush3.bf16.msra.mxu1 %v18334_v30 }
 0xad7   :  { %17033 = vmatprep.subr.bf16.mxu1 %v18075_v29 }
 0xad9   :  { %15576 = vmatmul.mubr.f32.vlgmr.msra.gmra.mrb[38].mxu1 %v4817_v42 }
 0xada   :  { %17035 = vmatpush3.bf16.msra.mxu1 %v18289_v13  ;;  %15586 = vmatprep.mubr.msk.f32.mxu1 %vm18077_vm2, %v18078_v27 }
 0xadb   :  { %17036 = vmatprep.subr.bf16.mxu1 %v18075_v29 }
 0xade   :  { %17038 = vmatpush3.bf16.msra.mxu1 %v18296_v20 }
 0xadf   :  { %17039 = vmatprep.subr.bf16.mxu1 %v18075_v29 }
 0xae1   :  { %15587 = vmatmul.mubr.f32.vlgmr.msra.gmra.mrb[38].mxu1 %v4818_v43 }
 0xae2   :  { %17041 = vmatpush3.bf16.msra.mxu1 %v18342_v36  ;;  %15597 = vmatprep.mubr.msk.f32.mxu1 %vm18077_vm2, %v18078_v27 }
 0xae3   :  { %17042 = vmatprep.subr.bf16.mxu1 %v18075_v29 }
 0xae6   :  { %17044 = vmatpush3.bf16.msra.mxu1 %v18349_v24 }
 0xae7   :  { %17045 = vmatprep.subr.bf16.mxu1 %v18075_v29 }
 0xae9   :  { %15598 = vmatmul.mubr.f32.vlgmr.msra.gmra.mrb[38].mxu1 %v18816_v40 }
 0xaea   :  { %17047 = vmatpush3.bf16.msra.mxu1 %v18289_v13  ;;  %15608 = vmatprep.mubr.msk.f32.mxu1 %vm18077_vm2, %v18078_v27 }
 0xaeb   :  { %17048 = vmatprep.subr.bf16.mxu1 %v18075_v29 }
 0xaee   :  { %17050 = vmatpush3.bf16.msra.mxu1 %v18296_v20 }
 0xaef   :  { %17087 = vmatprep.subr.bf16.mxu1 %v18075_v29 }
 0xaf1   :  { %15609 = vmatmul.mubr.f32.vlgmr.msra.gmra.mrb[38].mxu1 %v18816_v40 }
 0xaf2   :  { %17089 = vmatpush3.bf16.msra.mxu1 %v18481_v21  ;;  %15685 = vmatprep.mubr.msk.f32.mxu1 %vm18077_vm2, %v18078_v27 }
 0xaf3   :  { %17090 = vmatprep.subr.bf16.mxu1 %v18075_v29 }
 0xaf6   :  { %17092 = vmatpush3.bf16.msra.mxu1 %v18495_v32 }
 0xaf7   :  { %17099 = vmatprep.subr.bf16.mxu1 %v18075_v29 }
 0xb54   :  { %v4331_v46 = vpop.f32.mrb[36].mxu0 }
 0xb55   :  { %v15423_v47 = vpop.f32.mrb[37].mxu0 }
 0xb5c   :  { %v4422_v48 = vpop.f32.mrb[38].mxu0 }
 0xb5d   :  { %v4423_v51 = vadd.f32 %v4422_v48, %v4331_v46  ;;  %v15434_v52 = vpop.f32.mrb[39].mxu0 }
 0xb64   :  { %v4502_v10 = vpop.f32.mrb[40].mxu0 }
 0xb65   :  { %v4503_v54 = vadd.f32 %v4502_v10, %v4423_v51  ;;  %v15445_v55 = vpop.f32.mrb[41].mxu0 }
 0xb6c   :  { %v4579_v56 = vpop.f32.mrb[42].mxu0 }
 0xb6d   :  { %v4580_v60 = vadd.f32 %v4579_v56, %v4503_v54  ;;  %v15456_v62 = vpop.f32.mrb[43].mxu0 }
 0xb74   :  { %v4662_v4 = vpop.f32.mrb[44].mxu0 }
 0xb75   :  { %v4663_v63 = vadd.f32 %v4662_v4, %v4580_v60  ;;  %v15467_v1 = vpop.f32.mrb[45].mxu0 }
 0xb7c   :  { %v4737_v19 = vpop.f32.mrb[46].mxu0 }
 0xb7d   :  { %v4738_v6 = vadd.f32 %v4737_v19, %v4663_v63  ;;  %v15478_v7 = vpop.f32.mrb[47].mxu0 }
 0xb84   :  { %v4913_v16 = vpop.f32.mrb[48].mxu0  ;;  %v4822_v17 = vpop.f32.mrb[32].mxu1 }
 0xb85   :  { %v4823_v25 = vadd.f32 %v4822_v17, %v4738_v6  ;;  %v15500_v44 = vpop.f32.mrb[49].mxu0  ;;  %v15489_v3 = vpop.f32.mrb[33].mxu1 }
 0xb87   :  { %v4914_v5 = vadd.f32 %v4913_v16, %v4823_v25 }
 0xb8c   :  { %v4993_v9 = vpop.f32.mrb[34].mxu1  ;;  %v5070_v11 = vpop.f32.mrb[50].mxu0 }
 0xb8d   :  { %v4994_v12 = vadd.f32 %v4993_v9, %v4914_v5  ;;  %v15511_v14 = vpop.f32.mrb[35].mxu1  ;;  %v15522_v18 = vpop.f32.mrb[51].mxu0  ;;  %v5759_v9 = vrot.slane %v18778_v0, 6 }
 0xb8f   :  { %v5071_v40 = vadd.f32 %v5070_v11, %v4994_v12 }
 0xb94   :  { %v5153_v42 = vpop.f32.mrb[36].mxu1  ;;  %v5228_v43 = vpop.f32.mrb[52].mxu0 }
 0xb95   :  { %v5154_v33 = vadd.f32 %v5153_v42, %v5071_v40  ;;  %v15533_v45 = vpop.f32.mrb[37].mxu1  ;;  %v15544_v46 = vpop.f32.mrb[53].mxu0 }
 0xb97   :  { %v5229_v47 = vadd.f32 %v5228_v43, %v5154_v33 }
 0xb99   :  { %v5232_v48 = vadd.f32 %v18623_v49, %v5229_v47 }
 0xb9b   :  { %17806 = vtanh.f32 %v5232_v48  ;;  %v14078_v60 = vmul.f32 -1.442695, %v5232_v48 }
 0xba5   :  { %v17807_v51 = vpop.eup %17806 }
 0xba6   :  { %5242 = vrot.lane.b32.xlu0 %v17807_v51, %s18076_s22 }
 0xbc4   :  { %v5743_v52 = vpop.f32.mrb[38].mxu1 }
 0xbc5   :  { %v5748_v10 = vrot.slane %v5743_v52, 2  ;;  %v15610_v54 = vpop.f32.mrb[39].mxu1 }
 0xbc7   :  { %v5750_v55 = vadd.f32 %v18377_v53, %v5748_v10 }
 0xbc9   :  { %17808 = vtanh.f32 %v5750_v55  ;;  %v14079_v19 = vmul.f32 -1.442695, %v5750_v55 }
 0xbca   :  { %17810 = vpow2.f32 %v14078_v60 }
 0xbd3   :  { %v17809_v56 = vpop.eup %17808 }
 0xbd4   :  { %5763 = vrot.lane.b32.xlu1 %v17809_v56, %s18076_s22  ;;  %v17811_v62 = vpop.eup %17810 }
 0xbd5   :  { %v5236_v4 = vadd.f32 1.0, %v17811_v62 }
 0xbd7   :  { %17812 = vrcp.f32 %v5236_v4 }
 0xbd8   :  { %17814 = vpow2.f32 %v14079_v19 }
 0xbe1   :  { %v17813_v63 = vpop.eup %17812 }
 0xbe2   :  { %v17815_v6 = vpop.eup %17814  ;;  %v5240_v25 = vmul.f32 %v17813_v63, %v18773_v57 }
 0xbe3   :  { %v5754_v7 = vadd.f32 1.0, %v17815_v6 }
 0xbe5   :  { %17816 = vrcp.f32 %v5754_v7 }
 0xbef   :  { %v17817_v53 = vpop.eup %17816 }
 0xbf0   :  { %v5761_v11 = vmul.f32 %v17817_v53, %v5759_v9 }
 0xc18   :  { %v5243_v49 = vpop.permute.xlu0 %5242 }
 0xc19   :  { %v5245_v1 = vmul.f32 %v17813_v63, %v5243_v49 }
 0xc1b   :  { %5247 = vrot.lane.b32.xlu0 %v5245_v1, %s18076_s22 }
 0xc46   :  { %v5764_v16 = vpop.permute.xlu1 %5763 }
 0xc47   :  { %v5766_v17 = vmul.f32 %v17817_v53, %v5764_v16 }
 0xc49   :  { %5768 = vrot.lane.b32.xlu1 %v5766_v17, %s18076_s22 }
 0xc8d   :  { %v5248_v44 = vpop.permute.xlu0 %5247 }
 0xc8e   :  { %v18911_v3 = vadd.f32 %v5248_v44, %v5240_v25 }
 0xc90   :  { %17818 = vtanh.f32 %v18911_v3 }
 0xc9a   :  { %v17819_v5 = vpop.eup %17818 }
 0xc9b   :  { %5253 = vrot.lane.b32.xlu0 %v17819_v5, %s18076_s22 }
 0xcbb   :  { %v5769_v12 = vpop.permute.xlu1 %5768 }
 0xcbc   :  { %v18916_v14 = vadd.f32 %v5769_v12, %v5761_v11 }
 0xcbe   :  { %17820 = vtanh.f32 %v18916_v14 }
 0xcc8   :  { %v17821_v18 = vpop.eup %17820 }
 0xcc9   :  { %5774 = vrot.lane.b32.xlu1 %v17821_v18, %s18076_s22 }
 0xd0d   :  { %v5254_v57 = vpop.permute.xlu0 %5253 }
 0xd0e   :  { %v5256_v40 = vmul.f32 %v17813_v63, %v5254_v57 }
 0xd10   :  { %5258 = vrot.lane.b32.xlu0 %v5256_v40, %s18079_s4 }
 0xd3b   :  { %v5775_v42 = vpop.permute.xlu1 %5774 }
 0xd3c   :  { %v5777_v43 = vmul.f32 %v17817_v53, %v5775_v42 }
 0xd3e   :  { %v6266_v33 = vrot.slane %v5777_v43, 6 }
 0xd40   :  { %6267 = vrot.lane.b32.xlu1 %v6266_v33, %s18079_s4 }
 0xd82   :  { %v5259_v45 = vpop.permute.xlu0 %5258 }
 0xd83   :  { %5261 = vst.msk [vmem:[#allocation2 + $0x4] sm:$0x3] %vm2212_vm3, %v5259_v45  ;;  %v5778_v0 = vsel %vm679_vm1, %v5259_v45, 0 }
 0xd84   :  { %v5849_v46 = vand.u32 4294901760, %v5778_v0 }
 0xd86   :  { %v5850_v47 = vsub.f32 %v5778_v0, %v5849_v46 }
 0xd88   :  { %v5851_v48 = vand.u32 4294901760, %v5850_v47 }
 0xd8a   :  { %v5852_v51 = vsub.f32 %v5850_v47, %v5851_v48 }
 0xd8c   :  { %v5853_v52 = vand.u32 4294901760, %v5852_v51 }
 0xd8e   :  { %15620 = vmatmul.mubr.f32.vlgmr.msra.gmra.mrb[54].mxu0 %v5853_v52 }
 0xd8f   :  { %17059 = vmatpush3.bf16.msra.mxu0 %v18423_v58  ;;  %15630 = vmatprep.mubr.msk.f32.mxu0 %vm18077_vm2, %v18078_v27 }
 0xd90   :  { %17060 = vmatprep.subr.bf16.mxu0 %v18075_v29 }
 0xd93   :  { %17062 = vmatpush3.bf16.msra.mxu0 %v18428_v61 }
 0xd94   :  { %17063 = vmatprep.subr.bf16.mxu0 %v18075_v29 }
 0xd96   :  { %15631 = vmatmul.mubr.f32.vlgmr.msra.gmra.mrb[56].mxu0 %v5849_v46 }
 0xd97   :  { %17065 = vmatpush3.bf16.msra.mxu0 %v18425_v59  ;;  %15641 = vmatprep.mubr.msk.f32.mxu0 %vm18077_vm2, %v18078_v27 }
 0xd98   :  { %17066 = vmatprep.subr.bf16.mxu0 %v18075_v29 }
 0xd9b   :  { %17068 = vmatpush3.bf16.msra.mxu0 %v18438_v2 }
 0xd9c   :  { %17069 = vmatprep.subr.bf16.mxu0 %v18075_v29 }
 0xd9e   :  { %15642 = vmatmul.mubr.f32.vlgmr.msra.gmra.mrb[58].mxu0 %v5850_v47 }
 0xd9f   :  { %17071 = vmatpush3.bf16.msra.mxu0 %v18405_v23  ;;  %15652 = vmatprep.mubr.msk.f32.mxu0 %vm18077_vm2, %v18078_v27 }
 0xda0   :  { %17072 = vmatprep.subr.bf16.mxu0 %v18075_v29 }
 0xda3   :  { %17074 = vmatpush3.bf16.msra.mxu0 %v18410_v39 }
 0xda4   :  { %17075 = vmatprep.subr.bf16.mxu0 %v18075_v29 }
 0xda6   :  { %15653 = vmatmul.mubr.f32.vlgmr.msra.gmra.mrb[60].mxu0 %v5851_v48 }
 0xda7   :  { %17077 = vmatpush3.bf16.msra.mxu0 %v18450_v8  ;;  %15663 = vmatprep.mubr.msk.f32.mxu0 %vm18077_vm2, %v18078_v27 }
 0xda8   :  { %17078 = vmatprep.subr.bf16.mxu0 %v18075_v29 }
 0xdab   :  { %17080 = vmatpush3.bf16.msra.mxu0 %v18465_v15 }
 0xdac   :  { %17081 = vmatprep.subr.bf16.mxu0 %v18075_v29 }
 0xdae   :  { %15664 = vmatmul.mubr.f32.vlgmr.msra.gmra.mrb[62].mxu0 %v5849_v46 }
 0xdaf   :  { %17083 = vmatpush3.bf16.msra.mxu0 %v18405_v23  ;;  %15674 = vmatprep.mubr.msk.f32.mxu0 %vm18077_vm2, %v18078_v27 }
 0xdb0   :  { %17084 = vmatprep.subr.bf16.mxu0 %v18075_v29 }
 0xdb2   :  { %v6268_v10 = vpop.permute.xlu1 %6267 }
 0xdb3   :  { %17086 = vmatpush3.bf16.msra.mxu0 %v18410_v39  ;;  %v6269_v54 = vsel %vm679_vm1, %v6268_v10, 0 }
 0xdb4   :  { %v18954_v55 = vand.u32 4294901760, %v6269_v54  ;;  %17093 = vmatprep.subr.bf16.mxu0 %v18075_v29 }
 0xdb6   :  { %v6341_v56 = vsub.f32 %v6269_v54, %v18954_v55  ;;  %15675 = vmatmul.mubr.f32.vlgmr.msra.gmra.mrb[64].mxu0 %v5849_v46 }
 0xdb7   :  { %17095 = vmatpush3.bf16.msra.mxu0 %v18502_v37  ;;  %15696 = vmatprep.mubr.msk.f32.mxu0 %vm18077_vm2, %v18078_v27 }
 0xdb8   :  { %v6342_v60 = vand.u32 4294901760, %v6341_v56  ;;  %17096 = vmatprep.subr.bf16.mxu0 %v18075_v29 }
 0xdba   :  { %v6343_v62 = vsub.f32 %v6341_v56, %v6342_v60 }
 0xdbb   :  { %17098 = vmatpush3.bf16.msra.mxu0 %v18509_v41 }
 0xdbc   :  { %17105 = vmatprep.subr.bf16.mxu0 %v18075_v29  ;;  %v6344_v4 = vand.u32 4294901760, %v6343_v62 }
 0xdbe   :  { %15697 = vmatmul.mubr.f32.vlgmr.msra.gmra.mrb[66].mxu0 %v18954_v55  ;;  %15686 = vmatmul.mubr.f32.vlgmr.msra.gmra.mrb[40].mxu1 %v6344_v4 }
 0xdbf   :  { %17101 = vmatpush3.bf16.msra.mxu1 %v18532_v22  ;;  %17107 = vmatpush3.bf16.msra.mxu0 %v18481_v21 }
 0xdc0   :  { %17102 = vmatprep.subr.bf16.mxu1 %v18075_v29  ;;  %17108 = vmatprep.subr.bf16.mxu0 %v18075_v29 }
 0xdc1   :  { %15707 = vmatprep.mubr.msk.f32.mxu1 %vm18077_vm2, %v18078_v27  ;;  %15718 = vmatprep.mubr.msk.f32.mxu0 %vm18077_vm2, %v18078_v27 }
 0xdc3   :  { %17104 = vmatpush3.bf16.msra.mxu1 %v18539_v26  ;;  %17110 = vmatpush3.bf16.msra.mxu0 %v18495_v32 }
 0xdc4   :  { %17111 = vmatprep.subr.bf16.mxu1 %v18075_v29  ;;  %17117 = vmatprep.subr.bf16.mxu0 %v18075_v29 }
 0xdc6   :  { %15708 = vmatmul.mubr.f32.vlgmr.msra.gmra.mrb[42].mxu1 %v6341_v56  ;;  %15719 = vmatmul.mubr.f32.vlgmr.msra.gmra.mrb[68].mxu0 %v6342_v60 }
 0xdc7   :  { %17113 = vmatpush3.bf16.msra.mxu1 %v18553_v28  ;;  %17119 = vmatpush3.bf16.msra.mxu0 %v18481_v21 }
 0xdc8   :  { %17114 = vmatprep.subr.bf16.mxu1 %v18075_v29  ;;  %17120 = vmatprep.subr.bf16.mxu0 %v18075_v29 }
 0xdc9   :  { %15729 = vmatprep.mubr.msk.f32.mxu1 %vm18077_vm2, %v18078_v27  ;;  %15740 = vmatprep.mubr.msk.f32.mxu0 %vm18077_vm2, %v18078_v27 }
 0xdcb   :  { %17116 = vmatpush3.bf16.msra.mxu1 %v18563_v38  ;;  %17122 = vmatpush3.bf16.msra.mxu0 %v18495_v32 }
 0xdcc   :  { %17123 = vmatprep.subr.bf16.mxu1 %v18075_v29  ;;  %17129 = vmatprep.subr.bf16.mxu0 %v18075_v29 }
 0xdce   :  { %15730 = vmatmul.mubr.f32.vlgmr.msra.gmra.mrb[44].mxu1 %v18954_v55  ;;  %15741 = vmatmul.mubr.f32.vlgmr.msra.gmra.mrb[70].mxu0 %v18954_v55 }
 0xdcf   :  { %17125 = vmatpush3.bf16.msra.mxu1 %v18289_v13  ;;  %17131 = vmatpush3.bf16.msra.mxu0 %v18310_v31 }
 0xdd0   :  { %17126 = vmatprep.subr.bf16.mxu1 %v18075_v29  ;;  %17132 = vmatprep.subr.bf16.mxu0 %v18075_v29 }
 0xdd1   :  { %15751 = vmatprep.mubr.msk.f32.mxu1 %vm18077_vm2, %v18078_v27  ;;  %15762 = vmatprep.mubr.msk.f32.mxu0 %vm18077_vm2, %v18078_v27 }
 0xdd3   :  { %17128 = vmatpush3.bf16.msra.mxu1 %v18296_v20  ;;  %17134 = vmatpush3.bf16.msra.mxu0 %v18315_v34 }
 0xdd4   :  { %17135 = vmatprep.subr.bf16.mxu1 %v18075_v29  ;;  %17141 = vmatprep.subr.bf16.mxu0 %v18075_v29 }
 0xdd6   :  { %15752 = vmatmul.mubr.f32.vlgmr.msra.gmra.mrb[46].mxu1 %v6344_v4  ;;  %15763 = vmatmul.mubr.f32.vlgmr.msra.gmra.mrb[72].mxu0 %v18954_v55 }
 0xdd7   :  { %17137 = vmatpush3.bf16.msra.mxu1 %v18325_v35  ;;  %17143 = vmatpush3.bf16.msra.mxu0 %v18289_v13 }
 0xdd8   :  { %17138 = vmatprep.subr.bf16.mxu1 %v18075_v29  ;;  %17144 = vmatprep.subr.bf16.mxu0 %v18075_v29 }
 0xdd9   :  { %15773 = vmatprep.mubr.msk.f32.mxu1 %vm18077_vm2, %v18078_v27  ;;  %15784 = vmatprep.mubr.msk.f32.mxu0 %vm18077_vm2, %v18078_v27 }
 0xddb   :  { %17140 = vmatpush3.bf16.msra.mxu1 %v18334_v30  ;;  %17146 = vmatpush3.bf16.msra.mxu0 %v18296_v20 }
 0xddc   :  { %17147 = vmatprep.subr.bf16.mxu1 %v18075_v29  ;;  %17153 = vmatprep.subr.bf16.mxu0 %v18075_v29 }
 0xdde   :  { %15774 = vmatmul.mubr.f32.vlgmr.msra.gmra.mrb[48].mxu1 %v6341_v56  ;;  %15785 = vmatmul.mubr.f32.vlgmr.msra.gmra.mrb[74].mxu0 %v6342_v60 }
 0xddf   :  { %17149 = vmatpush3.bf16.msra.mxu1 %v18342_v36  ;;  %17155 = vmatpush3.bf16.msra.mxu0 %v18289_v13 }
 0xde0   :  { %17150 = vmatprep.subr.bf16.mxu1 %v18075_v29  ;;  %17156 = vmatprep.subr.bf16.mxu0 %v18075_v29 }
 0xde1   :  { %15795 = vmatprep.mubr.msk.f32.mxu1 %vm18077_vm2, %v18078_v27  ;;  %15806 = vmatprep.mubr.msk.f32.mxu0 %vm18077_vm2, %v18078_v27 }
 0xde3   :  { %17152 = vmatpush3.bf16.msra.mxu1 %v18349_v24  ;;  %17158 = vmatpush3.bf16.msra.mxu0 %v18296_v20 }
 0xde4   :  { %17165 = vmatprep.subr.bf16.mxu0 %v18075_v29  ;;  %17159 = vmatprep.subr.bf16.mxu1 %v18075_v29 }
 0xde6   :  { %15796 = vmatmul.mubr.f32.vlgmr.msra.gmra.mrb[50].mxu1 %v18954_v55  ;;  %15807 = vmatmul.mubr.f32.vlgmr.msra.gmra.mrb[76].mxu0 %v18954_v55 }
 0xde7   :  { %17167 = vmatpush3.bf16.msra.mxu0 %v18423_v58  ;;  %15828 = vmatprep.mubr.msk.f32.mxu0 %vm18077_vm2, %v18078_v27 }
 0xde8   :  { %17168 = vmatprep.subr.bf16.mxu0 %v18075_v29  ;;  %17161 = vmatpush3.bf16.msra.mxu1 %v18405_v23 }
 0xde9   :  { %17162 = vmatprep.subr.bf16.mxu1 %v18075_v29  ;;  %15817 = vmatprep.mubr.msk.f32.mxu1 %vm18077_vm2, %v18078_v27 }
 0xdeb   :  { %17170 = vmatpush3.bf16.msra.mxu0 %v18428_v61 }
 0xdec   :  { %17177 = vmatprep.subr.bf16.mxu0 %v18075_v29  ;;  %17164 = vmatpush3.bf16.msra.mxu1 %v18410_v39 }
 0xded   :  { %17171 = vmatprep.subr.bf16.mxu1 %v18075_v29 }
 0xe61   :  { %v5855_v63 = vpop.f32.mrb[54].mxu0 }
 0xe62   :  { %v15621_v49 = vpop.f32.mrb[55].mxu0 }
 0xe69   :  { %v5946_v1 = vpop.f32.mrb[56].mxu0 }
 0xe6a   :  { %v5947_v19 = vadd.f32 %v5946_v1, %v5855_v63  ;;  %v15632_v6 = vpop.f32.mrb[57].mxu0  ;;  %v19042_v63 = vld [vmem:[#allocation6 + $0x1] ss:$0 sm:$0xff] }
 0xe71   :  { %v6026_v7 = vpop.f32.mrb[58].mxu0 }
 0xe72   :  { %v6027_v53 = vadd.f32 %v6026_v7, %v5947_v19  ;;  %v15643_v16 = vpop.f32.mrb[59].mxu0 }
 0xe79   :  { %v6103_v17 = vpop.f32.mrb[60].mxu0 }
 0xe7a   :  { %v6104_v25 = vadd.f32 %v6103_v17, %v6027_v53  ;;  %v15654_v44 = vpop.f32.mrb[61].mxu0 }
 0xe81   :  { %v6186_v5 = vpop.f32.mrb[62].mxu0 }
 0xe82   :  { %v6187_v9 = vadd.f32 %v6186_v5, %v6104_v25  ;;  %v15665_v11 = vpop.f32.mrb[63].mxu0 }
 0xe89   :  { %v6261_v12 = vpop.f32.mrb[64].mxu0 }
 0xe8a   :  { %v6262_v18 = vadd.f32 %v6261_v12, %v6187_v9  ;;  %v15676_v57 = vpop.f32.mrb[65].mxu0 }
 0xe91   :  { %v6437_v40 = vpop.f32.mrb[66].mxu0  ;;  %v6346_v42 = vpop.f32.mrb[40].mxu1 }
 0xe92   :  { %v6347_v43 = vadd.f32 %v6346_v42, %v6262_v18  ;;  %v15698_v33 = vpop.f32.mrb[67].mxu0  ;;  %v15687_v45 = vpop.f32.mrb[41].mxu1 }
 0xe94   :  { %v6438_v0 = vadd.f32 %v6437_v40, %v6347_v43 }
 0xe99   :  { %v6517_v46 = vpop.f32.mrb[42].mxu1  ;;  %v6594_v47 = vpop.f32.mrb[68].mxu0 }
 0xe9a   :  { %v6518_v48 = vadd.f32 %v6517_v46, %v6438_v0  ;;  %v15709_v51 = vpop.f32.mrb[43].mxu1  ;;  %v15720_v52 = vpop.f32.mrb[69].mxu0 }
 0xe9c   :  { %v6595_v10 = vadd.f32 %v6594_v47, %v6518_v48 }
 0xea1   :  { %v6677_v54 = vpop.f32.mrb[44].mxu1  ;;  %v6752_v55 = vpop.f32.mrb[70].mxu0 }
 0xea2   :  { %v6678_v56 = vadd.f32 %v6677_v54, %v6595_v10  ;;  %v15731_v60 = vpop.f32.mrb[45].mxu1  ;;  %v15742_v62 = vpop.f32.mrb[71].mxu0 }
 0xea4   :  { %v6753_v4 = vadd.f32 %v6752_v55, %v6678_v56 }
 0xea6   :  { %v6756_v49 = vadd.f32 %v19042_v63, %v6753_v4 }
 0xea8   :  { %17822 = vtanh.f32 %v6756_v49  ;;  %v14080_v0 = vmul.f32 -1.442695, %v6756_v49 }
 0xea9   :  { %v6861_v1 = vpop.f32.mrb[46].mxu1  ;;  %v6952_v19 = vpop.f32.mrb[72].mxu0 }
 0xeaa   :  { %v6953_v6 = vadd.f32 %v6952_v19, %v6861_v1  ;;  %v15753_v7 = vpop.f32.mrb[47].mxu1  ;;  %v15764_v53 = vpop.f32.mrb[73].mxu0 }
 0xeb1   :  { %v7032_v16 = vpop.f32.mrb[48].mxu1  ;;  %v7109_v17 = vpop.f32.mrb[74].mxu0 }
 0xeb2   :  { %v17823_v25 = vpop.eup %17822  ;;  %v7033_v44 = vadd.f32 %v7032_v16, %v6953_v6  ;;  %v15775_v5 = vpop.f32.mrb[49].mxu1  ;;  %v7280_v6 = vrot.slane %v18916_v14, 6 }
 0xeb3   :  { %v15786_v9 = vpop.f32.mrb[75].mxu0  ;;  %6766 = vrot.lane.b32.xlu0 %v17823_v25, %s18076_s22 }
 0xeb4   :  { %v7110_v11 = vadd.f32 %v7109_v17, %v7033_v44 }
 0xeb9   :  { %v7192_v12 = vpop.f32.mrb[50].mxu1  ;;  %v7267_v18 = vpop.f32.mrb[76].mxu0 }
 0xeba   :  { %v7193_v57 = vadd.f32 %v7192_v12, %v7110_v11  ;;  %v15797_v40 = vpop.f32.mrb[51].mxu1  ;;  %v15808_v42 = vpop.f32.mrb[77].mxu0 }
 0xebc   :  { %v7268_v43 = vadd.f32 %v7267_v18, %v7193_v57 }
 0xebe   :  { %v7271_v33 = vadd.f32 %v18375_v50, %v7268_v43 }
 0xec0   :  { %17824 = vtanh.f32 %v7271_v33  ;;  %v14081_v48 = vmul.f32 -1.442695, %v7271_v33 }
 0xec1   :  { %17826 = vpow2.f32 %v14080_v0 }
 0xeca   :  { %v17825_v45 = vpop.eup %17824 }
 0xecb   :  { %7284 = vrot.lane.b32.xlu1 %v17825_v45, %s18076_s22  ;;  %v17827_v46 = vpop.eup %17826 }
 0xecc   :  { %v6760_v47 = vadd.f32 1.0, %v17827_v46 }
 0xece   :  { %17828 = vrcp.f32 %v6760_v47 }
 0xecf   :  { %17830 = vpow2.f32 %v14081_v48 }
 0xed8   :  { %v17829_v51 = vpop.eup %17828 }
 0xed9   :  { %v17831_v54 = vpop.eup %17830  ;;  %v6764_v4 = vmul.f32 %v17829_v51, %v18911_v3 }
 0xeda   :  { %v7275_v55 = vadd.f32 1.0, %v17831_v54 }
 0xedc   :  { %17832 = vrcp.f32 %v7275_v55 }
 0xee6   :  { %v17833_v56 = vpop.eup %17832 }
 0xee7   :  { %v7282_v7 = vmul.f32 %v17833_v56, %v7280_v6 }
 0xf25   :  { %v6767_v52 = vpop.permute.xlu0 %6766 }
 0xf26   :  { %v6769_v10 = vmul.f32 %v17829_v51, %v6767_v52 }
 0xf28   :  { %6771 = vrot.lane.b32.xlu0 %v6769_v10, %s18076_s22 }
 0xf3d   :  { %v7285_v60 = vpop.permute.xlu1 %7284 }
 0xf3e   :  { %v7287_v62 = vmul.f32 %v17833_v56, %v7285_v60 }
 0xf40   :  { %7289 = vrot.lane.b32.xlu1 %v7287_v62, %s18076_s22 }
 0xf9a   :  { %v6772_v49 = vpop.permute.xlu0 %6771 }
 0xf9b   :  { %v19051_v1 = vadd.f32 %v6772_v49, %v6764_v4 }
 0xf9d   :  { %17834 = vtanh.f32 %v19051_v1 }
 0xfa7   :  { %v17835_v19 = vpop.eup %17834 }
 0xfa8   :  { %6777 = vrot.lane.b32.xlu0 %v17835_v19, %s18076_s22 }
 0xfb2   :  { %v7290_v53 = vpop.permute.xlu1 %7289 }
 0xfb3   :  { %v19056_v16 = vadd.f32 %v7290_v53, %v7282_v7 }
 0xfb5   :  { %17836 = vtanh.f32 %v19056_v16 }
 0xfbf   :  { %v17837_v17 = vpop.eup %17836 }
 0xfc0   :  { %7295 = vrot.lane.b32.xlu1 %v17837_v17, %s18076_s22 }
0x101a   :  { %v6778_v3 = vpop.permute.xlu0 %6777 }
0x101b   :  { %v6780_v25 = vmul.f32 %v17829_v51, %v6778_v3 }
0x101d   :  { %6782 = vrot.lane.b32.xlu0 %v6780_v25, %s18079_s4 }
0x1032   :  { %v7296_v44 = vpop.permute.xlu1 %7295 }
0x1033   :  { %v7298_v5 = vmul.f32 %v17833_v56, %v7296_v44 }
0x1035   :  { %7787 = vrot.lane.b32.xlu1 %v7298_v5, %s18079_s4 }
0x108f   :  { %v6783_v9 = vpop.permute.xlu0 %6782 }
0x1090   :  { %6785 = vst.msk [vmem:[#allocation2 + $0x6] sm:$0x3] %vm2212_vm3, %v6783_v9  ;;  %v7299_v14 = vsel %vm679_vm1, %v6783_v9, 0 }
0x1091   :  { %v7370_v11 = vand.u32 4294901760, %v7299_v14 }
0x1093   :  { %v7371_v12 = vsub.f32 %v7299_v14, %v7370_v11  ;;  %15829 = vmatmul.mubr.f32.vlgmr.msra.gmra.mrb[78].mxu0 %v7370_v11 }
0x1094   :  { %17179 = vmatpush3.bf16.msra.mxu0 %v18405_v23  ;;  %15850 = vmatprep.mubr.msk.f32.mxu0 %vm18077_vm2, %v18078_v27 }
0x1095   :  { %v7372_v18 = vand.u32 4294901760, %v7371_v12  ;;  %17180 = vmatprep.subr.bf16.mxu0 %v18075_v29 }
0x1097   :  { %v7373_v57 = vsub.f32 %v7371_v12, %v7372_v18 }
0x1098   :  { %17182 = vmatpush3.bf16.msra.mxu0 %v18410_v39 }
0x1099   :  { %17189 = vmatprep.subr.bf16.mxu0 %v18075_v29  ;;  %v7374_v40 = vand.u32 4294901760, %v7373_v57 }
0x109b   :  { %15851 = vmatmul.mubr.f32.vlgmr.msra.gmra.mrb[80].mxu0 %v7372_v18  ;;  %15818 = vmatmul.mubr.f32.vlgmr.msra.gmra.mrb[52].mxu1 %v7374_v40 }
0x109c   :  { %17173 = vmatpush3.bf16.msra.mxu1 %v18425_v59  ;;  %17191 = vmatpush3.bf16.msra.mxu0 %v18405_v23 }
0x109d   :  { %17174 = vmatprep.subr.bf16.mxu1 %v18075_v29  ;;  %17192 = vmatprep.subr.bf16.mxu0 %v18075_v29 }
0x109e   :  { %15839 = vmatprep.mubr.msk.f32.mxu1 %vm18077_vm2, %v18078_v27  ;;  %15872 = vmatprep.mubr.msk.f32.mxu0 %vm18077_vm2, %v18078_v27 }
0x10a0   :  { %17176 = vmatpush3.bf16.msra.mxu1 %v18438_v2  ;;  %17194 = vmatpush3.bf16.msra.mxu0 %v18410_v39 }
0x10a1   :  { %17183 = vmatprep.subr.bf16.mxu1 %v18075_v29  ;;  %17201 = vmatprep.subr.bf16.mxu0 %v18075_v29 }
0x10a3   :  { %15840 = vmatmul.mubr.f32.vlgmr.msra.gmra.mrb[54].mxu1 %v7371_v12  ;;  %15873 = vmatmul.mubr.f32.vlgmr.msra.gmra.mrb[82].mxu0 %v7370_v11 }
0x10a4   :  { %17185 = vmatpush3.bf16.msra.mxu1 %v18450_v8  ;;  %17203 = vmatpush3.bf16.msra.mxu0 %v18502_v37 }
0x10a5   :  { %17186 = vmatprep.subr.bf16.mxu1 %v18075_v29  ;;  %17204 = vmatprep.subr.bf16.mxu0 %v18075_v29 }
0x10a6   :  { %15861 = vmatprep.mubr.msk.f32.mxu1 %vm18077_vm2, %v18078_v27  ;;  %15894 = vmatprep.mubr.msk.f32.mxu0 %vm18077_vm2, %v18078_v27 }
0x10a7   :  { %v7788_v42 = vpop.permute.xlu1 %7787 }
0x10a8   :  { %17188 = vmatpush3.bf16.msra.mxu1 %v18465_v15  ;;  %17206 = vmatpush3.bf16.msra.mxu0 %v18509_v41  ;;  %v7789_v43 = vsel %vm679_vm1, %v7788_v42, 0 }
0x10a9   :  { %v19093_v33 = vand.u32 4294901760, %v7789_v43  ;;  %17195 = vmatprep.subr.bf16.mxu1 %v18075_v29  ;;  %17213 = vmatprep.subr.bf16.mxu0 %v18075_v29 }
0x10ab   :  { %v7861_v45 = vsub.f32 %v7789_v43, %v19093_v33  ;;  %15862 = vmatmul.mubr.f32.vlgmr.msra.gmra.mrb[56].mxu1 %v7370_v11  ;;  %15895 = vmatmul.mubr.f32.vlgmr.msra.gmra.mrb[84].mxu0 %v19093_v33 }
0x10ac   :  { %17197 = vmatpush3.bf16.msra.mxu1 %v18481_v21  ;;  %17215 = vmatpush3.bf16.msra.mxu0 %v18481_v21 }
0x10ad   :  { %17198 = vmatprep.subr.bf16.mxu1 %v18075_v29  ;;  %17216 = vmatprep.subr.bf16.mxu0 %v18075_v29  ;;  %v7862_v0 = vand.u32 4294901760, %v7861_v45 }
0x10ae   :  { %15916 = vmatprep.mubr.msk.f32.mxu0 %vm18077_vm2, %v18078_v27  ;;  %15883 = vmatprep.mubr.msk.f32.mxu1 %vm18077_vm2, %v18078_v27 }
0x10af   :  { %v7863_v46 = vsub.f32 %v7861_v45, %v7862_v0 }
0x10b0   :  { %17200 = vmatpush3.bf16.msra.mxu1 %v18495_v32  ;;  %17218 = vmatpush3.bf16.msra.mxu0 %v18495_v32 }
0x10b1   :  { %17207 = vmatprep.subr.bf16.mxu1 %v18075_v29  ;;  %17225 = vmatprep.subr.bf16.mxu0 %v18075_v29  ;;  %v7864_v47 = vand.u32 4294901760, %v7863_v46 }
0x10b3   :  { %15917 = vmatmul.mubr.f32.vlgmr.msra.gmra.mrb[86].mxu0 %v7862_v0  ;;  %15884 = vmatmul.mubr.f32.vlgmr.msra.gmra.mrb[58].mxu1 %v7864_v47 }
0x10b4   :  { %17209 = vmatpush3.bf16.msra.mxu1 %v18532_v22  ;;  %17227 = vmatpush3.bf16.msra.mxu0 %v18481_v21 }
0x10b5   :  { %17210 = vmatprep.subr.bf16.mxu1 %v18075_v29  ;;  %17228 = vmatprep.subr.bf16.mxu0 %v18075_v29 }
0x10b6   :  { %15905 = vmatprep.mubr.msk.f32.mxu1 %vm18077_vm2, %v18078_v27  ;;  %15938 = vmatprep.mubr.msk.f32.mxu0 %vm18077_vm2, %v18078_v27 }
0x10b8   :  { %17212 = vmatpush3.bf16.msra.mxu1 %v18539_v26  ;;  %17230 = vmatpush3.bf16.msra.mxu0 %v18495_v32 }
0x10b9   :  { %17219 = vmatprep.subr.bf16.mxu1 %v18075_v29  ;;  %17267 = vmatprep.subr.bf16.mxu0 %v18075_v29 }
0x10bb   :  { %15906 = vmatmul.mubr.f32.vlgmr.msra.gmra.mrb[60].mxu1 %v7861_v45  ;;  %15939 = vmatmul.mubr.f32.vlgmr.msra.gmra.mrb[88].mxu0 %v19093_v33 }
0x10bc   :  { %17221 = vmatpush3.bf16.msra.mxu1 %v18553_v28  ;;  %15927 = vmatprep.mubr.msk.f32.mxu1 %vm18077_vm2, %v18078_v27 }
0x10bd   :  { %17222 = vmatprep.subr.bf16.mxu1 %v18075_v29  ;;  %17269 = vmatpush3.bf16.msra.mxu0 %v18405_v23 }
0x10be   :  { %17270 = vmatprep.subr.bf16.mxu0 %v18075_v29  ;;  %16015 = vmatprep.mubr.msk.f32.mxu0 %vm18077_vm2, %v18078_v27 }
0x10c0   :  { %17224 = vmatpush3.bf16.msra.mxu1 %v18563_v38 }
0x10c1   :  { %17231 = vmatprep.subr.bf16.mxu1 %v18075_v29  ;;  %17272 = vmatpush3.bf16.msra.mxu0 %v18410_v39 }
0x10c2   :  { %17273 = vmatprep.subr.bf16.mxu0 %v18075_v29 }
0x10c3   :  { %15928 = vmatmul.mubr.f32.vlgmr.msra.gmra.mrb[62].mxu1 %v19093_v33 }
0x10c4   :  { %17233 = vmatpush3.bf16.msra.mxu1 %v18289_v13  ;;  %15949 = vmatprep.mubr.msk.f32.mxu1 %vm18077_vm2, %v18078_v27 }
0x10c5   :  { %17234 = vmatprep.subr.bf16.mxu1 %v18075_v29 }
0x10c8   :  { %17236 = vmatpush3.bf16.msra.mxu1 %v18296_v20 }
0x10c9   :  { %17237 = vmatprep.subr.bf16.mxu1 %v18075_v29 }
0x10cb   :  { %15950 = vmatmul.mubr.f32.vlgmr.msra.gmra.mrb[64].mxu1 %v7864_v47 }
0x10cc   :  { %17239 = vmatpush3.bf16.msra.mxu1 %v18310_v31  ;;  %15960 = vmatprep.mubr.msk.f32.mxu1 %vm18077_vm2, %v18078_v27 }
0x10cd   :  { %17240 = vmatprep.subr.bf16.mxu1 %v18075_v29 }
0x10d0   :  { %17242 = vmatpush3.bf16.msra.mxu1 %v18315_v34 }
0x10d1   :  { %17243 = vmatprep.subr.bf16.mxu1 %v18075_v29 }
0x10d3   :  { %15961 = vmatmul.mubr.f32.vlgmr.msra.gmra.mrb[64].mxu1 %v19093_v33 }
0x10d4   :  { %17245 = vmatpush3.bf16.msra.mxu1 %v18325_v35  ;;  %15971 = vmatprep.mubr.msk.f32.mxu1 %vm18077_vm2, %v18078_v27 }
0x10d5   :  { %17246 = vmatprep.subr.bf16.mxu1 %v18075_v29 }
0x10d8   :  { %17248 = vmatpush3.bf16.msra.mxu1 %v18334_v30 }
0x10d9   :  { %17249 = vmatprep.subr.bf16.mxu1 %v18075_v29 }
0x10db   :  { %15972 = vmatmul.mubr.f32.vlgmr.msra.gmra.mrb[64].mxu1 %v7861_v45 }
0x10dc   :  { %17251 = vmatpush3.bf16.msra.mxu1 %v18289_v13  ;;  %15982 = vmatprep.mubr.msk.f32.mxu1 %vm18077_vm2, %v18078_v27 }
0x10dd   :  { %17252 = vmatprep.subr.bf16.mxu1 %v18075_v29 }
0x10e0   :  { %17254 = vmatpush3.bf16.msra.mxu1 %v18296_v20 }
0x10e1   :  { %17255 = vmatprep.subr.bf16.mxu1 %v18075_v29 }
0x10e3   :  { %15983 = vmatmul.mubr.f32.vlgmr.msra.gmra.mrb[64].mxu1 %v7862_v0 }
0x10e4   :  { %17257 = vmatpush3.bf16.msra.mxu1 %v18342_v36  ;;  %15993 = vmatprep.mubr.msk.f32.mxu1 %vm18077_vm2, %v18078_v27 }
0x10e5   :  { %17258 = vmatprep.subr.bf16.mxu1 %v18075_v29 }
0x10e8   :  { %17260 = vmatpush3.bf16.msra.mxu1 %v18349_v24 }
0x10e9   :  { %17261 = vmatprep.subr.bf16.mxu1 %v18075_v29 }
0x10eb   :  { %15994 = vmatmul.mubr.f32.vlgmr.msra.gmra.mrb[64].mxu1 %v19093_v33 }
0x10ec   :  { %17263 = vmatpush3.bf16.msra.mxu1 %v18289_v13  ;;  %16004 = vmatprep.mubr.msk.f32.mxu1 %vm18077_vm2, %v18078_v27 }
0x10ed   :  { %17264 = vmatprep.subr.bf16.mxu1 %v18075_v29 }
0x10f0   :  { %17266 = vmatpush3.bf16.msra.mxu1 %v18296_v20 }
0x10f1   :  { %17303 = vmatprep.subr.bf16.mxu1 %v18075_v29 }
0x10f3   :  { %16005 = vmatmul.mubr.f32.vlgmr.msra.gmra.mrb[64].mxu1 %v19093_v33 }
0x10f4   :  { %17305 = vmatpush3.bf16.msra.mxu1 %v18481_v21  ;;  %16081 = vmatprep.mubr.msk.f32.mxu1 %vm18077_vm2, %v18078_v27 }
0x10f5   :  { %17306 = vmatprep.subr.bf16.mxu1 %v18075_v29 }
0x10f8   :  { %17308 = vmatpush3.bf16.msra.mxu1 %v18495_v32 }
0x10f9   :  { %17315 = vmatprep.subr.bf16.mxu1 %v18075_v29 }
0x1166   :  { %v7467_v48 = vpop.f32.mrb[78].mxu0 }
0x1167   :  { %v15830_v51 = vpop.f32.mrb[79].mxu0 }
0x116e   :  { %v7624_v52 = vpop.f32.mrb[80].mxu0  ;;  %v7376_v10 = vpop.f32.mrb[52].mxu1 }
0x116f   :  { %v7468_v54 = vadd.f32 %v7467_v48, %v7376_v10  ;;  %v15852_v55 = vpop.f32.mrb[81].mxu0  ;;  %v15819_v56 = vpop.f32.mrb[53].mxu1 }
0x1176   :  { %v7547_v60 = vpop.f32.mrb[54].mxu1  ;;  %v7782_v62 = vpop.f32.mrb[82].mxu0 }
0x1177   :  { %v7548_v4 = vadd.f32 %v7547_v60, %v7468_v54  ;;  %v15841_v49 = vpop.f32.mrb[55].mxu1  ;;  %v15874_v19 = vpop.f32.mrb[83].mxu0 }
0x1179   :  { %v7625_v6 = vadd.f32 %v7624_v52, %v7548_v4 }
0x117e   :  { %v7707_v7 = vpop.f32.mrb[56].mxu1  ;;  %v7957_v53 = vpop.f32.mrb[84].mxu0 }
0x117f   :  { %v7708_v17 = vadd.f32 %v7707_v7, %v7625_v6  ;;  %v15863_v3 = vpop.f32.mrb[57].mxu1  ;;  %v15896_v25 = vpop.f32.mrb[85].mxu0 }
0x1181   :  { %v7783_v44 = vadd.f32 %v7782_v62, %v7708_v17 }
0x1186   :  { %v8114_v5 = vpop.f32.mrb[86].mxu0  ;;  %v7866_v9 = vpop.f32.mrb[58].mxu1 }
0x1187   :  { %v7867_v14 = vadd.f32 %v7866_v9, %v7783_v44  ;;  %v15918_v11 = vpop.f32.mrb[87].mxu0  ;;  %v15885_v12 = vpop.f32.mrb[59].mxu1 }
0x1189   :  { %v7958_v18 = vadd.f32 %v7957_v53, %v7867_v14 }
0x118e   :  { %v8037_v57 = vpop.f32.mrb[60].mxu1  ;;  %v8272_v40 = vpop.f32.mrb[88].mxu0 }
0x118f   :  { %v8038_v42 = vadd.f32 %v8037_v57, %v7958_v18  ;;  %v15907_v43 = vpop.f32.mrb[61].mxu1  ;;  %v15940_v33 = vpop.f32.mrb[89].mxu0  ;;  %v8803_v18 = vrot.slane %v19056_v16, 6 }
0x1191   :  { %v8115_v45 = vadd.f32 %v8114_v5, %v8038_v42 }
0x1196   :  { %v8197_v0 = vpop.f32.mrb[62].mxu1 }
0x1197   :  { %v8198_v46 = vadd.f32 %v8197_v0, %v8115_v45  ;;  %v15929_v47 = vpop.f32.mrb[63].mxu1 }
0x1199   :  { %v8273_v48 = vadd.f32 %v8272_v40, %v8198_v46 }
0x119b   :  { %v8276_v51 = vadd.f32 %v19042_v63, %v8273_v48 }
0x119d   :  { %17838 = vtanh.f32 %v8276_v51  ;;  %v14082_v62 = vmul.f32 -1.442695, %v8276_v51 }
0x11a7   :  { %v17839_v52 = vpop.eup %17838 }
0x11a8   :  { %8286 = vrot.lane.b32.xlu0 %v17839_v52, %s18076_s22 }
0x11c6   :  { %v8787_v10 = vpop.f32.mrb[64].mxu1 }
0x11c7   :  { %v8792_v54 = vrot.slane %v8787_v10, 6  ;;  %v16006_v55 = vpop.f32.mrb[65].mxu1 }
0x11c9   :  { %v8794_v56 = vadd.f32 %v18375_v50, %v8792_v54 }
0x11cb   :  { %17840 = vtanh.f32 %v8794_v56  ;;  %v14083_v53 = vmul.f32 -1.442695, %v8794_v56 }
0x11cc   :  { %17842 = vpow2.f32 %v14082_v62 }
0x11d5   :  { %v17841_v60 = vpop.eup %17840 }
0x11d6   :  { %8807 = vrot.lane.b32.xlu1 %v17841_v60, %s18076_s22  ;;  %v17843_v4 = vpop.eup %17842 }
0x11d7   :  { %v8280_v49 = vadd.f32 1.0, %v17843_v4 }
0x11d9   :  { %17844 = vrcp.f32 %v8280_v49 }
0x11da   :  { %17846 = vpow2.f32 %v14083_v53 }
0x11e3   :  { %v17845_v19 = vpop.eup %17844 }
0x11e4   :  { %v17847_v17 = vpop.eup %17846  ;;  %v8284_v9 = vmul.f32 %v17845_v19, %v19051_v1 }
0x11e5   :  { %v8798_v3 = vadd.f32 1.0, %v17847_v17 }
0x11e7   :  { %17848 = vrcp.f32 %v8798_v3 }
0x11f1   :  { %v17849_v25 = vpop.eup %17848 }
0x11f2   :  { %v8805_v57 = vmul.f32 %v17849_v25, %v8803_v18 }
0x121a   :  { %v8287_v6 = vpop.permute.xlu0 %8286 }
0x121b   :  { %v8289_v7 = vmul.f32 %v17845_v19, %v8287_v6 }
0x121d   :  { %8291 = vrot.lane.b32.xlu0 %v8289_v7, %s18076_s22 }
0x1248   :  { %v8808_v44 = vpop.permute.xlu1 %8807 }
0x1249   :  { %v8810_v5 = vmul.f32 %v17849_v25, %v8808_v44 }
0x124b   :  { %8812 = vrot.lane.b32.xlu1 %v8810_v5, %s18076_s22 }
0x128f   :  { %v8292_v14 = vpop.permute.xlu0 %8291 }
0x1290   :  { %v19189_v11 = vadd.f32 %v8292_v14, %v8284_v9 }
0x1292   :  { %17850 = vtanh.f32 %v19189_v11 }
0x129c   :  { %v17851_v12 = vpop.eup %17850 }
0x129d   :  { %8297 = vrot.lane.b32.xlu0 %v17851_v12, %s18076_s22 }
0x12bd   :  { %v8813_v40 = vpop.permute.xlu1 %8812 }
0x12be   :  { %v19194_v42 = vadd.f32 %v8813_v40, %v8805_v57 }
0x12c0   :  { %17852 = vtanh.f32 %v19194_v42 }
0x12ca   :  { %v17853_v43 = vpop.eup %17852 }
0x12cb   :  { %8818 = vrot.lane.b32.xlu1 %v17853_v43, %s18076_s22 }
0x130f   :  { %v8298_v1 = vpop.permute.xlu0 %8297 }
0x1310   :  { %v8300_v33 = vmul.f32 %v17845_v19, %v8298_v1 }
0x1312   :  { %8302 = vrot.lane.b32.xlu0 %v8300_v33, %s18079_s4 }
0x133d   :  { %v8819_v45 = vpop.permute.xlu1 %8818 }
0x133e   :  { %v8821_v0 = vmul.f32 %v17849_v25, %v8819_v45 }
0x1340   :  { %v9310_v46 = vrot.slane %v8821_v0, 2 }
0x1342   :  { %9311 = vrot.lane.b32.xlu1 %v9310_v46, %s18079_s4 }
0x1384   :  { %v8303_v47 = vpop.permute.xlu0 %8302 }
0x1385   :  { %8305 = vst.msk [vmem:[#allocation2 + $0x8] sm:$0x3] %vm2212_vm3, %v8303_v47  ;;  %v8822_v16 = vsel %vm679_vm1, %v8303_v47, 0 }
0x1386   :  { %v8893_v48 = vand.u32 4294901760, %v8822_v16 }
0x1388   :  { %v8894_v51 = vsub.f32 %v8822_v16, %v8893_v48 }
0x138a   :  { %v8895_v52 = vand.u32 4294901760, %v8894_v51 }
0x138c   :  { %v8896_v10 = vsub.f32 %v8894_v51, %v8895_v52 }
0x138e   :  { %v8897_v54 = vand.u32 4294901760, %v8896_v10 }
0x1390   :  { %16016 = vmatmul.mubr.f32.vlgmr.msra.gmra.mrb[90].mxu0 %v8897_v54 }
0x1391   :  { %17275 = vmatpush3.bf16.msra.mxu0 %v18423_v58  ;;  %16026 = vmatprep.mubr.msk.f32.mxu0 %vm18077_vm2, %v18078_v27 }
0x1392   :  { %17276 = vmatprep.subr.bf16.mxu0 %v18075_v29 }
0x1395   :  { %17278 = vmatpush3.bf16.msra.mxu0 %v18428_v61 }
0x1396   :  { %17279 = vmatprep.subr.bf16.mxu0 %v18075_v29 }
0x1398   :  { %16027 = vmatmul.mubr.f32.vlgmr.msra.gmra.mrb[92].mxu0 %v8893_v48 }
0x1399   :  { %17281 = vmatpush3.bf16.msra.mxu0 %v18425_v59  ;;  %16037 = vmatprep.mubr.msk.f32.mxu0 %vm18077_vm2, %v18078_v27 }
0x139a   :  { %17282 = vmatprep.subr.bf16.mxu0 %v18075_v29 }
0x139d   :  { %17284 = vmatpush3.bf16.msra.mxu0 %v18438_v2 }
0x139e   :  { %17285 = vmatprep.subr.bf16.mxu0 %v18075_v29 }
0x13a0   :  { %16038 = vmatmul.mubr.f32.vlgmr.msra.gmra.mrb[94].mxu0 %v8894_v51 }
0x13a1   :  { %17287 = vmatpush3.bf16.msra.mxu0 %v18405_v23  ;;  %16048 = vmatprep.mubr.msk.f32.mxu0 %vm18077_vm2, %v18078_v27 }
0x13a2   :  { %17288 = vmatprep.subr.bf16.mxu0 %v18075_v29 }
0x13a5   :  { %17290 = vmatpush3.bf16.msra.mxu0 %v18410_v39 }
0x13a6   :  { %17291 = vmatprep.subr.bf16.mxu0 %v18075_v29 }
0x13a8   :  { %16049 = vmatmul.mubr.f32.vlgmr.msra.gmra.mrb[96].mxu0 %v8895_v52 }
0x13a9   :  { %17293 = vmatpush3.bf16.msra.mxu0 %v18450_v8  ;;  %16059 = vmatprep.mubr.msk.f32.mxu0 %vm18077_vm2, %v18078_v27 }
0x13aa   :  { %17294 = vmatprep.subr.bf16.mxu0 %v18075_v29 }
0x13ad   :  { %17296 = vmatpush3.bf16.msra.mxu0 %v18465_v15 }
0x13ae   :  { %17297 = vmatprep.subr.bf16.mxu0 %v18075_v29 }
0x13b0   :  { %16060 = vmatmul.mubr.f32.vlgmr.msra.gmra.mrb[98].mxu0 %v8893_v48 }
0x13b1   :  { %17299 = vmatpush3.bf16.msra.mxu0 %v18405_v23  ;;  %16070 = vmatprep.mubr.msk.f32.mxu0 %vm18077_vm2, %v18078_v27 }
0x13b2   :  { %17300 = vmatprep.subr.bf16.mxu0 %v18075_v29 }
0x13b4   :  { %v9312_v55 = vpop.permute.xlu1 %9311 }
0x13b5   :  { %17302 = vmatpush3.bf16.msra.mxu0 %v18410_v39  ;;  %v9313_v56 = vsel %vm679_vm1, %v9312_v55, 0 }
0x13b6   :  { %v19232_v60 = vand.u32 4294901760, %v9313_v56  ;;  %17309 = vmatprep.subr.bf16.mxu0 %v18075_v29 }
0x13b8   :  { %v9385_v62 = vsub.f32 %v9313_v56, %v19232_v60  ;;  %16071 = vmatmul.mubr.f32.vlgmr.msra.gmra.mrb[100].mxu0 %v8893_v48 }
0x13b9   :  { %17311 = vmatpush3.bf16.msra.mxu0 %v18502_v37  ;;  %16092 = vmatprep.mubr.msk.f32.mxu0 %vm18077_vm2, %v18078_v27 }
0x13ba   :  { %v9386_v4 = vand.u32 4294901760, %v9385_v62  ;;  %17312 = vmatprep.subr.bf16.mxu0 %v18075_v29 }
0x13bc   :  { %v9387_v49 = vsub.f32 %v9385_v62, %v9386_v4 }
0x13bd   :  { %17314 = vmatpush3.bf16.msra.mxu0 %v18509_v41 }
0x13be   :  { %17321 = vmatprep.subr.bf16.mxu0 %v18075_v29  ;;  %v9388_v19 = vand.u32 4294901760, %v9387_v49 }
0x13c0   :  { %16093 = vmatmul.mubr.f32.vlgmr.msra.gmra.mrb[102].mxu0 %v19232_v60  ;;  %16082 = vmatmul.mubr.f32.vlgmr.msra.gmra.mrb[66].mxu1 %v9388_v19 }
0x13c1   :  { %17317 = vmatpush3.bf16.msra.mxu1 %v18532_v22  ;;  %17323 = vmatpush3.bf16.msra.mxu0 %v18481_v21 }
0x13c2   :  { %17318 = vmatprep.subr.bf16.mxu1 %v18075_v29  ;;  %17324 = vmatprep.subr.bf16.mxu0 %v18075_v29 }
0x13c3   :  { %16103 = vmatprep.mubr.msk.f32.mxu1 %vm18077_vm2, %v18078_v27  ;;  %16114 = vmatprep.mubr.msk.f32.mxu0 %vm18077_vm2, %v18078_v27 }
0x13c5   :  { %17320 = vmatpush3.bf16.msra.mxu1 %v18539_v26  ;;  %17326 = vmatpush3.bf16.msra.mxu0 %v18495_v32 }
0x13c6   :  { %17327 = vmatprep.subr.bf16.mxu1 %v18075_v29  ;;  %17333 = vmatprep.subr.bf16.mxu0 %v18075_v29 }
0x13c8   :  { %16104 = vmatmul.mubr.f32.vlgmr.msra.gmra.mrb[68].mxu1 %v9385_v62  ;;  %16115 = vmatmul.mubr.f32.vlgmr.msra.gmra.mrb[104].mxu0 %v9386_v4 }
0x13c9   :  { %17329 = vmatpush3.bf16.msra.mxu1 %v18553_v28  ;;  %17335 = vmatpush3.bf16.msra.mxu0 %v18481_v21 }
0x13ca   :  { %17330 = vmatprep.subr.bf16.mxu1 %v18075_v29  ;;  %17336 = vmatprep.subr.bf16.mxu0 %v18075_v29 }
0x13cb   :  { %16125 = vmatprep.mubr.msk.f32.mxu1 %vm18077_vm2, %v18078_v27  ;;  %16136 = vmatprep.mubr.msk.f32.mxu0 %vm18077_vm2, %v18078_v27 }
0x13cd   :  { %17332 = vmatpush3.bf16.msra.mxu1 %v18563_v38  ;;  %17338 = vmatpush3.bf16.msra.mxu0 %v18495_v32 }
0x13ce   :  { %17339 = vmatprep.subr.bf16.mxu1 %v18075_v29  ;;  %17375 = vmatprep.subr.bf16.mxu0 %v18075_v29 }
0x13d0   :  { %16126 = vmatmul.mubr.f32.vlgmr.msra.gmra.mrb[70].mxu1 %v19232_v60  ;;  %16137 = vmatmul.mubr.f32.vlgmr.msra.gmra.mrb[106].mxu0 %v19232_v60 }
0x13d1   :  { %17341 = vmatpush3.bf16.msra.mxu1 %v18289_v13  ;;  %16147 = vmatprep.mubr.msk.f32.mxu1 %vm18077_vm2, %v18078_v27 }
0x13d2   :  { %17342 = vmatprep.subr.bf16.mxu1 %v18075_v29  ;;  %17377 = vmatpush3.bf16.msra.mxu0 %v18405_v23 }
0x13d3   :  { %17378 = vmatprep.subr.bf16.mxu0 %v18075_v29  ;;  %16213 = vmatprep.mubr.msk.f32.mxu0 %vm18077_vm2, %v18078_v27 }
0x13d5   :  { %17344 = vmatpush3.bf16.msra.mxu1 %v18296_v20 }
0x13d6   :  { %17345 = vmatprep.subr.bf16.mxu1 %v18075_v29  ;;  %17380 = vmatpush3.bf16.msra.mxu0 %v18410_v39 }
0x13d7   :  { %17381 = vmatprep.subr.bf16.mxu0 %v18075_v29 }
0x13d8   :  { %16148 = vmatmul.mubr.f32.vlgmr.msra.gmra.mrb[72].mxu1 %v9388_v19 }
0x13d9   :  { %17347 = vmatpush3.bf16.msra.mxu1 %v18310_v31  ;;  %16158 = vmatprep.mubr.msk.f32.mxu1 %vm18077_vm2, %v18078_v27 }
0x13da   :  { %17348 = vmatprep.subr.bf16.mxu1 %v18075_v29 }
0x13dd   :  { %17350 = vmatpush3.bf16.msra.mxu1 %v18315_v34 }
0x13de   :  { %17351 = vmatprep.subr.bf16.mxu1 %v18075_v29 }
0x13e0   :  { %16159 = vmatmul.mubr.f32.vlgmr.msra.gmra.mrb[72].mxu1 %v19232_v60 }
0x13e1   :  { %17353 = vmatpush3.bf16.msra.mxu1 %v18325_v35  ;;  %16169 = vmatprep.mubr.msk.f32.mxu1 %vm18077_vm2, %v18078_v27 }
0x13e2   :  { %17354 = vmatprep.subr.bf16.mxu1 %v18075_v29 }
0x13e5   :  { %17356 = vmatpush3.bf16.msra.mxu1 %v18334_v30 }
0x13e6   :  { %17357 = vmatprep.subr.bf16.mxu1 %v18075_v29 }
0x13e8   :  { %16170 = vmatmul.mubr.f32.vlgmr.msra.gmra.mrb[72].mxu1 %v9385_v62 }
0x13e9   :  { %17359 = vmatpush3.bf16.msra.mxu1 %v18289_v13  ;;  %16180 = vmatprep.mubr.msk.f32.mxu1 %vm18077_vm2, %v18078_v27 }
0x13ea   :  { %17360 = vmatprep.subr.bf16.mxu1 %v18075_v29 }
0x13ed   :  { %17362 = vmatpush3.bf16.msra.mxu1 %v18296_v20 }
0x13ee   :  { %17363 = vmatprep.subr.bf16.mxu1 %v18075_v29 }
0x13f0   :  { %16181 = vmatmul.mubr.f32.vlgmr.msra.gmra.mrb[72].mxu1 %v9386_v4 }
0x13f1   :  { %17365 = vmatpush3.bf16.msra.mxu1 %v18342_v36  ;;  %16191 = vmatprep.mubr.msk.f32.mxu1 %vm18077_vm2, %v18078_v27 }
0x13f2   :  { %17366 = vmatprep.subr.bf16.mxu1 %v18075_v29 }
0x13f5   :  { %17368 = vmatpush3.bf16.msra.mxu1 %v18349_v24 }
0x13f6   :  { %17369 = vmatprep.subr.bf16.mxu1 %v18075_v29 }
0x13f8   :  { %16192 = vmatmul.mubr.f32.vlgmr.msra.gmra.mrb[72].mxu1 %v19232_v60 }
0x13f9   :  { %17371 = vmatpush3.bf16.msra.mxu1 %v18289_v13  ;;  %16202 = vmatprep.mubr.msk.f32.mxu1 %vm18077_vm2, %v18078_v27 }
0x13fa   :  { %17372 = vmatprep.subr.bf16.mxu1 %v18075_v29 }
0x13fd   :  { %17374 = vmatpush3.bf16.msra.mxu1 %v18296_v20 }
0x13fe   :  { %17411 = vmatprep.subr.bf16.mxu1 %v18075_v29 }
0x1400   :  { %16203 = vmatmul.mubr.f32.vlgmr.msra.gmra.mrb[72].mxu1 %v19232_v60 }
0x1401   :  { %17413 = vmatpush3.bf16.msra.mxu1 %v18481_v21  ;;  %16279 = vmatprep.mubr.msk.f32.mxu1 %vm18077_vm2, %v18078_v27 }
0x1402   :  { %17414 = vmatprep.subr.bf16.mxu1 %v18075_v29 }
0x1405   :  { %17416 = vmatpush3.bf16.msra.mxu1 %v18495_v32 }
0x1406   :  { %17423 = vmatprep.subr.bf16.mxu1 %v18075_v29 }
0x1463   :  { %v8899_v6 = vpop.f32.mrb[90].mxu0 }
0x1464   :  { %v16017_v7 = vpop.f32.mrb[91].mxu0 }
0x146b   :  { %v8990_v53 = vpop.f32.mrb[92].mxu0 }
0x146c   :  { %v8991_v17 = vadd.f32 %v8990_v53, %v8899_v6  ;;  %v16028_v3 = vpop.f32.mrb[93].mxu0 }
0x1473   :  { %v9070_v25 = vpop.f32.mrb[94].mxu0 }
0x1474   :  { %v9071_v44 = vadd.f32 %v9070_v25, %v8991_v17  ;;  %v16039_v5 = vpop.f32.mrb[95].mxu0 }
0x147b   :  { %v9147_v9 = vpop.f32.mrb[96].mxu0 }
0x147c   :  { %v9148_v14 = vadd.f32 %v9147_v9, %v9071_v44  ;;  %v16050_v12 = vpop.f32.mrb[97].mxu0 }
0x1483   :  { %v9230_v18 = vpop.f32.mrb[98].mxu0 }
0x1484   :  { %v9231_v57 = vadd.f32 %v9230_v18, %v9148_v14  ;;  %v16061_v40 = vpop.f32.mrb[99].mxu0 }
0x148b   :  { %v9305_v43 = vpop.f32.mrb[100].mxu0 }
0x148c   :  { %v9306_v1 = vadd.f32 %v9305_v43, %v9231_v57  ;;  %v16072_v33 = vpop.f32.mrb[101].mxu0 }
0x1493   :  { %v9481_v45 = vpop.f32.mrb[102].mxu0  ;;  %v9390_v0 = vpop.f32.mrb[66].mxu1 }
0x1494   :  { %v9391_v46 = vadd.f32 %v9390_v0, %v9306_v1  ;;  %v16094_v47 = vpop.f32.mrb[103].mxu0  ;;  %v16083_v16 = vpop.f32.mrb[67].mxu1 }
0x1496   :  { %v9482_v48 = vadd.f32 %v9481_v45, %v9391_v46 }
0x149b   :  { %v9561_v51 = vpop.f32.mrb[68].mxu1  ;;  %v9638_v52 = vpop.f32.mrb[104].mxu0 }
0x149c   :  { %v9562_v10 = vadd.f32 %v9561_v51, %v9482_v48  ;;  %v16105_v54 = vpop.f32.mrb[69].mxu1  ;;  %v16116_v55 = vpop.f32.mrb[105].mxu0  ;;  %v10327_v51 = vrot.slane %v19194_v42, 6 }
0x149e   :  { %v9639_v56 = vadd.f32 %v9638_v52, %v9562_v10 }
0x14a3   :  { %v9721_v60 = vpop.f32.mrb[70].mxu1  ;;  %v9796_v62 = vpop.f32.mrb[106].mxu0 }
0x14a4   :  { %v9722_v4 = vadd.f32 %v9721_v60, %v9639_v56  ;;  %v16127_v49 = vpop.f32.mrb[71].mxu1  ;;  %v16138_v19 = vpop.f32.mrb[107].mxu0 }
0x14a6   :  { %v9797_v6 = vadd.f32 %v9796_v62, %v9722_v4 }
0x14a8   :  { %v9800_v7 = vadd.f32 %v19042_v63, %v9797_v6 }
0x14aa   :  { %17854 = vtanh.f32 %v9800_v7  ;;  %v14084_v9 = vmul.f32 -1.442695, %v9800_v7 }
0x14b4   :  { %v17855_v53 = vpop.eup %17854 }
0x14b5   :  { %9810 = vrot.lane.b32.xlu0 %v17855_v53, %s18076_s22 }
0x14d3   :  { %v10311_v17 = vpop.f32.mrb[72].mxu1 }
0x14d4   :  { %v10316_v3 = vrot.slane %v10311_v17, 4  ;;  %v16204_v25 = vpop.f32.mrb[73].mxu1 }
0x14d6   :  { %v10318_v44 = vadd.f32 %v18375_v50, %v10316_v3 }
0x14d8   :  { %17856 = vtanh.f32 %v10318_v44  ;;  %v14085_v40 = vmul.f32 -1.442695, %v10318_v44 }
0x14d9   :  { %17858 = vpow2.f32 %v14084_v9 }
0x14e2   :  { %v17857_v5 = vpop.eup %17856 }
0x14e3   :  { %10331 = vrot.lane.b32.xlu1 %v17857_v5, %s18076_s22  ;;  %v17859_v14 = vpop.eup %17858 }
0x14e4   :  { %v9804_v12 = vadd.f32 1.0, %v17859_v14 }
0x14e6   :  { %17860 = vrcp.f32 %v9804_v12 }
0x14e7   :  { %17862 = vpow2.f32 %v14085_v40 }
0x14f0   :  { %v17861_v18 = vpop.eup %17860 }
0x14f1   :  { %v17863_v43 = vpop.eup %17862  ;;  %v9808_v46 = vmul.f32 %v17861_v18, %v19189_v11 }
0x14f2   :  { %v10322_v1 = vadd.f32 1.0, %v17863_v43 }
0x14f4   :  { %17864 = vrcp.f32 %v10322_v1 }
0x14fe   :  { %v17865_v33 = vpop.eup %17864 }
0x14ff   :  { %v10329_v52 = vmul.f32 %v17865_v33, %v10327_v51 }
0x1527   :  { %v9811_v63 = vpop.permute.xlu0 %9810 }
0x1528   :  { %v9813_v57 = vmul.f32 %v17861_v18, %v9811_v63 }
0x152a   :  { %9815 = vrot.lane.b32.xlu0 %v9813_v57, %s18076_s22 }
0x1555   :  { %v10332_v45 = vpop.permute.xlu1 %10331 }
0x1556   :  { %v10334_v0 = vmul.f32 %v17865_v33, %v10332_v45 }
0x1558   :  { %10336 = vrot.lane.b32.xlu1 %v10334_v0, %s18076_s22 }
0x159c   :  { %v9816_v47 = vpop.permute.xlu0 %9815 }
0x159d   :  { %v19327_v16 = vadd.f32 %v9816_v47, %v9808_v46 }
0x159f   :  { %17866 = vtanh.f32 %v19327_v16 }
0x15a9   :  { %v17867_v48 = vpop.eup %17866 }
0x15aa   :  { %9821 = vrot.lane.b32.xlu0 %v17867_v48, %s18076_s22 }
0x15ca   :  { %v10337_v10 = vpop.permute.xlu1 %10336 }
0x15cb   :  { %v19332_v54 = vadd.f32 %v10337_v10, %v10329_v52 }
0x15cd   :  { %17868 = vtanh.f32 %v19332_v54 }
0x15d7   :  { %v17869_v55 = vpop.eup %17868 }
0x15d8   :  { %10342 = vrot.lane.b32.xlu1 %v17869_v55, %s18076_s22 }
0x161c   :  { %v9822_v11 = vpop.permute.xlu0 %9821 }
0x161d   :  { %v9824_v56 = vmul.f32 %v17861_v18, %v9822_v11 }
0x161f   :  { %9826 = vrot.lane.b32.xlu0 %v9824_v56, %s18079_s4 }
0x164a   :  { %v10343_v60 = vpop.permute.xlu1 %10342 }
0x164b   :  { %v10345_v62 = vmul.f32 %v17865_v33, %v10343_v60 }
0x164d   :  { %v10834_v4 = vrot.slane %v10345_v62, 4 }
0x164f   :  { %10835 = vrot.lane.b32.xlu1 %v10834_v4, %s18079_s4 }
0x1691   :  { %v9827_v49 = vpop.permute.xlu0 %9826 }
0x1692   :  { %9829 = vst.msk [vmem:[#allocation2 + $0xa] sm:$0x3] %vm2212_vm3, %v9827_v49  ;;  %v10346_v42 = vsel %vm679_vm1, %v9827_v49, 0 }
0x1693   :  { %v10417_v19 = vand.u32 4294901760, %v10346_v42 }
0x1695   :  { %v10418_v6 = vsub.f32 %v10346_v42, %v10417_v19 }
0x1697   :  { %v10419_v7 = vand.u32 4294901760, %v10418_v6 }
0x1699   :  { %v10420_v53 = vsub.f32 %v10418_v6, %v10419_v7 }
0x169b   :  { %v10421_v17 = vand.u32 4294901760, %v10420_v53 }
0x169d   :  { %16214 = vmatmul.mubr.f32.vlgmr.msra.gmra.mrb[108].mxu0 %v10421_v17  ;;  %v19458_v17 = vld [vmem:[#allocation6 + $0x1] ss:$0 sm:$0xff] }
0x169e   :  { %17383 = vmatpush3.bf16.msra.mxu0 %v18423_v58  ;;  %16224 = vmatprep.mubr.msk.f32.mxu0 %vm18077_vm2, %v18078_v27 }
0x169f   :  { %17384 = vmatprep.subr.bf16.mxu0 %v18075_v29 }
0x16a2   :  { %17386 = vmatpush3.bf16.msra.mxu0 %v18428_v61 }
0x16a3   :  { %17387 = vmatprep.subr.bf16.mxu0 %v18075_v29 }
0x16a5   :  { %16225 = vmatmul.mubr.f32.vlgmr.msra.gmra.mrb[110].mxu0 %v10417_v19 }
0x16a6   :  { %17389 = vmatpush3.bf16.msra.mxu0 %v18425_v59  ;;  %16235 = vmatprep.mubr.msk.f32.mxu0 %vm18077_vm2, %v18078_v27 }
0x16a7   :  { %17390 = vmatprep.subr.bf16.mxu0 %v18075_v29 }
0x16aa   :  { %17392 = vmatpush3.bf16.msra.mxu0 %v18438_v2 }
0x16ab   :  { %17393 = vmatprep.subr.bf16.mxu0 %v18075_v29 }
0x16ad   :  { %16236 = vmatmul.mubr.f32.vlgmr.msra.gmra.mrb[112].mxu0 %v10418_v6 }
0x16ae   :  { %17395 = vmatpush3.bf16.msra.mxu0 %v18405_v23  ;;  %16246 = vmatprep.mubr.msk.f32.mxu0 %vm18077_vm2, %v18078_v27 }
0x16af   :  { %17396 = vmatprep.subr.bf16.mxu0 %v18075_v29 }
0x16b2   :  { %17398 = vmatpush3.bf16.msra.mxu0 %v18410_v39 }
0x16b3   :  { %17399 = vmatprep.subr.bf16.mxu0 %v18075_v29 }
0x16b5   :  { %16247 = vmatmul.mubr.f32.vlgmr.msra.gmra.mrb[114].mxu0 %v10419_v7 }
0x16b6   :  { %17401 = vmatpush3.bf16.msra.mxu0 %v18450_v8  ;;  %16257 = vmatprep.mubr.msk.f32.mxu0 %vm18077_vm2, %v18078_v27 }
0x16b7   :  { %17402 = vmatprep.subr.bf16.mxu0 %v18075_v29 }
0x16ba   :  { %17404 = vmatpush3.bf16.msra.mxu0 %v18465_v15 }
0x16bb   :  { %17405 = vmatprep.subr.bf16.mxu0 %v18075_v29 }
0x16bd   :  { %16258 = vmatmul.mubr.f32.vlgmr.msra.gmra.mrb[116].mxu0 %v10417_v19 }
0x16be   :  { %17407 = vmatpush3.bf16.msra.mxu0 %v18405_v23  ;;  %16268 = vmatprep.mubr.msk.f32.mxu0 %vm18077_vm2, %v18078_v27 }
0x16bf   :  { %17408 = vmatprep.subr.bf16.mxu0 %v18075_v29 }
0x16c1   :  { %v10836_v3 = vpop.permute.xlu1 %10835 }
0x16c2   :  { %17410 = vmatpush3.bf16.msra.mxu0 %v18410_v39  ;;  %v10837_v25 = vsel %vm679_vm1, %v10836_v3, 0 }
0x16c3   :  { %v19370_v44 = vand.u32 4294901760, %v10837_v25  ;;  %17417 = vmatprep.subr.bf16.mxu0 %v18075_v29 }
0x16c5   :  { %v10909_v5 = vsub.f32 %v10837_v25, %v19370_v44  ;;  %16269 = vmatmul.mubr.f32.vlgmr.msra.gmra.mrb[118].mxu0 %v10417_v19 }
0x16c6   :  { %17419 = vmatpush3.bf16.msra.mxu0 %v18502_v37  ;;  %16290 = vmatprep.mubr.msk.f32.mxu0 %vm18077_vm2, %v18078_v27 }
0x16c7   :  { %v10910_v9 = vand.u32 4294901760, %v10909_v5  ;;  %17420 = vmatprep.subr.bf16.mxu0 %v18075_v29 }
0x16c9   :  { %v10911_v14 = vsub.f32 %v10909_v5, %v10910_v9 }
0x16ca   :  { %17422 = vmatpush3.bf16.msra.mxu0 %v18509_v41 }
0x16cb   :  { %17429 = vmatprep.subr.bf16.mxu0 %v18075_v29  ;;  %v10912_v12 = vand.u32 4294901760, %v10911_v14 }
0x16cd   :  { %16291 = vmatmul.mubr.f32.vlgmr.msra.gmra.mrb[120].mxu0 %v19370_v44  ;;  %16280 = vmatmul.mubr.f32.vlgmr.msra.gmra.mrb[74].mxu1 %v10912_v12 }
0x16ce   :  { %17425 = vmatpush3.bf16.msra.mxu1 %v18532_v22  ;;  %17431 = vmatpush3.bf16.msra.mxu0 %v18481_v21 }
0x16cf   :  { %17426 = vmatprep.subr.bf16.mxu1 %v18075_v29  ;;  %17432 = vmatprep.subr.bf16.mxu0 %v18075_v29 }
0x16d0   :  { %16301 = vmatprep.mubr.msk.f32.mxu1 %vm18077_vm2, %v18078_v27  ;;  %16312 = vmatprep.mubr.msk.f32.mxu0 %vm18077_vm2, %v18078_v27 }
0x16d2   :  { %17428 = vmatpush3.bf16.msra.mxu1 %v18539_v26  ;;  %17434 = vmatpush3.bf16.msra.mxu0 %v18495_v32 }
0x16d3   :  { %17435 = vmatprep.subr.bf16.mxu1 %v18075_v29  ;;  %17441 = vmatprep.subr.bf16.mxu0 %v18075_v29 }
0x16d5   :  { %16302 = vmatmul.mubr.f32.vlgmr.msra.gmra.mrb[76].mxu1 %v10909_v5  ;;  %16313 = vmatmul.mubr.f32.vlgmr.msra.gmra.mrb[122].mxu0 %v10910_v9 }
0x16d6   :  { %17437 = vmatpush3.bf16.msra.mxu1 %v18553_v28  ;;  %17443 = vmatpush3.bf16.msra.mxu0 %v18481_v21 }
0x16d7   :  { %17438 = vmatprep.subr.bf16.mxu1 %v18075_v29  ;;  %17444 = vmatprep.subr.bf16.mxu0 %v18075_v29 }
0x16d8   :  { %16323 = vmatprep.mubr.msk.f32.mxu1 %vm18077_vm2, %v18078_v27  ;;  %16334 = vmatprep.mubr.msk.f32.mxu0 %vm18077_vm2, %v18078_v27 }
0x16da   :  { %17440 = vmatpush3.bf16.msra.mxu1 %v18563_v38  ;;  %17446 = vmatpush3.bf16.msra.mxu0 %v18495_v32 }
0x16db   :  { %17447 = vmatprep.subr.bf16.mxu1 %v18075_v29  ;;  %17483 = vmatprep.subr.bf16.mxu0 %v18075_v29 }
0x16dd   :  { %16324 = vmatmul.mubr.f32.vlgmr.msra.gmra.mrb[78].mxu1 %v19370_v44  ;;  %16335 = vmatmul.mubr.f32.vlgmr.msra.gmra.mrb[124].mxu0 %v19370_v44 }
0x16de   :  { %17449 = vmatpush3.bf16.msra.mxu1 %v18289_v13  ;;  %16345 = vmatprep.mubr.msk.f32.mxu1 %vm18077_vm2, %v18078_v27 }
0x16df   :  { %17450 = vmatprep.subr.bf16.mxu1 %v18075_v29  ;;  %17485 = vmatpush3.bf16.msra.mxu0 %v18405_v23 }
0x16e0   :  { %17486 = vmatprep.subr.bf16.mxu0 %v18075_v29  ;;  %16411 = vmatprep.mubr.msk.f32.mxu0 %vm18077_vm2, %v18078_v27 }
0x16e2   :  { %17452 = vmatpush3.bf16.msra.mxu1 %v18296_v20 }
0x16e3   :  { %17453 = vmatprep.subr.bf16.mxu1 %v18075_v29  ;;  %17488 = vmatpush3.bf16.msra.mxu0 %v18410_v39 }
0x16e4   :  { %17489 = vmatprep.subr.bf16.mxu0 %v18075_v29 }
0x16e5   :  { %16346 = vmatmul.mubr.f32.vlgmr.msra.gmra.mrb[80].mxu1 %v10912_v12 }
0x16e6   :  { %17455 = vmatpush3.bf16.msra.mxu1 %v18310_v31  ;;  %16356 = vmatprep.mubr.msk.f32.mxu1 %vm18077_vm2, %v18078_v27 }
0x16e7   :  { %17456 = vmatprep.subr.bf16.mxu1 %v18075_v29 }
0x16ea   :  { %17458 = vmatpush3.bf16.msra.mxu1 %v18315_v34 }
0x16eb   :  { %17459 = vmatprep.subr.bf16.mxu1 %v18075_v29 }
0x16ed   :  { %16357 = vmatmul.mubr.f32.vlgmr.msra.gmra.mrb[80].mxu1 %v19370_v44 }
0x16ee   :  { %17461 = vmatpush3.bf16.msra.mxu1 %v18325_v35  ;;  %16367 = vmatprep.mubr.msk.f32.mxu1 %vm18077_vm2, %v18078_v27 }
0x16ef   :  { %17462 = vmatprep.subr.bf16.mxu1 %v18075_v29 }
0x16f2   :  { %17464 = vmatpush3.bf16.msra.mxu1 %v18334_v30 }
0x16f3   :  { %17465 = vmatprep.subr.bf16.mxu1 %v18075_v29 }
0x16f5   :  { %16368 = vmatmul.mubr.f32.vlgmr.msra.gmra.mrb[80].mxu1 %v10909_v5 }
0x16f6   :  { %17467 = vmatpush3.bf16.msra.mxu1 %v18289_v13  ;;  %16378 = vmatprep.mubr.msk.f32.mxu1 %vm18077_vm2, %v18078_v27 }
0x16f7   :  { %17468 = vmatprep.subr.bf16.mxu1 %v18075_v29 }
0x16fa   :  { %17470 = vmatpush3.bf16.msra.mxu1 %v18296_v20 }
0x16fb   :  { %17471 = vmatprep.subr.bf16.mxu1 %v18075_v29 }
0x16fd   :  { %16379 = vmatmul.mubr.f32.vlgmr.msra.gmra.mrb[80].mxu1 %v10910_v9 }
0x16fe   :  { %17473 = vmatpush3.bf16.msra.mxu1 %v18342_v36  ;;  %16389 = vmatprep.mubr.msk.f32.mxu1 %vm18077_vm2, %v18078_v27 }
0x16ff   :  { %17474 = vmatprep.subr.bf16.mxu1 %v18075_v29 }
0x1702   :  { %17476 = vmatpush3.bf16.msra.mxu1 %v18349_v24 }
0x1703   :  { %17477 = vmatprep.subr.bf16.mxu1 %v18075_v29 }
0x1705   :  { %16390 = vmatmul.mubr.f32.vlgmr.msra.gmra.mrb[80].mxu1 %v19370_v44 }
0x1706   :  { %17479 = vmatpush3.bf16.msra.mxu1 %v18289_v13  ;;  %16400 = vmatprep.mubr.msk.f32.mxu1 %vm18077_vm2, %v18078_v27 }
0x1707   :  { %17480 = vmatprep.subr.bf16.mxu1 %v18075_v29 }
0x170a   :  { %17482 = vmatpush3.bf16.msra.mxu1 %v18296_v20 }
0x170b   :  { %17519 = vmatprep.subr.bf16.mxu1 %v18075_v29 }
0x170d   :  { %16401 = vmatmul.mubr.f32.vlgmr.msra.gmra.mrb[80].mxu1 %v19370_v44 }
0x170e   :  { %17521 = vmatpush3.bf16.msra.mxu1 %v18481_v21  ;;  %16477 = vmatprep.mubr.msk.f32.mxu1 %vm18077_vm2, %v18078_v27 }
0x170f   :  { %17522 = vmatprep.subr.bf16.mxu1 %v18075_v29 }
0x1712   :  { %17524 = vmatpush3.bf16.msra.mxu1 %v18495_v32 }
0x1713   :  { %17531 = vmatprep.subr.bf16.mxu1 %v18075_v29 }
0x1770   :  { %v10423_v13 = vpop.f32.mrb[108].mxu0 }
0x1771   :  { %v16215_v31 = vpop.f32.mrb[109].mxu0 }
0x1778   :  { %v10514_v34 = vpop.f32.mrb[110].mxu0 }
0x1779   :  { %v10515_v35 = vadd.f32 %v10514_v34, %v10423_v13  ;;  %v16226_v20 = vpop.f32.mrb[111].mxu0 }
0x1780   :  { %v10594_v30 = vpop.f32.mrb[112].mxu0 }
0x1781   :  { %v10595_v36 = vadd.f32 %v10594_v30, %v10515_v35  ;;  %v16237_v24 = vpop.f32.mrb[113].mxu0 }
0x1788   :  { %v10671_v18 = vpop.f32.mrb[114].mxu0 }
0x1789   :  { %v10672_v63 = vadd.f32 %v10671_v18, %v10595_v36  ;;  %v16248_v57 = vpop.f32.mrb[115].mxu0 }
0x1790   :  { %v10754_v40 = vpop.f32.mrb[116].mxu0 }
0x1791   :  { %v10755_v43 = vadd.f32 %v10754_v40, %v10672_v63  ;;  %v16259_v1 = vpop.f32.mrb[117].mxu0 }
0x1798   :  { %v10829_v33 = vpop.f32.mrb[118].mxu0 }
0x1799   :  { %v10830_v45 = vadd.f32 %v10829_v33, %v10755_v43  ;;  %v16270_v0 = vpop.f32.mrb[119].mxu0 }
0x17a0   :  { %v11005_v46 = vpop.f32.mrb[120].mxu0  ;;  %v10914_v47 = vpop.f32.mrb[74].mxu1 }
0x17a1   :  { %v10915_v48 = vadd.f32 %v10914_v47, %v10830_v45  ;;  %v16292_v51 = vpop.f32.mrb[121].mxu0  ;;  %v16281_v52 = vpop.f32.mrb[75].mxu1  ;;  %v11851_v45 = vrot.slane %v19332_v54, 6 }
0x17a3   :  { %v11006_v10 = vadd.f32 %v11005_v46, %v10915_v48 }
0x17a8   :  { %v11085_v55 = vpop.f32.mrb[76].mxu1  ;;  %v11162_v11 = vpop.f32.mrb[122].mxu0 }
0x17a9   :  { %v11086_v56 = vadd.f32 %v11085_v55, %v11006_v10  ;;  %v16303_v60 = vpop.f32.mrb[77].mxu1  ;;  %v16314_v62 = vpop.f32.mrb[123].mxu0 }
0x17ab   :  { %v11163_v4 = vadd.f32 %v11162_v11, %v11086_v56 }
0x17b0   :  { %v11245_v49 = vpop.f32.mrb[78].mxu1  ;;  %v11320_v42 = vpop.f32.mrb[124].mxu0 }
0x17b1   :  { %v11246_v19 = vadd.f32 %v11245_v49, %v11163_v4  ;;  %v16325_v6 = vpop.f32.mrb[79].mxu1  ;;  %v16336_v7 = vpop.f32.mrb[125].mxu0 }
0x17b3   :  { %v11321_v53 = vadd.f32 %v11320_v42, %v11246_v19 }
0x17b5   :  { %v11324_v3 = vadd.f32 %v19458_v17, %v11321_v53 }
0x17b7   :  { %17870 = vtanh.f32 %v11324_v3  ;;  %v14086_v13 = vmul.f32 -1.442695, %v11324_v3 }
0x17c1   :  { %v17871_v25 = vpop.eup %17870 }
0x17c2   :  { %11334 = vrot.lane.b32.xlu0 %v17871_v25, %s18076_s22 }
0x17e0   :  { %v11835_v44 = vpop.f32.mrb[80].mxu1 }
0x17e1   :  { %v11840_v5 = vrot.slane %v11835_v44, 2  ;;  %v16402_v9 = vpop.f32.mrb[81].mxu1 }
0x17e3   :  { %v11842_v14 = vadd.f32 %v18375_v50, %v11840_v5 }
0x17e5   :  { %17872 = vtanh.f32 %v11842_v14  ;;  %v14087_v36 = vmul.f32 -1.442695, %v11842_v14 }
0x17e6   :  { %17874 = vpow2.f32 %v14086_v13 }
0x17ef   :  { %v17873_v12 = vpop.eup %17872 }
0x17f0   :  { %11855 = vrot.lane.b32.xlu1 %v17873_v12, %s18076_s22  ;;  %v17875_v31 = vpop.eup %17874 }
0x17f1   :  { %v11328_v34 = vadd.f32 1.0, %v17875_v31 }
0x17f3   :  { %17876 = vrcp.f32 %v11328_v34 }
0x17f4   :  { %17878 = vpow2.f32 %v14087_v36 }
0x17fd   :  { %v17877_v35 = vpop.eup %17876 }
0x17fe   :  { %v17879_v24 = vpop.eup %17878  ;;  %v11332_v40 = vmul.f32 %v17877_v35, %v19327_v16 }
0x17ff   :  { %v11846_v18 = vadd.f32 1.0, %v17879_v24 }
0x1801   :  { %17880 = vrcp.f32 %v11846_v18 }
0x180b   :  { %v17881_v50 = vpop.eup %17880 }
0x180c   :  { %v11853_v0 = vmul.f32 %v17881_v50, %v11851_v45 }
0x1834   :  { %v11335_v20 = vpop.permute.xlu0 %11334 }
0x1835   :  { %v11337_v30 = vmul.f32 %v17877_v35, %v11335_v20 }
0x1837   :  { %11339 = vrot.lane.b32.xlu0 %v11337_v30, %s18076_s22 }
0x1862   :  { %v11856_v63 = vpop.permute.xlu1 %11855 }
0x1863   :  { %v11858_v57 = vmul.f32 %v17881_v50, %v11856_v63 }
0x1865   :  { %11860 = vrot.lane.b32.xlu1 %v11858_v57, %s18076_s22 }
0x18a9   :  { %v11340_v43 = vpop.permute.xlu0 %11339 }
0x18aa   :  { %v19467_v1 = vadd.f32 %v11340_v43, %v11332_v40 }
0x18ac   :  { %17882 = vtanh.f32 %v19467_v1 }
0x18b6   :  { %v17883_v33 = vpop.eup %17882 }
0x18b7   :  { %11345 = vrot.lane.b32.xlu0 %v17883_v33, %s18076_s22 }
0x18d7   :  { %v11861_v46 = vpop.permute.xlu1 %11860 }
0x18d8   :  { %v19472_v47 = vadd.f32 %v11861_v46, %v11853_v0 }
0x18da   :  { %17884 = vtanh.f32 %v19472_v47 }
0x18e4   :  { %v17885_v48 = vpop.eup %17884 }
0x18e5   :  { %11866 = vrot.lane.b32.xlu1 %v17885_v48, %s18076_s22 }
0x1929   :  { %v11346_v16 = vpop.permute.xlu0 %11345 }
0x192a   :  { %v11348_v51 = vmul.f32 %v17877_v35, %v11346_v16 }
0x192c   :  { %11350 = vrot.lane.b32.xlu0 %v11348_v51, %s18079_s4 }
0x1957   :  { %v11867_v52 = vpop.permute.xlu1 %11866 }
0x1958   :  { %v19477_v10 = vmul.f32 %v17881_v50, %v11867_v52 }
0x195a   :  { %v12358_v55 = vrot.slane %v19477_v10, 6 }
0x195c   :  { %12359 = vrot.lane.b32.xlu1 %v12358_v55, %s18079_s4 }
0x199e   :  { %v11351_v54 = vpop.permute.xlu0 %11350 }
0x199f   :  { %11353 = vst.msk [vmem:[#allocation2 + $0xc] sm:$0x3] %vm2212_vm3, %v11351_v54  ;;  %v11870_v11 = vsel %vm679_vm1, %v11351_v54, 0  ;;  %v12894_v54 = vld [vmem:[#allocation2] sm:$0xff] }
0x19a0   :  { %v11941_v56 = vand.u32 4294901760, %v11870_v11 }
0x19a2   :  { %v11942_v60 = vsub.f32 %v11870_v11, %v11941_v56  ;;  %v12898_v11 = vsel %vm679_vm1, %v12894_v54, 0.0 }
0x19a4   :  { %v11943_v62 = vand.u32 4294901760, %v11942_v60 }
0x19a6   :  { %v11944_v4 = vsub.f32 %v11942_v60, %v11943_v62 }
0x19a8   :  { %v11945_v49 = vand.u32 4294901760, %v11944_v4 }
0x19aa   :  { %16412 = vmatmul.mubr.f32.vlgmr.msra.gmra.mrb[126].mxu0 %v11945_v49 }
0x19ab   :  { %17491 = vmatpush3.bf16.msra.mxu0 %v18423_v58  ;;  %16422 = vmatprep.mubr.msk.f32.mxu0 %vm18077_vm2, %v18078_v27 }
0x19ac   :  { %17492 = vmatprep.subr.bf16.mxu0 %v18075_v29 }
0x19af   :  { %17494 = vmatpush3.bf16.msra.mxu0 %v18428_v61 }
0x19b0   :  { %17495 = vmatprep.subr.bf16.mxu0 %v18075_v29 }
0x19b2   :  { %16423 = vmatmul.mubr.f32.vlgmr.msra.gmra.mrb[128].mxu0 %v11941_v56 }
0x19b3   :  { %17497 = vmatpush3.bf16.msra.mxu0 %v18425_v59  ;;  %16433 = vmatprep.mubr.msk.f32.mxu0 %vm18077_vm2, %v18078_v27 }
0x19b4   :  { %17498 = vmatprep.subr.bf16.mxu0 %v18075_v29 }
0x19b7   :  { %17500 = vmatpush3.bf16.msra.mxu0 %v18438_v2 }
0x19b8   :  { %17501 = vmatprep.subr.bf16.mxu0 %v18075_v29 }
0x19ba   :  { %16434 = vmatmul.mubr.f32.vlgmr.msra.gmra.mrb[130].mxu0 %v11942_v60 }
0x19bb   :  { %17503 = vmatpush3.bf16.msra.mxu0 %v18405_v23  ;;  %16444 = vmatprep.mubr.msk.f32.mxu0 %vm18077_vm2, %v18078_v27 }
0x19bc   :  { %17504 = vmatprep.subr.bf16.mxu0 %v18075_v29 }
0x19bf   :  { %17506 = vmatpush3.bf16.msra.mxu0 %v18410_v39 }
0x19c0   :  { %17507 = vmatprep.subr.bf16.mxu0 %v18075_v29 }
0x19c2   :  { %16445 = vmatmul.mubr.f32.vlgmr.msra.gmra.mrb[132].mxu0 %v11943_v62 }
0x19c3   :  { %17509 = vmatpush3.bf16.msra.mxu0 %v18450_v8  ;;  %16455 = vmatprep.mubr.msk.f32.mxu0 %vm18077_vm2, %v18078_v27 }
0x19c4   :  { %17510 = vmatprep.subr.bf16.mxu0 %v18075_v29 }
0x19c7   :  { %17512 = vmatpush3.bf16.msra.mxu0 %v18465_v15 }
0x19c8   :  { %17513 = vmatprep.subr.bf16.mxu0 %v18075_v29 }
0x19ca   :  { %16456 = vmatmul.mubr.f32.vlgmr.msra.gmra.mrb[134].mxu0 %v11941_v56 }
0x19cb   :  { %17515 = vmatpush3.bf16.msra.mxu0 %v18405_v23  ;;  %16466 = vmatprep.mubr.msk.f32.mxu0 %vm18077_vm2, %v18078_v27 }
0x19cc   :  { %17516 = vmatprep.subr.bf16.mxu0 %v18075_v29 }
0x19ce   :  { %v12360_v58 = vpop.permute.xlu1 %12359 }
0x19cf   :  { %17518 = vmatpush3.bf16.msra.mxu0 %v18410_v39  ;;  %v12361_v59 = vsel %vm679_vm1, %v12360_v58, 0 }
0x19d0   :  { %v12432_v61 = vand.u32 4294901760, %v12361_v59  ;;  %17525 = vmatprep.subr.bf16.mxu0 %v18075_v29 }
0x19d2   :  { %v12433_v2 = vsub.f32 %v12361_v59, %v12432_v61  ;;  %16467 = vmatmul.mubr.f32.vlgmr.msra.gmra.mrb[136].mxu0 %v11941_v56 }
0x19d3   :  { %17527 = vmatpush3.bf16.msra.mxu0 %v18502_v37  ;;  %16488 = vmatprep.mubr.msk.f32.mxu0 %vm18077_vm2, %v18078_v27 }
0x19d4   :  { %v12434_v23 = vand.u32 4294901760, %v12433_v2  ;;  %17528 = vmatprep.subr.bf16.mxu0 %v18075_v29 }
0x19d6   :  { %v12435_v8 = vsub.f32 %v12433_v2, %v12434_v23 }
0x19d7   :  { %17530 = vmatpush3.bf16.msra.mxu0 %v18509_v41 }
0x19d8   :  { %v12436_v15 = vand.u32 4294901760, %v12435_v8  ;;  %17537 = vmatprep.subr.bf16.mxu0 %v18075_v29 }
0x19da   :  { %16489 = vmatmul.mubr.f32.vlgmr.msra.gmra.mrb[138].mxu0 %v12432_v61  ;;  %16478 = vmatmul.mubr.f32.vlgmr.msra.gmra.mrb[82].mxu1 %v12436_v15 }
0x19db   :  { %17533 = vmatpush3.bf16.msra.mxu1 %v18532_v22  ;;  %17539 = vmatpush3.bf16.msra.mxu0 %v18481_v21 }
0x19dc   :  { %17534 = vmatprep.subr.bf16.mxu1 %v18075_v29  ;;  %17540 = vmatprep.subr.bf16.mxu0 %v18075_v29 }
0x19dd   :  { %16499 = vmatprep.mubr.msk.f32.mxu1 %vm18077_vm2, %v18078_v27  ;;  %16510 = vmatprep.mubr.msk.f32.mxu0 %vm18077_vm2, %v18078_v27 }
0x19df   :  { %17536 = vmatpush3.bf16.msra.mxu1 %v18539_v26  ;;  %17542 = vmatpush3.bf16.msra.mxu0 %v18495_v32 }
0x19e0   :  { %17543 = vmatprep.subr.bf16.mxu1 %v18075_v29  ;;  %17549 = vmatprep.subr.bf16.mxu0 %v18075_v29 }
0x19e2   :  { %16500 = vmatmul.mubr.f32.vlgmr.msra.gmra.mrb[84].mxu1 %v12433_v2  ;;  %16511 = vmatmul.mubr.f32.vlgmr.msra.gmra.mrb[140].mxu0 %v12434_v23 }
0x19e3   :  { %17545 = vmatpush3.bf16.msra.mxu1 %v18553_v28  ;;  %17551 = vmatpush3.bf16.msra.mxu0 %v18481_v21 }
0x19e4   :  { %17546 = vmatprep.subr.bf16.mxu1 %v18075_v29  ;;  %17552 = vmatprep.subr.bf16.mxu0 %v18075_v29 }
0x19e5   :  { %16521 = vmatprep.mubr.msk.f32.mxu1 %vm18077_vm2, %v18078_v27  ;;  %16532 = vmatprep.mubr.msk.f32.mxu0 %vm18077_vm2, %v18078_v27 }
0x19e7   :  { %17548 = vmatpush3.bf16.msra.mxu1 %v18563_v38  ;;  %17554 = vmatpush3.bf16.msra.mxu0 %v18495_v32 }
0x19ea   :  { %16522 = vmatmul.mubr.f32.vlgmr.msra.gmra.mrb[86].mxu1 %v12432_v61  ;;  %16533 = vmatmul.mubr.f32.vlgmr.msra.gmra.mrb[142].mxu0 %v12432_v61 }
0x1a7d   :  { %v11947_v39 = vpop.f32.mrb[126].mxu0 }
0x1a7e   :  { %v16413_v37 = vpop.f32.mrb[127].mxu0 }
0x1a7f   :  { %v19554_v37 = vld [vmem:[#allocation8] ss:$0 sm:$0xff] }
0x1a85   :  { %v12038_v41 = vpop.f32.mrb[128].mxu0 }
0x1a86   :  { %v12039_v21 = vadd.f32 %v12038_v41, %v11947_v39  ;;  %v16424_v22 = vpop.f32.mrb[129].mxu0 }
0x1a8d   :  { %v12118_v26 = vpop.f32.mrb[130].mxu0 }
0x1a8e   :  { %v12119_v28 = vadd.f32 %v12118_v26, %v12039_v21  ;;  %v16435_v29 = vpop.f32.mrb[131].mxu0  ;;  %v19556_v21 = vld [vmem:[#allocation8 + $0x1] ss:$0 sm:$0xff] }
0x1a95   :  { %v12195_v42 = vpop.f32.mrb[132].mxu0 }
0x1a96   :  { %v12196_v19 = vadd.f32 %v12195_v42, %v12119_v28  ;;  %v16446_v6 = vpop.f32.mrb[133].mxu0 }
0x1a9d   :  { %v12278_v7 = vpop.f32.mrb[134].mxu0 }
0x1a9e   :  { %v12279_v53 = vadd.f32 %v12278_v7, %v12196_v19  ;;  %v16457_v27 = vpop.f32.mrb[135].mxu0 }
0x1aa5   :  { %v12353_v3 = vpop.f32.mrb[136].mxu0 }
0x1aa6   :  { %v12354_v38 = vadd.f32 %v12353_v3, %v12279_v53  ;;  %v16468_v25 = vpop.f32.mrb[137].mxu0 }
0x1aad   :  { %v12529_v32 = vpop.f32.mrb[138].mxu0  ;;  %v12438_v44 = vpop.f32.mrb[82].mxu1 }
0x1aae   :  { %v12439_v5 = vadd.f32 %v12438_v44, %v12354_v38  ;;  %v16490_v9 = vpop.f32.mrb[139].mxu0  ;;  %v16479_v14 = vpop.f32.mrb[83].mxu1  ;;  %v12937_v44 = vld [vmem:[#allocation9] sm:$0xff] }
0x1aaf   :  { %v12939_v9 = vld [vmem:[#allocation9 + $0x10] sm:$0xff]  ;;  %v12955_v14 = vand.u32 4294901760, %v12937_v44 }
0x1ab0   :  { %v12530_v12 = vadd.f32 %v12529_v32, %v12439_v5  ;;  %v12938_v5 = vld [vmem:[#allocation9 + $0x8] sm:$0xff] }
0x1ab5   :  { %v12609_v13 = vpop.f32.mrb[84].mxu1  ;;  %v12686_v31 = vpop.f32.mrb[140].mxu0 }
0x1ab6   :  { %v12610_v34 = vadd.f32 %v12609_v13, %v12530_v12  ;;  %v16501_v35 = vpop.f32.mrb[85].mxu1  ;;  %v16512_v20 = vpop.f32.mrb[141].mxu0  ;;  %v12958_v12 = vand.u32 4294901760, %v12938_v5  ;;  %v12940_v13 = vld [vmem:[#allocation9 + $0x18] sm:$0xff] }
0x1ab8   :  { %v12687_v30 = vadd.f32 %v12686_v31, %v12610_v34  ;;  %v12961_v31 = vand.u32 4294901760, %v12939_v9  ;;  %v12964_v34 = vand.u32 4294901760, %v12940_v13  ;;  %v19575_v35 = vpack.c.bf16 %v12958_v12, %v12955_v14 }
0x1aba   :  { %v19577_v20 = vpack.c.bf16 %v12964_v34, %v12961_v31  ;;  %17556 = vmatprep.subr.bf16.mxu1 %v19575_v35 }
0x1abb   :  { %17558 = vmatpush3.bf16.msra.mxu1 %v19575_v35 }
0x1abc   :  { %17560 = vmatprep.subr.bf16.mxu1 %v19577_v20 }
0x1abd   :  { %v12769_v36 = vpop.f32.mrb[86].mxu1  ;;  %v12844_v24 = vpop.f32.mrb[142].mxu0 }
0x1abe   :  { %v12770_v18 = vadd.f32 %v12769_v36, %v12687_v30  ;;  %v16523_v50 = vpop.f32.mrb[87].mxu1  ;;  %v16534_v63 = vpop.f32.mrb[143].mxu0  ;;  %v13045_v30 = vsub.f32 %v12937_v44, %v12955_v14  ;;  %v13052_v36 = vsub.f32 %v12938_v5, %v12958_v12 }
0x1abf   :  { %v13059_v63 = vsub.f32 %v12939_v9, %v12961_v31  ;;  %17562 = vmatpush3.bf16.msra.mxu1 %v19577_v20 }
0x1ac0   :  { %v12845_v57 = vadd.f32 %v12844_v24, %v12770_v18  ;;  %v13053_v24 = vand.u32 4294901760, %v13052_v36 }
0x1ac2   :  { %v12848_v40 = vadd.f32 %v19458_v17, %v12845_v57  ;;  %v13054_v50 = vsub.f32 %v13052_v36, %v13053_v24  ;;  %v13066_v57 = vsub.f32 %v12940_v13, %v12964_v34 }
0x1ac4   :  { %17886 = vtanh.f32 %v12848_v40  ;;  %v14088_v33 = vmul.f32 -1.442695, %v12848_v40 }
0x1ac6   :  { %17888 = vpow2.f32 %v14088_v33  ;;  %v13060_v33 = vand.u32 4294901760, %v13059_v63 }
0x1ace   :  { %v17887_v43 = vpop.eup %17886 }
0x1acf   :  { %12858 = vrot.lane.b32.xlu0 %v17887_v43, %s18076_s22  ;;  %v13055_v43 = vand.u32 4294901760, %v13054_v50 }
0x1ad0   :  { %v17889_v45 = vpop.eup %17888 }
0x1ad1   :  { %v12852_v0 = vadd.f32 1.0, %v17889_v45  ;;  %v13067_v45 = vand.u32 4294901760, %v13066_v57 }
0x1ad3   :  { %17890 = vrcp.f32 %v12852_v0 }
0x1add   :  { %v17891_v46 = vpop.eup %17890 }
0x1ade   :  { %v12856_v51 = vmul.f32 %v17891_v46, %v19467_v1 }
0x1b41   :  { %v12859_v48 = vpop.permute.xlu0 %12858 }
0x1b42   :  { %v12861_v16 = vmul.f32 %v17891_v46, %v12859_v48  ;;  %v13068_v48 = vsub.f32 %v13066_v57, %v13067_v45 }
0x1b44   :  { %12863 = vrot.lane.b32.xlu1 %v12861_v16, %s18076_s22 }
0x1bb6   :  { %v12864_v52 = vpop.permute.xlu1 %12863 }
0x1bb7   :  { %v12866_v55 = vadd.f32 %v12864_v52, %v12856_v51  ;;  %v13069_v51 = vand.u32 4294901760, %v13068_v48 }
0x1bb9   :  { %17892 = vtanh.f32 %v12866_v55 }
0x1bc3   :  { %v17893_v17 = vpop.eup %17892 }
0x1bc4   :  { %12869 = vrot.lane.b32.xlu0 %v17893_v17, %s18076_s22  ;;  %v17575_v17 = vpack.c.bf16 %v13066_v57, %v13059_v63 }
0x1be3   :  { %12899 = vadd.xlane.f32.xlu0 %v12898_v11  ;;  %v17591_v11 = vpack.c.bf16 %v13067_v45, %v13060_v33 }
0x1c36   :  { %v12870_v56 = vpop.permute.xlu0 %12869 }
0x1c37   :  { %v12872_v60 = vmul.f32 %v17891_v46, %v12870_v56  ;;  %v13061_v46 = vsub.f32 %v13059_v63, %v13060_v33 }
0x1c39   :  { %12874 = vrot.lane.b32.xlu1 %v12872_v60, %s18079_s4  ;;  %v13062_v16 = vand.u32 4294901760, %v13061_v46 }
0x1c3b   :  { %v17567_v52 = vpack.c.bf16 %v13069_v51, %v13062_v16 }
0x1c70   :  { %v12900_v62 = vpop.xlane.xlu0 %12899 }
0x1c71   :  { %v12905_v4 = vmul.f32 0.03125, %v12900_v62 }
0x1c73   :  { %v12907_v49 = vsub.f32 %v12894_v54, %v12905_v4 }
0x1c75   :  { %v12909_v58 = vmul.f32 %v12907_v49, %v12907_v49 }
0x1c77   :  { %v12911_v1 = vsel %vm679_vm1, %v12909_v58, 0.0 }
0x1c78   :  { %12912 = vadd.xlane.f32.xlu0 %v12911_v1 }
0x1cab   :  { %v12875_v59 = vpop.permute.xlu1 %12874 }
0x1cac   :  { %12877 = vst.msk [vmem:[#allocation2 + $0xe] sm:$0x3] %vm2212_vm3, %v12875_v59  ;;  %12883 = vst.msk [vmem:[#allocation12 + $0x2] sm:$0x3] %vm2212_vm3, %v12875_v59 }
0x1cb3   :  { %v12895_v61 = vld [vmem:[#allocation2 + $0x8] sm:$0xff] }
0x1cb4   :  { %v12901_v2 = vsel %vm679_vm1, %v12895_v61, 0.0 }
0x1cb5   :  { %12902 = vadd.xlane.f32.xlu1 %v12901_v2 }
0x1cc6   :  { %12885 = vrot.lane.b32.xlu1 %v19472_v47, %s18080_s2 }
0x1cca   :  { %12890 = vrot.lane.b32.xlu1 %v12866_v55, %s18080_s2  ;;  %v17571_v55 = vpack.c.bf16 %v13052_v36, %v13045_v30 }
0x1d05   :  { %v12913_v23 = vpop.xlane.xlu0 %12912 }
0x1d06   :  { %v12917_v8 = vmul.f32 0.03125, %v12913_v23 }
0x1d08   :  { %v12919_v15 = vadd.f32 1e-05, %v12917_v8 }
0x1d0a   :  { %17894 = vrsqrt.f32 %v12919_v15 }
0x1d14   :  { %v17895_v39 = vpop.eup %17894 }
0x1d15   :  { %v12923_v41 = vmul.f32 %v17895_v39, %v12907_v49 }
0x1d17   :  { %v12929_v22 = vmul.f32 %v19554_v37, %v12923_v41  ;;  %v13485_v41 = vld [vmem:[%s19673_s9 + $0x8] sm:$0xff] }
0x1d19   :  { %v12935_v26 = vadd.f32 %v19556_v21, %v12929_v22  ;;  %v13505_v22 = vand.u32 4294901760, %v13485_v41 }
0x1d1b   :  { %v12949_v28 = vsel %vm679_vm1, %v12935_v26, 0 }
0x1d1c   :  { %v19561_v29 = vand.u32 4294901760, %v12949_v28 }
0x1d1e   :  { %v19564_v47 = vsub.f32 %v12949_v28, %v19561_v29 }
0x1d20   :  { %v13025_v42 = vand.u32 4294901760, %v19564_v47 }
0x1d22   :  { %v13026_v19 = vsub.f32 %v19564_v47, %v13025_v42 }
0x1d24   :  { %v13027_v6 = vand.u32 4294901760, %v13026_v19 }
0x1d26   :  { %16543 = vmatprep.mubr.f32.mxu1 %v13027_v6 }
0x1d42   :  { %v12903_v7 = vpop.xlane.xlu1 %12902 }
0x1d43   :  { %v12906_v53 = vmul.f32 0.03125, %v12903_v7 }
0x1d45   :  { %v12908_v27 = vsub.f32 %v12895_v61, %v12906_v53 }
0x1d46   :  { %v12886_v3 = vpop.permute.xlu1 %12885 }
0x1d47   :  { %12888 = vst.msk [vmem:[#allocation13 - $0x6] sm:$0xc0] %vm12881_vm4, %v12886_v3  ;;  %v12910_v38 = vmul.f32 %v12908_v27, %v12908_v27 }
0x1d49   :  { %v12914_v25 = vsel %vm679_vm1, %v12910_v38, 0.0 }
0x1d4a   :  { %v12891_v32 = vpop.permute.xlu1 %12890  ;;  %12915 = vadd.xlane.f32.xlu0 %v12914_v25 }
0x1d4b   :  { %12893 = vst.msk [vmem:[#allocation13 + $0x2] sm:$0x3] %vm2212_vm3, %v12891_v32 }
0x1d60   :  { %12878 = vrot.lane.b32.xlu0 %v19477_v10, %s18079_s4  ;;  %v13046_v10 = vand.u32 4294901760, %v13045_v30 }
0x1d62   :  { %v13047_v18 = vsub.f32 %v13045_v30, %v13046_v10  ;;  %v17587_v54 = vpack.c.bf16 %v13053_v24, %v13046_v10 }
0x1d64   :  { %v13048_v40 = vand.u32 4294901760, %v13047_v18  ;;  %v14091_v18 = vld [vmem:[%s19672_s8] ss:$0 sm:$0xff]  ;;  %s18081_s8 = smov [#allocation12]  }
0x1d65   :  { %s14042_s17 = sshll.u32 %s18081_s8, 4  ;;  %s14043_s17 = int_to_ptr.vmem [resolvable:$true] %s14042_s17 }
0x1d66   :  { %v17563_v0 = vpack.c.bf16 %v13055_v43, %v13048_v40  ;;  %s18014_s19 = scalar_lea.vmem %s14043_s17, 64  ;;  %p18019_p13 = scmp.lt.s32.totalorder %s14043_s17, %s14043_s17 }
0x1d67   :  { %p18015_p12 = scmp.ne.s32.totalorder %s14043_s17, %s18014_s19  ;;  %p18020_p0 = scmp.lt.s32.totalorder %s18014_s19, %s18014_s19 }
0x1d68   :  { %17564 = vmatprep.subr.bf16.mxu1 %v17563_v0 }
0x1d69   :  { %p18021_p1 = por %p18020_p0, %p18019_p13 }
0x1d6b   :  { %p18022_p2 = pnand %p18021_p1, %p18015_p12 }
0x1dd7   :  { %v12916_v56 = vpop.xlane.xlu0 %12915 }
0x1dd8   :  { %v12918_v60 = vmul.f32 0.03125, %v12916_v56 }
0x1dda   :  { %v12920_v62 = vadd.f32 1e-05, %v12918_v60 }
0x1ddb   :  { %v12879_v4 = vpop.permute.xlu0 %12878 }
0x1ddc   :  { %17896 = vrsqrt.f32 %v12920_v62  ;;  %12882 = vst.msk [vmem:[#allocation12 - $0x6] sm:$0xc0] %vm12881_vm4, %v12879_v4 }
0x1de6   :  { %v17897_v49 = vpop.eup %17896 }
0x1de7   :  { %v12924_v58 = vmul.f32 %v17897_v49, %v12908_v27 }
0x1de9   :  { %v12930_v1 = vmul.f32 %v19554_v37, %v12924_v58  ;;  %v13484_v37 = vld [vmem:[%s19673_s9] sm:$0xff] }
0x1deb   :  { %v12936_v59 = vadd.f32 %v19556_v21, %v12930_v1  ;;  %v13502_v21 = vand.u32 4294901760, %v13484_v37 }
0x1ded   :  { %v12952_v61 = vsel %vm679_vm1, %v12936_v59, 0  ;;  %v19607_v26 = vpack.c.bf16 %v13505_v22, %v13502_v21  ;;  %v13592_v28 = vsub.f32 %v13484_v37, %v13502_v21 }
0x1dee   :  { %v13033_v2 = vand.u32 4294901760, %v12952_v61 }
0x1def   :  { %17604 = vmatprep.subr.bf16.mxu0 %v19607_v26  ;;  %v13593_v7 = vand.u32 4294901760, %v13592_v28 }
0x1df0   :  { %v13034_v23 = vsub.f32 %v12952_v61, %v13033_v2  ;;  %17606 = vmatpush3.bf16.msra.mxu0 %v19607_v26 }
0x1df1   :  { %v13594_v3 = vsub.f32 %v13592_v28, %v13593_v7 }
0x1df2   :  { %v13035_v8 = vand.u32 4294901760, %v13034_v23 }
0x1df3   :  { %v13595_v44 = vand.u32 4294901760, %v13594_v3 }
0x1df4   :  { %v13036_v15 = vsub.f32 %v13034_v23, %v13035_v8 }
0x1df6   :  { %v13037_v39 = vand.u32 4294901760, %v13036_v15 }
0x1df8   :  { %16544 = vmatmul.mubr.f32.vlgmr.msra.gmra.mrb[88].mxu1 %v13037_v39 }
0x1df9   :  { %17566 = vmatpush3.bf16.msra.mxu1 %v17563_v0  ;;  %16554 = vmatprep.mubr.f32.mxu1 %v19561_v29 }
0x1dfa   :  { %17568 = vmatprep.subr.bf16.mxu1 %v17567_v52 }
0x1dfd   :  { %17570 = vmatpush3.bf16.msra.mxu1 %v17567_v52 }
0x1dfe   :  { %17572 = vmatprep.subr.bf16.mxu1 %v17571_v55 }
0x1e00   :  { %16555 = vmatmul.mubr.f32.vlgmr.msra.gmra.mrb[88].mxu1 %v13033_v2 }
0x1e01   :  { %17574 = vmatpush3.bf16.msra.mxu1 %v17571_v55  ;;  %16565 = vmatprep.mubr.f32.mxu1 %v19564_v47  ;;  %v13599_v47 = vsub.f32 %v13485_v41, %v13505_v22 }
0x1e02   :  { %17576 = vmatprep.subr.bf16.mxu1 %v17575_v17 }
0x1e03   :  { %v13600_v53 = vand.u32 4294901760, %v13599_v47  ;;  %v17619_v30 = vpack.c.bf16 %v13599_v47, %v13592_v28 }
0x1e05   :  { %17578 = vmatpush3.bf16.msra.mxu1 %v17575_v17  ;;  %v13601_v38 = vsub.f32 %v13599_v47, %v13600_v53  ;;  %v17635_v10 = vpack.c.bf16 %v13600_v53, %v13593_v7 }
0x1e06   :  { %17580 = vmatprep.subr.bf16.mxu1 %v19575_v35 }
0x1e07   :  { %v13602_v5 = vand.u32 4294901760, %v13601_v38 }
0x1e08   :  { %16566 = vmatmul.mubr.f32.vlgmr.msra.gmra.mrb[88].mxu1 %v13034_v23 }
0x1e09   :  { %17582 = vmatpush3.bf16.msra.mxu1 %v19575_v35  ;;  %16576 = vmatprep.mubr.f32.mxu1 %v13025_v42  ;;  %v13487_v42 = vld [vmem:[%s19673_s9 + $0x18] sm:$0xff]  ;;  %v17611_v12 = vpack.c.bf16 %v13602_v5, %v13595_v44 }
0x1e0a   :  { %17584 = vmatprep.subr.bf16.mxu1 %v19577_v20  ;;  %v13511_v6 = vand.u32 4294901760, %v13487_v42 }
0x1e0c   :  { %v13613_v32 = vsub.f32 %v13487_v42, %v13511_v6 }
0x1e0d   :  { %17586 = vmatpush3.bf16.msra.mxu1 %v19577_v20 }
0x1e0e   :  { %17588 = vmatprep.subr.bf16.mxu1 %v17587_v54  ;;  %v13614_v14 = vand.u32 4294901760, %v13613_v32 }
0x1e10   :  { %16577 = vmatmul.mubr.f32.vlgmr.msra.gmra.mrb[88].mxu1 %v13035_v8  ;;  %v13615_v31 = vsub.f32 %v13613_v32, %v13614_v14 }
0x1e11   :  { %17590 = vmatpush3.bf16.msra.mxu1 %v17587_v54  ;;  %16587 = vmatprep.mubr.f32.mxu1 %v19561_v29 }
0x1e12   :  { %17592 = vmatprep.subr.bf16.mxu1 %v17591_v11 }
0x1e15   :  { %17594 = vmatpush3.bf16.msra.mxu1 %v17591_v11 }
0x1e16   :  { %17596 = vmatprep.subr.bf16.mxu1 %v19575_v35 }
0x1e18   :  { %16588 = vmatmul.mubr.f32.vlgmr.msra.gmra.mrb[88].mxu1 %v13033_v2 }
0x1e19   :  { %17598 = vmatpush3.bf16.msra.mxu1 %v19575_v35  ;;  %16598 = vmatprep.mubr.f32.mxu1 %v19561_v29  ;;  %v13486_v29 = vld [vmem:[%s19673_s9 + $0x10] sm:$0xff]  ;;  %v13616_v35 = vand.u32 4294901760, %v13615_v31 }
0x1e1a   :  { %17600 = vmatprep.subr.bf16.mxu1 %v19577_v20  ;;  %v13508_v19 = vand.u32 4294901760, %v13486_v29 }
0x1e1c   :  { %v19617_v27 = vpack.c.bf16 %v13511_v6, %v13508_v19  ;;  %v13606_v25 = vsub.f32 %v13486_v29, %v13508_v19 }
0x1e1d   :  { %17602 = vmatpush3.bf16.msra.mxu1 %v19577_v20 }
0x1e1e   :  { %17608 = vmatprep.subr.bf16.mxu0 %v19617_v27  ;;  %v13607_v9 = vand.u32 4294901760, %v13606_v25  ;;  %v17623_v36 = vpack.c.bf16 %v13613_v32, %v13606_v25 }
0x1e1f   :  { %17610 = vmatpush3.bf16.msra.mxu0 %v19617_v27 }
0x1e20   :  { %16599 = vmatmul.mubr.f32.vlgmr.msra.gmra.mrb[88].mxu1 %v13033_v2  ;;  %v13608_v13 = vsub.f32 %v13606_v25, %v13607_v9  ;;  %17612 = vmatprep.subr.bf16.mxu0 %v17611_v12  ;;  %v17639_v24 = vpack.c.bf16 %v13614_v14, %v13607_v9 }
0x1e22   :  { %v13609_v34 = vand.u32 4294901760, %v13608_v13 }
0x1e24   :  { %v17615_v20 = vpack.c.bf16 %v13616_v35, %v13609_v34 }
0x1ef3   :  { %v16600_v50 = vpop.f32.mrb[88].mxu1 }
0x1ef4   :  { %v17655_v63 = vadd.f32 %v16600_v50, %v14091_v18  ;;  %v13472_v57 = vpop.f32.mrb[89].mxu1 }
0x1ef5   :  { %v17656_v40 = vadd.f32 %v14091_v18, %v13472_v57 }
0x1ef6   :  { %v13483_v43 = vmax.f32 %v17655_v63, 0.0 }
0x1ef7   :  { %v13482_v33 = vmax.f32 %v17656_v40, 0.0 }
0x1ef8   :  { %v13499_v45 = vsel %vm679_vm1, %v13483_v43, 0 }
0x1ef9   :  { %v13580_v0 = vand.u32 4294901760, %v13499_v45  ;;  %v13496_v46 = vsel %vm679_vm1, %v13482_v33, 0 }
0x1efa   :  { %v13570_v48 = vand.u32 4294901760, %v13496_v46 }
0x1efb   :  { %v13581_v16 = vsub.f32 %v13499_v45, %v13580_v0 }
0x1efc   :  { %v13571_v51 = vsub.f32 %v13496_v46, %v13570_v48 }
0x1efd   :  { %v13582_v52 = vand.u32 4294901760, %v13581_v16 }
0x1efe   :  { %v13572_v55 = vand.u32 4294901760, %v13571_v51 }
0x1eff   :  { %v13583_v17 = vsub.f32 %v13581_v16, %v13582_v52 }
0x1f00   :  { %v13573_v54 = vsub.f32 %v13571_v51, %v13572_v55 }
0x1f01   :  { %v13584_v56 = vand.u32 4294901760, %v13583_v17 }
0x1f02   :  { %v13574_v11 = vand.u32 4294901760, %v13573_v54 }
0x1f04   :  { %16609 = vmatprep.mubr.f32.mxu0 %v13574_v11 }
0x1f05   :  { %16610 = vmatmul.mubr.f32.vlgmr.msra.gmra.mrb[144].mxu0 %v13584_v56 }
0x1f06   :  { %17614 = vmatpush3.bf16.msra.mxu0 %v17611_v12  ;;  %16620 = vmatprep.mubr.f32.mxu0 %v13570_v48 }
0x1f07   :  { %17616 = vmatprep.subr.bf16.mxu0 %v17615_v20 }
0x1f0a   :  { %17618 = vmatpush3.bf16.msra.mxu0 %v17615_v20 }
0x1f0b   :  { %17620 = vmatprep.subr.bf16.mxu0 %v17619_v30 }
0x1f0d   :  { %16621 = vmatmul.mubr.f32.vlgmr.msra.gmra.mrb[144].mxu0 %v13580_v0 }
0x1f0e   :  { %17622 = vmatpush3.bf16.msra.mxu0 %v17619_v30  ;;  %16631 = vmatprep.mubr.f32.mxu0 %v13571_v51 }
0x1f0f   :  { %17624 = vmatprep.subr.bf16.mxu0 %v17623_v36 }
0x1f12   :  { %17626 = vmatpush3.bf16.msra.mxu0 %v17623_v36 }
0x1f13   :  { %17628 = vmatprep.subr.bf16.mxu0 %v19607_v26 }
0x1f15   :  { %16632 = vmatmul.mubr.f32.vlgmr.msra.gmra.mrb[144].mxu0 %v13581_v16 }
0x1f16   :  { %17630 = vmatpush3.bf16.msra.mxu0 %v19607_v26  ;;  %16642 = vmatprep.mubr.f32.mxu0 %v13572_v55 }
0x1f17   :  { %17632 = vmatprep.subr.bf16.mxu0 %v19617_v27 }
0x1f1a   :  { %17634 = vmatpush3.bf16.msra.mxu0 %v19617_v27 }
0x1f1b   :  { %17636 = vmatprep.subr.bf16.mxu0 %v17635_v10 }
0x1f1d   :  { %16643 = vmatmul.mubr.f32.vlgmr.msra.gmra.mrb[144].mxu0 %v13582_v52 }
0x1f1e   :  { %17638 = vmatpush3.bf16.msra.mxu0 %v17635_v10  ;;  %16653 = vmatprep.mubr.f32.mxu0 %v13570_v48 }
0x1f1f   :  { %17640 = vmatprep.subr.bf16.mxu0 %v17639_v24 }
0x1f22   :  { %17642 = vmatpush3.bf16.msra.mxu0 %v17639_v24 }
0x1f23   :  { %17644 = vmatprep.subr.bf16.mxu0 %v19607_v26 }
0x1f25   :  { %16654 = vmatmul.mubr.f32.vlgmr.msra.gmra.mrb[144].mxu0 %v13580_v0 }
0x1f26   :  { %17646 = vmatpush3.bf16.msra.mxu0 %v19607_v26  ;;  %16664 = vmatprep.mubr.f32.mxu0 %v13570_v48 }
0x1f27   :  { %17648 = vmatprep.subr.bf16.mxu0 %v19617_v27 }
0x1f2a   :  { %17650 = vmatpush3.bf16.msra.mxu0 %v19617_v27 }
0x1f2d   :  { %16665 = vmatmul.mubr.f32.vlgmr.msra.gmra.mrb[144].mxu0 %v13580_v0 }
0x1f2e   :  { %18025 = shalt.err (!%p18022_p2)
}
0x1f2f   :  { %s18026_s3 = scalar_lea.hbm %s19676_s12, 64 }
0x1f30   :  { %p18027_p3 = scmp.ne.s32.totalorder %s19676_s12, %s18026_s3  ;;  %p18030_p4 = scmp.lt.u32.totalorder %s18026_s3, %s19676_s12 }
0x1f32   :  { %p18032_p5 = pnand %p18030_p4, %p18027_p3 }
0x1f34   :  { %18035 = shalt.err (!%p18032_p5)
}
0x1f35   :  { %14045 = dma.vmem_to_hbm [thread:$0]  %s14043_s17, 64, %s19676_s12, [#allocation5]  }
0x1f36   :  { %s18036_s4 = scalar_lea.vmem %s14053_s10, 64  ;;  %p18041_p7 = scmp.lt.s32.totalorder %s14053_s10, %s14053_s10 }
0x1f37   :  { %p18037_p6 = scmp.ne.s32.totalorder %s14053_s10, %s18036_s4  ;;  %p18042_p8 = scmp.lt.s32.totalorder %s18036_s4, %s18036_s4 }
0x1f39   :  { %p18043_p9 = por %p18042_p8, %p18041_p7 }
0x1f3b   :  { %p18044_p10 = pnand %p18043_p9, %p18037_p6 }
0x1f3d   :  { %18047 = shalt.err (!%p18044_p10)
}
0x1f3e   :  { %s18048_s2 = scalar_lea.hbm %s19677_s13, 64 }
0x1f3f   :  { %p18049_p11 = scmp.ne.s32.totalorder %s19677_s13, %s18048_s2  ;;  %p18052_p12 = scmp.lt.u32.totalorder %s18048_s2, %s19677_s13 }
0x1f41   :  { %p18054_p13 = pnand %p18052_p12, %p18049_p11 }
0x1f43   :  { %18057 = shalt.err (!%p18054_p13)
}
0x1f44   :  { %14055 = dma.vmem_to_hbm [thread:$0]  %s14053_s10, 64, %s19677_s13, [#allocation14]   ;;  %v14092_v60 = vld [vmem:[#allocation11] ss:$0 sm:$0xff]  ;;  %vm14031_vm5 = vcmask 64512  }
0x2000   :  { %v16666_v62 = vpop.f32.mrb[144].mxu0 }
0x2001   :  { %v17657_v4 = vadd.f32 %v16666_v62, %v14092_v60  ;;  %v14019_v49 = vpop.f32.mrb[145].mxu0 }
0x2002   :  { %v17658_v58 = vadd.f32 %v14092_v60, %v14019_v49 }
0x2003   :  { %17898 = vtanh.f32 %v17657_v4 }
0x2004   :  { %17900 = vtanh.f32 %v17658_v58 }
0x200d   :  { %v17899_v1 = vpop.eup %17898 }
0x200e   :  { %v17901_v59 = vpop.eup %17900  ;;  %14033 = vst.msk [vmem:[%s19675_s11 + $0x8] sm:$0xff] %vm14031_vm5, %v17899_v1 }
0x200f   :  { %14032 = vst.msk [vmem:[%s19675_s11] sm:$0xff] %vm14031_vm5, %v17901_v59 }
0x2010   :  { %18064 = dma.done.wait [#allocation5], 64  }
0x2011   :  { %18065 = vsyncadd [#allocation5], 4294967232 }
0x2012   :  { %18066 = dma.done.wait [#allocation14], 64  }
0x2013   :  { %18067 = vsyncadd [#allocation14], 4294967232 }
0x2014   :  { %14064 = vsyncpa [#allocation4], 1 }
0x2015   :  { %14065 = vsyncpa [#allocation7], 1 }
0x2016   :  { %14066 = vsyncpa [#allocation10], 1 }
0x2017   :  { %14067 = vsyncpa [#allocation5], 1 }
0x2018   :  { %14068 = vsyncpa [#allocation14], 1 }

</bundles_post_ra>
